<compile_context>
chip_gen: v7x
topology: tpu7x:2x2x1
jax: 0.10.0
libtpu: 0.0.40
codegen_flags: <defaults>
</compile_context>

<pallas_src>
import jax
import jax.numpy as jnp
from jax.experimental import pallas as pl
from jax.experimental.pallas import tpu as pltpu


def _round_up(x, m):
    return (x + m - 1) // m * m


def _leaky_relu(x, slope=0.2):
    return jnp.where(x > 0, x, slope * x)


def disc_kernel(x_ref, w1_ref, b1_ref, w2_ref, b2_ref, w3_ref, b3_ref, o_ref):
    """One batch tile: x (tb, Dp) bf16; all weights resident in VMEM.

    Layers 1-2 run on the MXU in bf16 with f32 accumulation.  Layer 3 has a single
    output column, so it runs as a VPU multiply + cross-lane reduce (XLU) instead of
    a nearly-empty MXU matmul.
    """
    x = x_ref[...]                    # (tb, Dp)   bf16
    b1 = b1_ref[...]                  # (1, 512)   f32  -- read biases once, reuse
    b2 = b2_ref[...]                  # (1, 256)   f32
    b3 = b3_ref[...]                  # (1, 1)     f32
    w3 = w3_ref[...]                  # (1, 256)   f32  (last layer, transposed row)

    h1 = jnp.dot(x, w1_ref[...], preferred_element_type=jnp.float32) + b1
    h1 = _leaky_relu(h1)

    h2 = jnp.dot(h1.astype(jnp.bfloat16), w2_ref[...],
                 preferred_element_type=jnp.float32) + b2
    h2 = _leaky_relu(h2)

    # Layer 3: (tb, 256) -> (tb, 1) via elementwise multiply + lane reduce.
    h3 = jnp.sum(h2 * w3, axis=-1, keepdims=True) + b3

    # Numerically stable sigmoid: exp on the EUP, no overflow for |h3| large.
    z = jnp.exp(-jnp.abs(h3))
    sig = jnp.where(h3 >= 0, 1.0, z) * pl.reciprocal(1.0 + z, approx=False)
    o_ref[...] = sig.astype(o_ref.dtype)


def _build_call(tb, B_p, Dp, h1_dim, h2_dim, out_dim, single_buffer_weights):
    """Construct the pallas_call for a padded (B_p, Dp) input."""

    def const_spec(shape):
        # Constant-index (fully resident) blocks: single-buffer them so the weights
        # are not allocated twice in VMEM (matters for real image sizes on v7x).
        if single_buffer_weights:
            return pl.BlockSpec(shape, lambda i: (0, 0),
                                pipeline_mode=pl.Buffered(1))
        return pl.BlockSpec(shape, lambda i: (0, 0))

    buf = 1 if single_buffer_weights else 2
    vmem_needed = (
        2 * tb * Dp * 2                                       # x tile, double-buffered, bf16
        + 2 * tb * out_dim * 4                                # out tile, double-buffered, f32
        + buf * (Dp * h1_dim + h1_dim * h2_dim) * 2           # w1, w2 (bf16)
        + buf * (h1_dim + 2 * h2_dim + out_dim) * 4           # b1, b2, w3 row, b3 (f32)
        + 2 * tb * (h1_dim + h2_dim) * 4                      # live f32 activations + slack
    )
    # Explicit budget: 2x headroom, floored at 16 MiB, capped at 48 MiB (v7x = 64 MiB VMEM).
    vmem_limit = min(max(int(vmem_needed * 2), 16 << 20), 48 << 20)

    grid = (B_p // tb,)
    return pl.pallas_call(
        disc_kernel,
        out_shape=jax.ShapeDtypeStruct((B_p, out_dim), jnp.float32),
        grid_spec=pltpu.PrefetchScalarGridSpec(
            num_scalar_prefetch=0,
            grid=grid,
            in_specs=[
                pl.BlockSpec((tb, Dp), lambda i: (i, 0)),     # x tile (streamed over batch)
                const_spec((Dp, h1_dim)),                     # w1 (resident)
                const_spec((1, h1_dim)),                      # b1
                const_spec((h1_dim, h2_dim)),                 # w2
                const_spec((1, h2_dim)),                      # b2
                const_spec((1, h2_dim)),                      # w3 (transposed row)
                const_spec((1, out_dim)),                     # b3
            ],
            out_specs=pl.BlockSpec((tb, out_dim), lambda i: (i, 0)),
        ),
        compiler_params=pltpu.CompilerParams(
            dimension_semantics=("parallel",),                # batch tiles independent
            vmem_limit_bytes=vmem_limit,
        ),
    )


def discriminator_forward(x, params, *, tb=None):
    """x: (B, img_dim) float32.  params: w1 (D,512), b1 (1,512), w2 (512,256),
    b2 (1,256), w3 (256,1), b3 (1,1).  Returns (B, 1) float32 probabilities."""
    B, img_dim = x.shape
    h1_dim = params["w1"].shape[1]
    h2_dim = params["w2"].shape[1]
    out_dim = params["w3"].shape[1]
    assert out_dim == 1, "Discriminator head is a single unit"

    # Batch tile: up to 256 rows to fill the MXU (2x256x256 on v6e/v7x); for large
    # batches this also keeps grid >= 2 so v7x's two TensorCores both get work.
    if tb is None:
        tb = min(256, _round_up(B, 8))
    else:
        tb = max(8, _round_up(tb, 8))
    B_p = _round_up(B, tb)                 # pad batch instead of asserting divisibility

    # Lane-align img_dim to 128 (e.g. 784 -> 896): unmasked (8,128) vreg loads for the
    # first (largest) matmul.  Zero padding is exact.
    Dp = _round_up(img_dim, 128)

    # bf16 inputs/weights -> ~3x MXU throughput and half the DMA/VMEM bytes; accumulation
    # stays f32 (preferred_element_type) and bias/activation math stays f32.
    x_p = jnp.zeros((B_p, Dp), jnp.bfloat16).at[:B, :img_dim].set(
        x.astype(jnp.bfloat16))
    w1_p = jnp.zeros((Dp, h1_dim), jnp.bfloat16).at[:img_dim, :].set(
        params["w1"].astype(jnp.bfloat16))
    w2 = params["w2"].astype(jnp.bfloat16)
    b1 = params["b1"].astype(jnp.float32)
    b2 = params["b2"].astype(jnp.float32)
    w3_row = params["w3"].astype(jnp.float32).T          # (1, 256) for the VPU reduce
    b3 = params["b3"].astype(jnp.float32)

    args = (x_p, w1_p, b1, w2, b2, w3_row, b3)

    out, err = None, None
    for single_buf in (True, False):
        try:
            call = _build_call(tb, B_p, Dp, h1_dim, h2_dim, out_dim, single_buf)
            out = jax.block_until_ready(call(*args))
            break
        except Exception as e:   # pl.Buffered(1) not supported on this jax build
            err, out = e, None
    if out is None:
        raise err
    return out[:B]


def init_params(key, img_dim):
    """Deterministic init mimicking PyTorch nn.Linear (uniform +-1/sqrt(fan_in))."""
    dims = [(img_dim, 512), (512, 256), (256, 1)]
    params = {}
    for idx, (fan_in, fan_out) in enumerate(dims, start=1):
        key, kw, kb = jax.random.split(key, 3)
        bound = 1.0 / jnp.sqrt(fan_in)
        params[f"w{idx}"] = jax.random.uniform(
            kw, (fan_in, fan_out), jnp.float32, -bound, bound)
        params[f"b{idx}"] = jax.random.uniform(
            kb, (1, fan_out), jnp.float32, -bound, bound)
    return params


def reference_forward(x, p):
    """Pure-JAX reference at the same precision policy as the kernel
    (bf16 matmuls for layers 1-2 with f32 accumulation, f32 final layer)."""
    h = jnp.dot(x.astype(jnp.bfloat16), p["w1"].astype(jnp.bfloat16),
                preferred_element_type=jnp.float32) + p["b1"]
    h = jnp.where(h > 0, h, 0.2 * h)
    h = jnp.dot(h.astype(jnp.bfloat16), p["w2"].astype(jnp.bfloat16),
                preferred_element_type=jnp.float32) + p["b2"]
    h = jnp.where(h > 0, h, 0.2 * h)
    h = jnp.dot(h, p["w3"]) + p["b3"]
    return jax.nn.sigmoid(h)


if __name__ == "__main__":
    key = jax.random.PRNGKey(0)
    img_dim = 784   # flattened 28x28 image (not a multiple of 128 -> exercises lane padding)
    batch = 12      # not a multiple of 8 -> exercises batch padding

    key, kx, kp = jax.random.split(key, 3)
    x = jax.random.normal(kx, (batch, img_dim), jnp.float32)
    params = init_params(kp, img_dim)

    out = discriminator_forward(x, params)
    out = jax.block_until_ready(out)

    ref = reference_forward(x, params)
    assert out.shape == (batch, 1)
    assert bool(jnp.all(jnp.isfinite(out)))
    assert jnp.allclose(out, ref, atol=1e-3, rtol=1e-3), (
        f"mismatch vs reference, max abs err {jnp.max(jnp.abs(out - ref))}")

    print("KERNEL_OK")
</pallas_src>

<mosaic_0001>
module attributes {stable_mosaic.version = 11 : i64} {
  func.func @disc_kernel(%arg0: i32, %arg1: memref<16x896xbf16, #tpu.memory_space<vmem>>, %arg2: memref<896x512xbf16, #tpu.memory_space<vmem>>, %arg3: memref<1x512xf32, #tpu.memory_space<vmem>>, %arg4: memref<512x256xbf16, #tpu.memory_space<vmem>>, %arg5: memref<1x256xf32, #tpu.memory_space<vmem>>, %arg6: memref<1x256xf32, #tpu.memory_space<vmem>>, %arg7: memref<1x1xf32, #tpu.memory_space<vmem>>, %arg8: memref<16x1xf32, #tpu.memory_space<vmem>>) attributes {dimension_semantics = [#tpu.dimension_semantics<parallel>], iteration_bounds = array<i64: 1>, scalar_prefetch = 0 : i64, scratch_operands = 0 : i64, tpu.core_type = #tpu.core_type<tc>, window_params = [{transform_indices = @transform_0, window_bounds = array<i64: 16, 896>}, {pipeline_mode = #tpu.pipeline_mode<synchronous>, transform_indices = @transform_1, window_bounds = array<i64: 896, 512>}, {pipeline_mode = #tpu.pipeline_mode<synchronous>, transform_indices = @transform_2, window_bounds = array<i64: 1, 512>}, {pipeline_mode = #tpu.pipeline_mode<synchronous>, transform_indices = @transform_3, window_bounds = array<i64: 512, 256>}, {pipeline_mode = #tpu.pipeline_mode<synchronous>, transform_indices = @transform_4, window_bounds = array<i64: 1, 256>}, {pipeline_mode = #tpu.pipeline_mode<synchronous>, transform_indices = @transform_5, window_bounds = array<i64: 1, 256>}, {pipeline_mode = #tpu.pipeline_mode<synchronous>, transform_indices = @transform_6, window_bounds = array<i64: 1, 1>}, {transform_indices = @transform_7, window_bounds = array<i64: 16, 1>}]} {
    %c0 = arith.constant 0 : index
    %c0_0 = arith.constant 0 : index
    %0 = vector.load %arg1[%c0, %c0_0] : memref<16x896xbf16, #tpu.memory_space<vmem>>, vector<16x896xbf16>
    %c0_1 = arith.constant 0 : index
    %c0_2 = arith.constant 0 : index
    %1 = vector.load %arg3[%c0_1, %c0_2] : memref<1x512xf32, #tpu.memory_space<vmem>>, vector<1x512xf32>
    %c0_3 = arith.constant 0 : index
    %c0_4 = arith.constant 0 : index
    %2 = vector.load %arg5[%c0_3, %c0_4] : memref<1x256xf32, #tpu.memory_space<vmem>>, vector<1x256xf32>
    %c0_5 = arith.constant 0 : index
    %c0_6 = arith.constant 0 : index
    %3 = vector.load %arg7[%c0_5, %c0_6] : memref<1x1xf32, #tpu.memory_space<vmem>>, vector<1x1xf32>
    %c0_7 = arith.constant 0 : index
    %c0_8 = arith.constant 0 : index
    %4 = vector.load %arg6[%c0_7, %c0_8] : memref<1x256xf32, #tpu.memory_space<vmem>>, vector<1x256xf32>
    %c0_9 = arith.constant 0 : index
    %c0_10 = arith.constant 0 : index
    %5 = vector.load %arg2[%c0_9, %c0_10] : memref<896x512xbf16, #tpu.memory_space<vmem>>, vector<896x512xbf16>
    %cst = arith.constant dense<0.000000e+00> : vector<16x512xf32>
    %6 = tpu.matmul %0, %5, %cst {dimension_numbers = #tpu.dot_dimension_numbers<[1], [0], [0], [1], [0, 0, 1, 1], [], []>} : vector<16x896xbf16>, vector<896x512xbf16>, vector<16x512xf32> -> vector<16x512xf32>
    %7 = vector.broadcast %1 : vector<1x512xf32> to vector<16x512xf32>
    %8 = arith.addf %6, %7 : vector<16x512xf32>
    %cst_11 = arith.constant 0.000000e+00 : f32
    %9 = vector.broadcast %cst_11 : f32 to vector<16x512xf32>
    %10 = arith.cmpf ogt, %8, %9 : vector<16x512xf32>
    %cst_12 = arith.constant 2.000000e-01 : f32
    %11 = vector.broadcast %cst_12 : f32 to vector<16x512xf32>
    %12 = arith.mulf %11, %8 : vector<16x512xf32>
    %13 = arith.select %10, %8, %12 : vector<16x512xi1>, vector<16x512xf32>
    %14 = arith.truncf %13 : vector<16x512xf32> to vector<16x512xbf16>
    %c0_13 = arith.constant 0 : index
    %c0_14 = arith.constant 0 : index
    %15 = vector.load %arg4[%c0_13, %c0_14] : memref<512x256xbf16, #tpu.memory_space<vmem>>, vector<512x256xbf16>
    %cst_15 = arith.constant dense<0.000000e+00> : vector<16x256xf32>
    %16 = tpu.matmul %14, %15, %cst_15 {dimension_numbers = #tpu.dot_dimension_numbers<[1], [0], [0], [1], [0, 0, 1, 1], [], []>} : vector<16x512xbf16>, vector<512x256xbf16>, vector<16x256xf32> -> vector<16x256xf32>
    %17 = vector.broadcast %2 : vector<1x256xf32> to vector<16x256xf32>
    %18 = arith.addf %16, %17 : vector<16x256xf32>
    %cst_16 = arith.constant 0.000000e+00 : f32
    %19 = vector.broadcast %cst_16 : f32 to vector<16x256xf32>
    %20 = arith.cmpf ogt, %18, %19 : vector<16x256xf32>
    %cst_17 = arith.constant 2.000000e-01 : f32
    %21 = vector.broadcast %cst_17 : f32 to vector<16x256xf32>
    %22 = arith.mulf %21, %18 : vector<16x256xf32>
    %23 = arith.select %20, %18, %22 : vector<16x256xi1>, vector<16x256xf32>
    %24 = vector.broadcast %4 : vector<1x256xf32> to vector<16x256xf32>
    %25 = arith.mulf %23, %24 : vector<16x256xf32>
    %cst_18 = arith.constant dense<0.000000e+00> : vector<16xf32>
    %26 = vector.multi_reduction <add>, %25, %cst_18 [1] : vector<16x256xf32> to vector<16xf32>
    %27 = vector.shape_cast %26 : vector<16xf32> to vector<16x1xf32>
    %28 = vector.broadcast %3 : vector<1x1xf32> to vector<16x1xf32>
    %29 = arith.addf %27, %28 : vector<16x1xf32>
    %30 = math.absf %29 : vector<16x1xf32>
    %cst_19 = arith.constant 0.000000e+00 : f32
    %31 = vector.broadcast %cst_19 : f32 to vector<16x1xf32>
    %32 = arith.subf %31, %30 : vector<16x1xf32>
    %33 = math.exp %32 : vector<16x1xf32>
    %cst_20 = arith.constant 0.000000e+00 : f32
    %34 = vector.broadcast %cst_20 : f32 to vector<16x1xf32>
    %35 = arith.cmpf oge, %29, %34 : vector<16x1xf32>
    %cst_21 = arith.constant 1.000000e+00 : f32
    %36 = vector.broadcast %cst_21 : f32 to vector<16x1xf32>
    %37 = arith.select %35, %36, %33 : vector<16x1xi1>, vector<16x1xf32>
    %cst_22 = arith.constant 1.000000e+00 : f32
    %38 = vector.broadcast %cst_22 : f32 to vector<16x1xf32>
    %39 = arith.addf %38, %33 : vector<16x1xf32>
    %40 = tpu.reciprocal %39 : vector<16x1xf32> -> vector<16x1xf32>
    %41 = arith.mulf %37, %40 : vector<16x1xf32>
    %c0_23 = arith.constant 0 : index
    %c0_24 = arith.constant 0 : index
    %42 = vector.load %arg8[%c0_23, %c0_24] : memref<16x1xf32, #tpu.memory_space<vmem>>, vector<16x1xf32>
    tpu.vector_store %arg8[%c0_23, %c0_24], %41 {strides = array<i32>} : memref<16x1xf32, #tpu.memory_space<vmem>>, vector<16x1xf32>,
    return
  }
  func.func @transform_0(%arg0: i32) -> (i32, i32) {
    %c0_i32 = arith.constant 0 : i32
    %c0_i32_0 = arith.constant 0 : i32
    return %arg0, %c0_i32 : i32, i32
  }
  func.func @transform_1(%arg0: i32) -> (i32, i32) {
    %c0_i32 = arith.constant 0 : i32
    %c0_i32_0 = arith.constant 0 : i32
    %c0_i32_1 = arith.constant 0 : i32
    return %c0_i32, %c0_i32_0 : i32, i32
  }
  func.func @transform_2(%arg0: i32) -> (i32, i32) {
    %c0_i32 = arith.constant 0 : i32
    %c0_i32_0 = arith.constant 0 : i32
    %c0_i32_1 = arith.constant 0 : i32
    return %c0_i32, %c0_i32_0 : i32, i32
  }
  func.func @transform_3(%arg0: i32) -> (i32, i32) {
    %c0_i32 = arith.constant 0 : i32
    %c0_i32_0 = arith.constant 0 : i32
    %c0_i32_1 = arith.constant 0 : i32
    return %c0_i32, %c0_i32_0 : i32, i32
  }
  func.func @transform_4(%arg0: i32) -> (i32, i32) {
    %c0_i32 = arith.constant 0 : i32
    %c0_i32_0 = arith.constant 0 : i32
    %c0_i32_1 = arith.constant 0 : i32
    return %c0_i32, %c0_i32_0 : i32, i32
  }
  func.func @transform_5(%arg0: i32) -> (i32, i32) {
    %c0_i32 = arith.constant 0 : i32
    %c0_i32_0 = arith.constant 0 : i32
    %c0_i32_1 = arith.constant 0 : i32
    return %c0_i32, %c0_i32_0 : i32, i32
  }
  func.func @transform_6(%arg0: i32) -> (i32, i32) {
    %c0_i32 = arith.constant 0 : i32
    %c0_i32_0 = arith.constant 0 : i32
    %c0_i32_1 = arith.constant 0 : i32
    return %c0_i32, %c0_i32_0 : i32, i32
  }
  func.func @transform_7(%arg0: i32) -> (i32, i32) {
    %c0_i32 = arith.constant 0 : i32
    %c0_i32_0 = arith.constant 0 : i32
    return %arg0, %c0_i32 : i32, i32
  }
}

module attributes {stable_mosaic.version = 11 : i64} {
  func.func @disc_kernel(%arg0: i32, %arg1: memref<16x896xbf16, #tpu.memory_space<vmem>>, %arg2: memref<896x512xbf16, #tpu.memory_space<vmem>>, %arg3: memref<1x512xf32, #tpu.memory_space<vmem>>, %arg4: memref<512x256xbf16, #tpu.memory_space<vmem>>, %arg5: memref<1x256xf32, #tpu.memory_space<vmem>>, %arg6: memref<1x256xf32, #tpu.memory_space<vmem>>, %arg7: memref<1x1xf32, #tpu.memory_space<vmem>>, %arg8: memref<16x1xf32, #tpu.memory_space<vmem>>) attributes {dimension_semantics = [#tpu.dimension_semantics<parallel>], iteration_bounds = array<i64: 1>, scalar_prefetch = 0 : i64, scratch_operands = 0 : i64, tpu.core_type = #tpu.core_type<tc>, window_params = [{transform_indices = @transform_0, window_bounds = array<i64: 16, 896>}, {pipeline_mode = #tpu.pipeline_mode<synchronous>, transform_indices = @transform_1, window_bounds = array<i64: 896, 512>}, {pipeline_mode = #tpu.pipeline_mode<synchronous>, transform_indices = @transform_2, window_bounds = array<i64: 1, 512>}, {pipeline_mode = #tpu.pipeline_mode<synchronous>, transform_indices = @transform_3, window_bounds = array<i64: 512, 256>}, {pipeline_mode = #tpu.pipeline_mode<synchronous>, transform_indices = @transform_4, window_bounds = array<i64: 1, 256>}, {pipeline_mode = #tpu.pipeline_mode<synchronous>, transform_indices = @transform_5, window_bounds = array<i64: 1, 256>}, {pipeline_mode = #tpu.pipeline_mode<synchronous>, transform_indices = @transform_6, window_bounds = array<i64: 1, 1>}, {transform_indices = @transform_7, window_bounds = array<i64: 16, 1>}]} {
    %c0 = arith.constant 0 : index
    %c0_0 = arith.constant 0 : index
    %0 = vector.load %arg1[%c0, %c0_0] : memref<16x896xbf16, #tpu.memory_space<vmem>>, vector<16x896xbf16>
    %c0_1 = arith.constant 0 : index
    %c0_2 = arith.constant 0 : index
    %1 = vector.load %arg3[%c0_1, %c0_2] : memref<1x512xf32, #tpu.memory_space<vmem>>, vector<1x512xf32>
    %c0_3 = arith.constant 0 : index
    %c0_4 = arith.constant 0 : index
    %2 = vector.load %arg5[%c0_3, %c0_4] : memref<1x256xf32, #tpu.memory_space<vmem>>, vector<1x256xf32>
    %c0_5 = arith.constant 0 : index
    %c0_6 = arith.constant 0 : index
    %3 = vector.load %arg7[%c0_5, %c0_6] : memref<1x1xf32, #tpu.memory_space<vmem>>, vector<1x1xf32>
    %c0_7 = arith.constant 0 : index
    %c0_8 = arith.constant 0 : index
    %4 = vector.load %arg6[%c0_7, %c0_8] : memref<1x256xf32, #tpu.memory_space<vmem>>, vector<1x256xf32>
    %c0_9 = arith.constant 0 : index
    %c0_10 = arith.constant 0 : index
    %5 = vector.load %arg2[%c0_9, %c0_10] : memref<896x512xbf16, #tpu.memory_space<vmem>>, vector<896x512xbf16>
    %cst = arith.constant dense<0.000000e+00> : vector<16x512xf32>
    %6 = tpu.matmul %0, %5, %cst {dimension_numbers = #tpu.dot_dimension_numbers<[1], [0], [0], [1], [0, 0, 1, 1], [], []>} : vector<16x896xbf16>, vector<896x512xbf16>, vector<16x512xf32> -> vector<16x512xf32>
    %7 = vector.broadcast %1 : vector<1x512xf32> to vector<16x512xf32>
    %8 = arith.addf %6, %7 : vector<16x512xf32>
    %cst_11 = arith.constant 0.000000e+00 : f32
    %9 = vector.broadcast %cst_11 : f32 to vector<16x512xf32>
    %10 = arith.cmpf ogt, %8, %9 : vector<16x512xf32>
    %cst_12 = arith.constant 2.000000e-01 : f32
    %11 = vector.broadcast %cst_12 : f32 to vector<16x512xf32>
    %12 = arith.mulf %11, %8 : vector<16x512xf32>
    %13 = arith.select %10, %8, %12 : vector<16x512xi1>, vector<16x512xf32>
    %14 = arith.truncf %13 : vector<16x512xf32> to vector<16x512xbf16>
    %c0_13 = arith.constant 0 : index
    %c0_14 = arith.constant 0 : index
    %15 = vector.load %arg4[%c0_13, %c0_14] : memref<512x256xbf16, #tpu.memory_space<vmem>>, vector<512x256xbf16>
    %cst_15 = arith.constant dense<0.000000e+00> : vector<16x256xf32>
    %16 = tpu.matmul %14, %15, %cst_15 {dimension_numbers = #tpu.dot_dimension_numbers<[1], [0], [0], [1], [0, 0, 1, 1], [], []>} : vector<16x512xbf16>, vector<512x256xbf16>, vector<16x256xf32> -> vector<16x256xf32>
    %17 = vector.broadcast %2 : vector<1x256xf32> to vector<16x256xf32>
    %18 = arith.addf %16, %17 : vector<16x256xf32>
    %cst_16 = arith.constant 0.000000e+00 : f32
    %19 = vector.broadcast %cst_16 : f32 to vector<16x256xf32>
    %20 = arith.cmpf ogt, %18, %19 : vector<16x256xf32>
    %cst_17 = arith.constant 2.000000e-01 : f32
    %21 = vector.broadcast %cst_17 : f32 to vector<16x256xf32>
    %22 = arith.mulf %21, %18 : vector<16x256xf32>
    %23 = arith.select %20, %18, %22 : vector<16x256xi1>, vector<16x256xf32>
    %24 = vector.broadcast %4 : vector<1x256xf32> to vector<16x256xf32>
    %25 = arith.mulf %23, %24 : vector<16x256xf32>
    %cst_18 = arith.constant dense<0.000000e+00> : vector<16xf32>
    %26 = vector.multi_reduction <add>, %25, %cst_18 [1] : vector<16x256xf32> to vector<16xf32>
    %27 = vector.shape_cast %26 : vector<16xf32> to vector<16x1xf32>
    %28 = vector.broadcast %3 : vector<1x1xf32> to vector<16x1xf32>
    %29 = arith.addf %27, %28 : vector<16x1xf32>
    %30 = math.absf %29 : vector<16x1xf32>
    %cst_19 = arith.constant 0.000000e+00 : f32
    %31 = vector.broadcast %cst_19 : f32 to vector<16x1xf32>
    %32 = arith.subf %31, %30 : vector<16x1xf32>
    %33 = math.exp %32 : vector<16x1xf32>
    %cst_20 = arith.constant 0.000000e+00 : f32
    %34 = vector.broadcast %cst_20 : f32 to vector<16x1xf32>
    %35 = arith.cmpf oge, %29, %34 : vector<16x1xf32>
    %cst_21 = arith.constant 1.000000e+00 : f32
    %36 = vector.broadcast %cst_21 : f32 to vector<16x1xf32>
    %37 = arith.select %35, %36, %33 : vector<16x1xi1>, vector<16x1xf32>
    %cst_22 = arith.constant 1.000000e+00 : f32
    %38 = vector.broadcast %cst_22 : f32 to vector<16x1xf32>
    %39 = arith.addf %38, %33 : vector<16x1xf32>
    %40 = tpu.reciprocal %39 : vector<16x1xf32> -> vector<16x1xf32>
    %41 = arith.mulf %37, %40 : vector<16x1xf32>
    %c0_23 = arith.constant 0 : index
    %c0_24 = arith.constant 0 : index
    %42 = vector.load %arg8[%c0_23, %c0_24] : memref<16x1xf32, #tpu.memory_space<vmem>>, vector<16x1xf32>
    tpu.vector_store %arg8[%c0_23, %c0_24], %41 {strides = array<i32>} : memref<16x1xf32, #tpu.memory_space<vmem>>, vector<16x1xf32>,
    return
  }
  func.func @transform_0(%arg0: i32) -> (i32, i32) {
    %c0_i32 = arith.constant 0 : i32
    %c0_i32_0 = arith.constant 0 : i32
    return %arg0, %c0_i32 : i32, i32
  }
  func.func @transform_1(%arg0: i32) -> (i32, i32) {
    %c0_i32 = arith.constant 0 : i32
    %c0_i32_0 = arith.constant 0 : i32
    %c0_i32_1 = arith.constant 0 : i32
    return %c0_i32, %c0_i32_0 : i32, i32
  }
  func.func @transform_2(%arg0: i32) -> (i32, i32) {
    %c0_i32 = arith.constant 0 : i32
    %c0_i32_0 = arith.constant 0 : i32
    %c0_i32_1 = arith.constant 0 : i32
    return %c0_i32, %c0_i32_0 : i32, i32
  }
  func.func @transform_3(%arg0: i32) -> (i32, i32) {
    %c0_i32 = arith.constant 0 : i32
    %c0_i32_0 = arith.constant 0 : i32
    %c0_i32_1 = arith.constant 0 : i32
    return %c0_i32, %c0_i32_0 : i32, i32
  }
  func.func @transform_4(%arg0: i32) -> (i32, i32) {
    %c0_i32 = arith.constant 0 : i32
    %c0_i32_0 = arith.constant 0 : i32
    %c0_i32_1 = arith.constant 0 : i32
    return %c0_i32, %c0_i32_0 : i32, i32
  }
  func.func @transform_5(%arg0: i32) -> (i32, i32) {
    %c0_i32 = arith.constant 0 : i32
    %c0_i32_0 = arith.constant 0 : i32
    %c0_i32_1 = arith.constant 0 : i32
    return %c0_i32, %c0_i32_0 : i32, i32
  }
  func.func @transform_6(%arg0: i32) -> (i32, i32) {
    %c0_i32 = arith.constant 0 : i32
    %c0_i32_0 = arith.constant 0 : i32
    %c0_i32_1 = arith.constant 0 : i32
    return %c0_i32, %c0_i32_0 : i32, i32
  }
  func.func @transform_7(%arg0: i32) -> (i32, i32) {
    %c0_i32 = arith.constant 0 : i32
    %c0_i32_0 = arith.constant 0 : i32
    return %arg0, %c0_i32 : i32, i32
  }
}

</mosaic_0001>

<bundles_post_ra>
// kernel: tpu_custom_call.1
= control target key start
LH: loop header
LB: loop body
LE: loop exit
PB: predicated region body
PF: predicated region fallthrough
CT: control target
= control target key end

     0   :  { %s3422_s0 = inlined_call_operand.hbm [shape: bf16[16,896], index: 0, kind: input, shape index: {}]   ;;  %s3423_s1 = inlined_call_operand.hbm [shape: bf16[896,512], index: 1, kind: input, shape index: {}]   ;;  %s3424_s2 = inlined_call_operand.vmem [shape: f32[1,512], index: 2, kind: input, shape index: {}]   ;;  %s3425_s3 = inlined_call_operand.hbm [shape: bf16[512,256], index: 3, kind: input, shape index: {}]   ;;  %s3426_s4 = inlined_call_operand.vmem [shape: f32[1,256], index: 4, kind: input, shape index: {}]   ;;  %s3427_s5 = inlined_call_operand.vmem [shape: f32[1,256], index: 5, kind: input, shape index: {}]   ;;  %s3428_s6 = inlined_call_operand.<no memory space> [shape: f32[1,1], index: 6, kind: input, shape index: {}]   ;;  %s3429_s7 = inlined_call_operand.vmem [shape: f32[16,1], index: 7, kind: output, shape index: {}]  }
   0x1   :  { %v12_v0 = vstv %s3428_s6 }
   0x2   :  { %13 = vst [vmem:[#allocation2] sm:$0x1] %v12_v0 }
   0x3   :  { %14 = vsyncpa [#allocation4], 0 }
   0x4   :  { %15 = vsyncpa [#allocation6], 0  ;;  %s3270_s26 = smov [#allocation5]   ;;  %s3200_s30 = scalar_lea.hbm %s3423_s1, 28672 }
   0x5   :  { %s33_s27 = sshll.u32 %s3270_s26, 4  ;;  %p3201_p0 = scmp.ne.s32.totalorder %s3423_s1, %s3200_s30  ;;  %s34_s27 = int_to_ptr.vmem [resolvable:$true] %s33_s27 }
   0x6   :  { %p3204_p1 = scmp.lt.u32.totalorder %s3200_s30, %s3423_s1 }
   0x8   :  { %p3206_p2 = pnand %p3204_p1, %p3201_p0 }
   0xa   :  { %3209 = shalt.err (!%p3206_p2)
}
   0xb   :  { %s3210_s6 = scalar_lea.vmem %s34_s27, 28672  ;;  %p3215_p4 = scmp.lt.s32.totalorder %s34_s27, %s34_s27 }
   0xc   :  { %p3211_p3 = scmp.ne.s32.totalorder %s34_s27, %s3210_s6  ;;  %p3216_p5 = scmp.lt.s32.totalorder %s3210_s6, %s3210_s6 }
   0xe   :  { %p3217_p6 = por %p3216_p5, %p3215_p4 }
  0x10   :  { %p3218_p7 = pnand %p3217_p6, %p3211_p3 }
  0x12   :  { %3221 = shalt.err (!%p3218_p7)
}
  0x13   :  { %s3271_s12 = smov 256   ;;  %s3272_s13 = smov 16  }
  0x14   :  { %39 = dma.hbm_to_vmem [thread:$0]  %s3423_s1, 28672, %s34_s27, [#allocation6], %s3271_s12, %s3271_s12, %s3272_s13  }
  0x15   :  { %s3273_s16 = smov [#allocation3]   ;;  %s3222_s20 = scalar_lea.hbm %s3422_s0, 896 }
  0x16   :  { %s21_s17 = sshll.u32 %s3273_s16, 4  ;;  %p3223_p8 = scmp.ne.s32.totalorder %s3422_s0, %s3222_s20  ;;  %s22_s17 = int_to_ptr.vmem [resolvable:$true] %s21_s17 }
  0x17   :  { %p3226_p9 = scmp.lt.u32.totalorder %s3222_s20, %s3422_s0 }
  0x19   :  { %p3228_p10 = pnand %p3226_p9, %p3223_p8 }
  0x1b   :  { %3231 = shalt.err (!%p3228_p10)
}
  0x1c   :  { %s3232_s25 = scalar_lea.vmem %s22_s17, 896  ;;  %p3237_p12 = scmp.lt.s32.totalorder %s22_s17, %s22_s17 }
  0x1d   :  { %p3233_p11 = scmp.ne.s32.totalorder %s22_s17, %s3232_s25  ;;  %p3238_p13 = scmp.lt.s32.totalorder %s3232_s25, %s3232_s25 }
  0x1f   :  { %p3239_p0 = por %p3238_p13, %p3237_p12 }
  0x21   :  { %p3240_p1 = pnand %p3239_p0, %p3233_p11 }
  0x23   :  { %3243 = shalt.err (!%p3240_p1)
}
  0x24   :  { %s3274_s1 = smov 448   ;;  %s3275_s26 = smov 28  }
  0x25   :  { %27 = dma.hbm_to_vmem [thread:$0]  %s3422_s0, 896, %s22_s17, [#allocation4], %s3274_s1, %s3274_s1, %s3275_s26  }
  0x26   :  { %s3276_s29 = smov [#allocation7]   ;;  %s3244_s10 = scalar_lea.hbm %s3425_s3, 8192 }
  0x27   :  { %s47_s30 = sshll.u32 %s3276_s29, 4  ;;  %p3245_p2 = scmp.ne.s32.totalorder %s3425_s3, %s3244_s10  ;;  %s48_s30 = int_to_ptr.vmem [resolvable:$true] %s47_s30 }
  0x28   :  { %p3248_p3 = scmp.lt.u32.totalorder %s3244_s10, %s3425_s3 }
  0x2a   :  { %p3250_p4 = pnand %p3248_p3, %p3245_p2 }
  0x2c   :  { %3253 = shalt.err (!%p3250_p4)
}
  0x2d   :  { %s3254_s14 = scalar_lea.vmem %s48_s30, 8192  ;;  %p3259_p6 = scmp.lt.s32.totalorder %s48_s30, %s48_s30 }
  0x2e   :  { %p3255_p5 = scmp.ne.s32.totalorder %s48_s30, %s3254_s14  ;;  %p3260_p7 = scmp.lt.s32.totalorder %s3254_s14, %s3254_s14 }
  0x30   :  { %p3261_p8 = por %p3260_p7, %p3259_p6 }
  0x32   :  { %p3262_p9 = pnand %p3261_p8, %p3255_p5 }
  0x34   :  { %3265 = shalt.err (!%p3262_p9)
}
  0x35   :  { %s3277_s0 = smov 128   ;;  %s3278_s15 = smov 8  }
  0x36   :  { %53 = dma.hbm_to_vmem [thread:$0]  %s3425_s3, 8192, %s48_s30, [#allocation6], %s3277_s0, %s3277_s0, %s3278_s15  }
  0x37   :  { %3266 = dma.done.wait [#allocation4], 896  }
  0x38   :  { %3267 = vsyncadd [#allocation4], 4294966400 }
  0x39   :  { %3268 = dma.done.wait [#allocation6], 36864  }
  0x3a   :  { %3269 = vsyncadd [#allocation6], 4294930432  ;;  %v2750_v1 = vld [vmem:[#allocation5 + $0x4] ss:$16 sps:$4 sm:$0xff]   ;;  %v2754_v3 = vld [vmem:[#allocation5] ss:$16 sps:$4 sm:$0xff]  }
  0x3b   :  { %v2752_v2 = vld [vmem:[#allocation5 + $0x204] ss:$16 sps:$4 sm:$0xff]   ;;  %1483 = vmatprep.subr.bf16.mxu1 %v2750_v1  ;;  %v2755_v4 = vld [vmem:[#allocation5 + $0x200] ss:$16 sps:$4 sm:$0xff]   ;;  %v2848_v50 = vld [vmem:[#allocation3 + $0x4] ss:$28 sps:$4 sm:$0xff]  }
  0x3c   :  { %1526 = vmatprep.subr.bf16.mxu0 %v2752_v2  ;;  %v2756_v5 = vld [vmem:[#allocation5 + $0x24] ss:$16 sps:$4 sm:$0xff]   ;;  %1484 = vmatpush1.bf16.msra.mxu1 %v2754_v3  ;;  %v2760_v7 = vld [vmem:[#allocation5 + $0x20] ss:$16 sps:$4 sm:$0xff]   ;;  %vm2395_vm13 = vcmask 7168  }
  0x3d   :  { %1527 = vmatpush1.bf16.msra.mxu0 %v2755_v4  ;;  %v2758_v6 = vld [vmem:[#allocation5 + $0x224] ss:$16 sps:$4 sm:$0xff]   ;;  %1485 = vmatprep.subr.bf16.mxu1 %v2756_v5  ;;  %v2761_v8 = vld [vmem:[#allocation5 + $0x220] ss:$16 sps:$4 sm:$0xff]   ;;  %v2857_v4 = vld [vmem:[#allocation5 + $0xc] ss:$16 sps:$4 sm:$0xff]  }
  0x3e   :  { %1528 = vmatprep.subr.bf16.mxu0 %v2758_v6  ;;  %v2762_v9 = vld [vmem:[#allocation5 + $0x44] ss:$16 sps:$4 sm:$0xff]   ;;  %v2766_v11 = vld [vmem:[#allocation5 + $0x40] ss:$16 sps:$4 sm:$0xff]   ;;  %1515 = vmatprep.mubr.bf16.mxu1 %v2848_v50 }
  0x3f   :  { %v2764_v10 = vld [vmem:[#allocation5 + $0x244] ss:$16 sps:$4 sm:$0xff]   ;;  %v2767_v12 = vld [vmem:[#allocation5 + $0x240] ss:$16 sps:$4 sm:$0xff]  }
  0x40   :  { %1486 = vmatpush1.bf16.msra.mxu1 %v2760_v7  ;;  %v2768_v13 = vld [vmem:[#allocation5 + $0x64] ss:$16 sps:$4 sm:$0xff]   ;;  %v2772_v15 = vld [vmem:[#allocation5 + $0x60] ss:$16 sps:$4 sm:$0xff]  }
  0x41   :  { %1529 = vmatpush1.bf16.msra.mxu0 %v2761_v8  ;;  %1487 = vmatprep.subr.bf16.mxu1 %v2762_v9  ;;  %v2770_v14 = vld [vmem:[#allocation5 + $0x264] ss:$16 sps:$4 sm:$0xff]   ;;  %v2773_v16 = vld [vmem:[#allocation5 + $0x260] ss:$16 sps:$4 sm:$0xff]   ;;  %v2855_v8 = vld [vmem:[#allocation5 + $0x8] ss:$16 sps:$4 sm:$0xff]  }
  0x42   :  { %1530 = vmatprep.subr.bf16.mxu0 %v2764_v10  ;;  %v2774_v17 = vld [vmem:[#allocation5 + $0x84] ss:$16 sps:$4 sm:$0xff]   ;;  %v2778_v19 = vld [vmem:[#allocation5 + $0x80] ss:$16 sps:$4 sm:$0xff]   ;;  %v2863_v10 = vld [vmem:[#allocation5 + $0x2c] ss:$16 sps:$4 sm:$0xff]  }
  0x43   :  { %v2776_v18 = vld [vmem:[#allocation5 + $0x284] ss:$16 sps:$4 sm:$0xff]   ;;  %v2779_v20 = vld [vmem:[#allocation5 + $0x280] ss:$16 sps:$4 sm:$0xff]  }
  0x44   :  { %1488 = vmatpush1.bf16.msra.mxu1 %v2766_v11  ;;  %v2780_v21 = vld [vmem:[#allocation5 + $0xa4] ss:$16 sps:$4 sm:$0xff]   ;;  %v2784_v23 = vld [vmem:[#allocation5 + $0xa0] ss:$16 sps:$4 sm:$0xff]  }
  0x45   :  { %1531 = vmatpush1.bf16.msra.mxu0 %v2767_v12  ;;  %1489 = vmatprep.subr.bf16.mxu1 %v2768_v13  ;;  %v2782_v22 = vld [vmem:[#allocation5 + $0x2a4] ss:$16 sps:$4 sm:$0xff]   ;;  %v2785_v24 = vld [vmem:[#allocation5 + $0x2a0] ss:$16 sps:$4 sm:$0xff]   ;;  %v2861_v12 = vld [vmem:[#allocation5 + $0x28] ss:$16 sps:$4 sm:$0xff]  }
  0x46   :  { %1532 = vmatprep.subr.bf16.mxu0 %v2770_v14  ;;  %v2786_v25 = vld [vmem:[#allocation5 + $0xc4] ss:$16 sps:$4 sm:$0xff]   ;;  %v2790_v27 = vld [vmem:[#allocation5 + $0xc0] ss:$16 sps:$4 sm:$0xff]   ;;  %v2869_v14 = vld [vmem:[#allocation5 + $0x4c] ss:$16 sps:$4 sm:$0xff]  }
  0x47   :  { %v2788_v26 = vld [vmem:[#allocation5 + $0x2c4] ss:$16 sps:$4 sm:$0xff]   ;;  %v2791_v28 = vld [vmem:[#allocation5 + $0x2c0] ss:$16 sps:$4 sm:$0xff]  }
  0x48   :  { %1490 = vmatpush1.bf16.msra.mxu1 %v2772_v15  ;;  %v2792_v29 = vld [vmem:[#allocation5 + $0xe4] ss:$16 sps:$4 sm:$0xff]   ;;  %v2796_v31 = vld [vmem:[#allocation5 + $0xe0] ss:$16 sps:$4 sm:$0xff]  }
  0x49   :  { %1533 = vmatpush1.bf16.msra.mxu0 %v2773_v16  ;;  %1491 = vmatprep.subr.bf16.mxu1 %v2774_v17  ;;  %v2794_v30 = vld [vmem:[#allocation5 + $0x2e4] ss:$16 sps:$4 sm:$0xff]   ;;  %v2797_v32 = vld [vmem:[#allocation5 + $0x2e0] ss:$16 sps:$4 sm:$0xff]   ;;  %v2867_v16 = vld [vmem:[#allocation5 + $0x48] ss:$16 sps:$4 sm:$0xff]  }
  0x4a   :  { %1534 = vmatprep.subr.bf16.mxu0 %v2776_v18  ;;  %v2798_v33 = vld [vmem:[#allocation5 + $0x104] ss:$16 sps:$4 sm:$0xff]   ;;  %v2802_v35 = vld [vmem:[#allocation5 + $0x100] ss:$16 sps:$4 sm:$0xff]   ;;  %v2875_v18 = vld [vmem:[#allocation5 + $0x6c] ss:$16 sps:$4 sm:$0xff]  }
  0x4b   :  { %v2800_v34 = vld [vmem:[#allocation5 + $0x304] ss:$16 sps:$4 sm:$0xff]   ;;  %v2803_v36 = vld [vmem:[#allocation5 + $0x300] ss:$16 sps:$4 sm:$0xff]  }
  0x4c   :  { %1492 = vmatpush1.bf16.msra.mxu1 %v2778_v19  ;;  %v2804_v37 = vld [vmem:[#allocation5 + $0x124] ss:$16 sps:$4 sm:$0xff]   ;;  %v2808_v39 = vld [vmem:[#allocation5 + $0x120] ss:$16 sps:$4 sm:$0xff]  }
  0x4d   :  { %1535 = vmatpush1.bf16.msra.mxu0 %v2779_v20  ;;  %1493 = vmatprep.subr.bf16.mxu1 %v2780_v21  ;;  %v2806_v38 = vld [vmem:[#allocation5 + $0x324] ss:$16 sps:$4 sm:$0xff]   ;;  %v2809_v40 = vld [vmem:[#allocation5 + $0x320] ss:$16 sps:$4 sm:$0xff]   ;;  %v2873_v20 = vld [vmem:[#allocation5 + $0x68] ss:$16 sps:$4 sm:$0xff]  }
  0x4e   :  { %1536 = vmatprep.subr.bf16.mxu0 %v2782_v22  ;;  %v2810_v41 = vld [vmem:[#allocation5 + $0x144] ss:$16 sps:$4 sm:$0xff]   ;;  %v2814_v43 = vld [vmem:[#allocation5 + $0x140] ss:$16 sps:$4 sm:$0xff]   ;;  %v2881_v22 = vld [vmem:[#allocation5 + $0x8c] ss:$16 sps:$4 sm:$0xff]  }
  0x4f   :  { %v2812_v42 = vld [vmem:[#allocation5 + $0x344] ss:$16 sps:$4 sm:$0xff]   ;;  %v2815_v44 = vld [vmem:[#allocation5 + $0x340] ss:$16 sps:$4 sm:$0xff]  }
  0x50   :  { %1494 = vmatpush1.bf16.msra.mxu1 %v2784_v23  ;;  %v2816_v45 = vld [vmem:[#allocation5 + $0x164] ss:$16 sps:$4 sm:$0xff]   ;;  %v2820_v47 = vld [vmem:[#allocation5 + $0x160] ss:$16 sps:$4 sm:$0xff]  }
  0x51   :  { %1537 = vmatpush1.bf16.msra.mxu0 %v2785_v24  ;;  %1495 = vmatprep.subr.bf16.mxu1 %v2786_v25  ;;  %v2818_v46 = vld [vmem:[#allocation5 + $0x364] ss:$16 sps:$4 sm:$0xff]   ;;  %v2821_v48 = vld [vmem:[#allocation5 + $0x360] ss:$16 sps:$4 sm:$0xff]   ;;  %v2879_v24 = vld [vmem:[#allocation5 + $0x88] ss:$16 sps:$4 sm:$0xff]  }
  0x52   :  { %1538 = vmatprep.subr.bf16.mxu0 %v2788_v26  ;;  %v2822_v49 = vld [vmem:[#allocation5 + $0x184] ss:$16 sps:$4 sm:$0xff]   ;;  %v2826_v53 = vld [vmem:[#allocation5 + $0x180] ss:$16 sps:$4 sm:$0xff]   ;;  %v2887_v26 = vld [vmem:[#allocation5 + $0xac] ss:$16 sps:$4 sm:$0xff]  }
  0x53   :  { %v2824_v51 = vld [vmem:[#allocation5 + $0x384] ss:$16 sps:$4 sm:$0xff]   ;;  %v2827_v54 = vld [vmem:[#allocation5 + $0x380] ss:$16 sps:$4 sm:$0xff]  }
  0x54   :  { %1496 = vmatpush1.bf16.msra.mxu1 %v2790_v27  ;;  %v3359_v52 = vld [vmem:[#allocation3 + $0xc] ss:$28 sps:$4 sm:$0xff]   ;;  %v3362_v5 = vld [vmem:[#allocation3] ss:$28 sps:$4 sm:$0xff]  }
  0x55   :  { %1539 = vmatpush1.bf16.msra.mxu0 %v2791_v28  ;;  %1497 = vmatprep.subr.bf16.mxu1 %v2792_v29  ;;  %v2828_v55 = vld [vmem:[#allocation5 + $0x1a4] ss:$16 sps:$4 sm:$0xff]   ;;  %v2832_v57 = vld [vmem:[#allocation5 + $0x1a0] ss:$16 sps:$4 sm:$0xff]   ;;  %v2885_v28 = vld [vmem:[#allocation5 + $0xa8] ss:$16 sps:$4 sm:$0xff]  }
  0x56   :  { %1540 = vmatprep.subr.bf16.mxu0 %v2794_v30  ;;  %1558 = vmatprep.mubr.bf16.mxu0 %v3359_v52  ;;  %v2830_v56 = vld [vmem:[#allocation5 + $0x3a4] ss:$16 sps:$4 sm:$0xff]   ;;  %v2833_v58 = vld [vmem:[#allocation5 + $0x3a0] ss:$16 sps:$4 sm:$0xff]   ;;  %v2893_v30 = vld [vmem:[#allocation5 + $0xcc] ss:$16 sps:$4 sm:$0xff]  }
  0x57   :  { %v2834_v59 = vld [vmem:[#allocation5 + $0x1c4] ss:$16 sps:$4 sm:$0xff]   ;;  %v2838_v61 = vld [vmem:[#allocation5 + $0x1c0] ss:$16 sps:$4 sm:$0xff]  }
  0x58   :  { %1498 = vmatpush1.bf16.msra.mxu1 %v2796_v31  ;;  %v2836_v60 = vld [vmem:[#allocation5 + $0x3c4] ss:$16 sps:$4 sm:$0xff]   ;;  %v2839_v62 = vld [vmem:[#allocation5 + $0x3c0] ss:$16 sps:$4 sm:$0xff]  }
  0x59   :  { %1541 = vmatpush1.bf16.msra.mxu0 %v2797_v32  ;;  %1499 = vmatprep.subr.bf16.mxu1 %v2798_v33  ;;  %v2840_v63 = vld [vmem:[#allocation5 + $0x1e4] ss:$16 sps:$4 sm:$0xff]   ;;  %v2844_v1 = vld [vmem:[#allocation5 + $0x1e0] ss:$16 sps:$4 sm:$0xff]   ;;  %v2891_v32 = vld [vmem:[#allocation5 + $0xc8] ss:$16 sps:$4 sm:$0xff]  }
  0x5a   :  { %1542 = vmatprep.subr.bf16.mxu0 %v2800_v34  ;;  %v2842_v0 = vld [vmem:[#allocation5 + $0x3e4] ss:$16 sps:$4 sm:$0xff]   ;;  %v2845_v2 = vld [vmem:[#allocation5 + $0x3e0] ss:$16 sps:$4 sm:$0xff]   ;;  %v2899_v34 = vld [vmem:[#allocation5 + $0xec] ss:$16 sps:$4 sm:$0xff]  }
  0x5b   :  { %v2854_v3 = vld [vmem:[#allocation5 + $0x404] ss:$16 sps:$4 sm:$0xff]   ;;  %v3364_v6 = vld [vmem:[#allocation3 + $0x8] ss:$28 sps:$4 sm:$0xff]  }
  0x5c   :  { %1500 = vmatpush1.bf16.msra.mxu1 %v2802_v35  ;;  %v2852_v7 = vld [vmem:[#allocation5 + $0x400] ss:$16 sps:$4 sm:$0xff]   ;;  %v2860_v9 = vld [vmem:[#allocation5 + $0x424] ss:$16 sps:$4 sm:$0xff]   ;;  %v3368_v35 = vld [vmem:[#allocation3 + $0x14] ss:$28 sps:$4 sm:$0xff]  }
  0x5d   :  { %1543 = vmatpush1.bf16.msra.mxu0 %v2803_v36  ;;  %1501 = vmatprep.subr.bf16.mxu1 %v2804_v37  ;;  %v2858_v11 = vld [vmem:[#allocation5 + $0x420] ss:$16 sps:$4 sm:$0xff]   ;;  %v2866_v13 = vld [vmem:[#allocation5 + $0x444] ss:$16 sps:$4 sm:$0xff]   ;;  %v2897_v37 = vld [vmem:[#allocation5 + $0xe8] ss:$16 sps:$4 sm:$0xff]  }
  0x5e   :  { %1544 = vmatprep.subr.bf16.mxu0 %v2806_v38  ;;  %v2864_v15 = vld [vmem:[#allocation5 + $0x440] ss:$16 sps:$4 sm:$0xff]   ;;  %v2872_v17 = vld [vmem:[#allocation5 + $0x464] ss:$16 sps:$4 sm:$0xff]  }
  0x5f   :  { %v2870_v19 = vld [vmem:[#allocation5 + $0x460] ss:$16 sps:$4 sm:$0xff]   ;;  %v2878_v21 = vld [vmem:[#allocation5 + $0x484] ss:$16 sps:$4 sm:$0xff]  }
  0x60   :  { %1502 = vmatpush1.bf16.msra.mxu1 %v2808_v39  ;;  %v2876_v23 = vld [vmem:[#allocation5 + $0x480] ss:$16 sps:$4 sm:$0xff]   ;;  %v2884_v25 = vld [vmem:[#allocation5 + $0x4a4] ss:$16 sps:$4 sm:$0xff]   ;;  %v2905_v39 = vld [vmem:[#allocation5 + $0x10c] ss:$16 sps:$4 sm:$0xff]  }
  0x61   :  { %1545 = vmatpush1.bf16.msra.mxu0 %v2809_v40  ;;  %1503 = vmatprep.subr.bf16.mxu1 %v2810_v41  ;;  %v2882_v27 = vld [vmem:[#allocation5 + $0x4a0] ss:$16 sps:$4 sm:$0xff]   ;;  %v2890_v29 = vld [vmem:[#allocation5 + $0x4c4] ss:$16 sps:$4 sm:$0xff]   ;;  %v2903_v41 = vld [vmem:[#allocation5 + $0x108] ss:$16 sps:$4 sm:$0xff]  }
  0x62   :  { %1546 = vmatprep.subr.bf16.mxu0 %v2812_v42  ;;  %v2888_v31 = vld [vmem:[#allocation5 + $0x4c0] ss:$16 sps:$4 sm:$0xff]   ;;  %v2896_v33 = vld [vmem:[#allocation5 + $0x4e4] ss:$16 sps:$4 sm:$0xff]  }
  0x63   :  { %v2894_v36 = vld [vmem:[#allocation5 + $0x4e0] ss:$16 sps:$4 sm:$0xff]   ;;  %v2902_v38 = vld [vmem:[#allocation5 + $0x504] ss:$16 sps:$4 sm:$0xff]  }
  0x64   :  { %1504 = vmatpush1.bf16.msra.mxu1 %v2814_v43  ;;  %v2900_v40 = vld [vmem:[#allocation5 + $0x500] ss:$16 sps:$4 sm:$0xff]   ;;  %v2908_v42 = vld [vmem:[#allocation5 + $0x524] ss:$16 sps:$4 sm:$0xff]   ;;  %v2911_v43 = vld [vmem:[#allocation5 + $0x12c] ss:$16 sps:$4 sm:$0xff]  }
  0x65   :  { %1547 = vmatpush1.bf16.msra.mxu0 %v2815_v44  ;;  %1505 = vmatprep.subr.bf16.mxu1 %v2816_v45  ;;  %v2906_v44 = vld [vmem:[#allocation5 + $0x520] ss:$16 sps:$4 sm:$0xff]   ;;  %v2909_v45 = vld [vmem:[#allocation5 + $0x128] ss:$16 sps:$4 sm:$0xff]  }
  0x66   :  { %1548 = vmatprep.subr.bf16.mxu0 %v2818_v46  ;;  %v2914_v46 = vld [vmem:[#allocation5 + $0x544] ss:$16 sps:$4 sm:$0xff]  }
  0x68   :  { %1506 = vmatpush1.bf16.msra.mxu1 %v2820_v47  ;;  %v2917_v47 = vld [vmem:[#allocation5 + $0x14c] ss:$16 sps:$4 sm:$0xff]  }
  0x69   :  { %1549 = vmatpush1.bf16.msra.mxu0 %v2821_v48  ;;  %1507 = vmatprep.subr.bf16.mxu1 %v2822_v49  ;;  %v2912_v48 = vld [vmem:[#allocation5 + $0x540] ss:$16 sps:$4 sm:$0xff]   ;;  %v2915_v49 = vld [vmem:[#allocation5 + $0x148] ss:$16 sps:$4 sm:$0xff]  }
  0x6a   :  { %1550 = vmatprep.subr.bf16.mxu0 %v2824_v51  ;;  %v2923_v51 = vld [vmem:[#allocation5 + $0x16c] ss:$16 sps:$4 sm:$0xff]  }
  0x6c   :  { %1508 = vmatpush1.bf16.msra.mxu1 %v2826_v53  ;;  %v2918_v53 = vld [vmem:[#allocation5 + $0x560] ss:$16 sps:$4 sm:$0xff]  }
  0x6d   :  { %1551 = vmatpush1.bf16.msra.mxu0 %v2827_v54  ;;  %1509 = vmatprep.subr.bf16.mxu1 %v2828_v55  ;;  %v2921_v54 = vld [vmem:[#allocation5 + $0x168] ss:$16 sps:$4 sm:$0xff]   ;;  %v2926_v55 = vld [vmem:[#allocation5 + $0x584] ss:$16 sps:$4 sm:$0xff]  }
  0x6e   :  { %1552 = vmatprep.subr.bf16.mxu0 %v2830_v56  ;;  %v2929_v56 = vld [vmem:[#allocation5 + $0x18c] ss:$16 sps:$4 sm:$0xff]  }
  0x70   :  { %1510 = vmatpush1.bf16.msra.mxu1 %v2832_v57  ;;  %v2924_v57 = vld [vmem:[#allocation5 + $0x580] ss:$16 sps:$4 sm:$0xff]  }
  0x71   :  { %1553 = vmatpush1.bf16.msra.mxu0 %v2833_v58  ;;  %1511 = vmatprep.subr.bf16.mxu1 %v2834_v59  ;;  %v2927_v58 = vld [vmem:[#allocation5 + $0x188] ss:$16 sps:$4 sm:$0xff]   ;;  %v2932_v59 = vld [vmem:[#allocation5 + $0x5a4] ss:$16 sps:$4 sm:$0xff]  }
  0x72   :  { %1554 = vmatprep.subr.bf16.mxu0 %v2836_v60  ;;  %v2935_v60 = vld [vmem:[#allocation5 + $0x1ac] ss:$16 sps:$4 sm:$0xff]  }
  0x74   :  { %1512 = vmatpush1.bf16.msra.mxu1 %v2838_v61  ;;  %v2930_v61 = vld [vmem:[#allocation5 + $0x5a0] ss:$16 sps:$4 sm:$0xff]  }
  0x75   :  { %1555 = vmatpush1.bf16.msra.mxu0 %v2839_v62  ;;  %1513 = vmatprep.subr.bf16.mxu1 %v2840_v63  ;;  %v2933_v62 = vld [vmem:[#allocation5 + $0x1a8] ss:$16 sps:$4 sm:$0xff]   ;;  %v2938_v63 = vld [vmem:[#allocation5 + $0x5c4] ss:$16 sps:$4 sm:$0xff]  }
  0x76   :  { %1556 = vmatprep.subr.bf16.mxu0 %v2842_v0  ;;  %v2941_v0 = vld [vmem:[#allocation5 + $0x1cc] ss:$16 sps:$4 sm:$0xff]  }
  0x78   :  { %1514 = vmatpush1.bf16.msra.mxu1 %v2844_v1  ;;  %v2936_v1 = vld [vmem:[#allocation5 + $0x5c0] ss:$16 sps:$4 sm:$0xff]  }
  0x79   :  { %1557 = vmatpush1.bf16.msra.mxu0 %v2845_v2  ;;  %1655 = vmatprep.subr.bf16.mxu1 %v2857_v4  ;;  %v2939_v2 = vld [vmem:[#allocation5 + $0x1c8] ss:$16 sps:$4 sm:$0xff]   ;;  %v2947_v4 = vld [vmem:[#allocation5 + $0x1ec] ss:$16 sps:$4 sm:$0xff]  }
  0x7a   :  { %1569 = vmatprep.subr.bf16.mxu0 %v2854_v3  ;;  %v2944_v3 = vld [vmem:[#allocation5 + $0x5e4] ss:$16 sps:$4 sm:$0xff]  }
  0x7b   :  { %1516 = vmatmul.mubr.bf16.vlgmr.msra.gmra.mrb[0].mxu1 %v3362_v5 }
  0x7c   :  { %1559 = vmatmul.mubr.bf16.vlgmr.msra.gmra.mrb[0].mxu0 %v3364_v6  ;;  %1656 = vmatpush1.bf16.msra.mxu1 %v2855_v8  ;;  %v2945_v8 = vld [vmem:[#allocation5 + $0x1e8] ss:$16 sps:$4 sm:$0xff]  }
  0x7d   :  { %1570 = vmatpush1.bf16.msra.mxu0 %v2852_v7  ;;  %1657 = vmatprep.subr.bf16.mxu1 %v2863_v10  ;;  %v2942_v7 = vld [vmem:[#allocation5 + $0x5e0] ss:$16 sps:$4 sm:$0xff]   ;;  %v2956_v10 = vld [vmem:[#allocation5 + $0x20c] ss:$16 sps:$4 sm:$0xff]  }
  0x7e   :  { %1571 = vmatprep.subr.bf16.mxu0 %v2860_v9  ;;  %1687 = vmatprep.mubr.bf16.mxu1 %v2848_v50  ;;  %v2920_v50 = vld [vmem:[#allocation5 + $0x564] ss:$16 sps:$4 sm:$0xff]  }
  0x7f   :  { %1601 = vmatprep.mubr.bf16.mxu0 %v3368_v35  ;;  %v2953_v9 = vld [vmem:[#allocation5 + $0x604] ss:$16 sps:$4 sm:$0xff]  }
  0x80   :  { %1658 = vmatpush1.bf16.msra.mxu1 %v2861_v12  ;;  %v2951_v12 = vld [vmem:[#allocation5 + $0x600] ss:$16 sps:$4 sm:$0xff]  }
  0x81   :  { %1572 = vmatpush1.bf16.msra.mxu0 %v2858_v11  ;;  %1659 = vmatprep.subr.bf16.mxu1 %v2869_v14  ;;  %v3371_v11 = vld [vmem:[#allocation3 + $0x10] ss:$28 sps:$4 sm:$0xff]  }
  0x82   :  { %1573 = vmatprep.subr.bf16.mxu0 %v2866_v13  ;;  %v2954_v13 = vld [vmem:[#allocation5 + $0x208] ss:$16 sps:$4 sm:$0xff]   ;;  %v2959_v14 = vld [vmem:[#allocation5 + $0x624] ss:$16 sps:$4 sm:$0xff]  }
  0x84   :  { %1660 = vmatpush1.bf16.msra.mxu1 %v2867_v16  ;;  %v2957_v16 = vld [vmem:[#allocation5 + $0x620] ss:$16 sps:$4 sm:$0xff]  }
  0x85   :  { %1574 = vmatpush1.bf16.msra.mxu0 %v2864_v15  ;;  %1661 = vmatprep.subr.bf16.mxu1 %v2875_v18  ;;  %v2962_v15 = vld [vmem:[#allocation5 + $0x22c] ss:$16 sps:$4 sm:$0xff]   ;;  %v2965_v18 = vld [vmem:[#allocation5 + $0x644] ss:$16 sps:$4 sm:$0xff]  }
  0x86   :  { %1575 = vmatprep.subr.bf16.mxu0 %v2872_v17  ;;  %v2960_v17 = vld [vmem:[#allocation5 + $0x228] ss:$16 sps:$4 sm:$0xff]  }
  0x88   :  { %1662 = vmatpush1.bf16.msra.mxu1 %v2873_v20  ;;  %v3279_v20 = vmov 0  }
  0x89   :  { %1576 = vmatpush1.bf16.msra.mxu0 %v2870_v19  ;;  %1663 = vmatprep.subr.bf16.mxu1 %v2881_v22  ;;  %v2968_v19 = vld [vmem:[#allocation5 + $0x24c] ss:$16 sps:$4 sm:$0xff]   ;;  %v2966_v22 = vld [vmem:[#allocation5 + $0x248] ss:$16 sps:$4 sm:$0xff]  }
  0x8a   :  { %1577 = vmatprep.subr.bf16.mxu0 %v2878_v21  ;;  %v2963_v21 = vld [vmem:[#allocation5 + $0x640] ss:$16 sps:$4 sm:$0xff]  }
  0x8c   :  { %1664 = vmatpush1.bf16.msra.mxu1 %v2879_v24  ;;  %v2969_v24 = vld [vmem:[#allocation5 + $0x660] ss:$16 sps:$4 sm:$0xff]  }
  0x8d   :  { %1578 = vmatpush1.bf16.msra.mxu0 %v2876_v23  ;;  %1665 = vmatprep.subr.bf16.mxu1 %v2887_v26  ;;  %v2971_v23 = vld [vmem:[#allocation5 + $0x664] ss:$16 sps:$4 sm:$0xff]  }
  0x8e   :  { %1579 = vmatprep.subr.bf16.mxu0 %v2884_v25  ;;  %v2972_v25 = vld [vmem:[#allocation5 + $0x268] ss:$16 sps:$4 sm:$0xff]   ;;  %v2977_v26 = vld [vmem:[#allocation5 + $0x684] ss:$16 sps:$4 sm:$0xff]  }
  0x90   :  { %1666 = vmatpush1.bf16.msra.mxu1 %v2885_v28  ;;  %v2975_v28 = vld [vmem:[#allocation5 + $0x680] ss:$16 sps:$4 sm:$0xff]  }
  0x91   :  { %1580 = vmatpush1.bf16.msra.mxu0 %v2882_v27  ;;  %1667 = vmatprep.subr.bf16.mxu1 %v2893_v30  ;;  %v2980_v27 = vld [vmem:[#allocation5 + $0x28c] ss:$16 sps:$4 sm:$0xff]  }
  0x92   :  { %1581 = vmatprep.subr.bf16.mxu0 %v2890_v29  ;;  %v2983_v29 = vld [vmem:[#allocation5 + $0x6a4] ss:$16 sps:$4 sm:$0xff]   ;;  %v2986_v30 = vld [vmem:[#allocation5 + $0x2ac] ss:$16 sps:$4 sm:$0xff]  }
  0x94   :  { %1668 = vmatpush1.bf16.msra.mxu1 %v2891_v32  ;;  %v2984_v32 = vld [vmem:[#allocation5 + $0x2a8] ss:$16 sps:$4 sm:$0xff]  }
  0x95   :  { %1582 = vmatpush1.bf16.msra.mxu0 %v2888_v31  ;;  %1669 = vmatprep.subr.bf16.mxu1 %v2899_v34  ;;  %v2981_v31 = vld [vmem:[#allocation5 + $0x6a0] ss:$16 sps:$4 sm:$0xff]   ;;  %v2992_v34 = vld [vmem:[#allocation5 + $0x2cc] ss:$16 sps:$4 sm:$0xff]  }
  0x96   :  { %1583 = vmatprep.subr.bf16.mxu0 %v2896_v33  ;;  %v2989_v33 = vld [vmem:[#allocation5 + $0x6c4] ss:$16 sps:$4 sm:$0xff]  }
  0x98   :  { %1670 = vmatpush1.bf16.msra.mxu1 %v2897_v37  ;;  %v2990_v37 = vld [vmem:[#allocation5 + $0x2c8] ss:$16 sps:$4 sm:$0xff]  }
  0x99   :  { %1584 = vmatpush1.bf16.msra.mxu0 %v2894_v36  ;;  %1671 = vmatprep.subr.bf16.mxu1 %v2905_v39  ;;  %v2987_v36 = vld [vmem:[#allocation5 + $0x6c0] ss:$16 sps:$4 sm:$0xff]   ;;  %v2998_v39 = vld [vmem:[#allocation5 + $0x2ec] ss:$16 sps:$4 sm:$0xff]  }
  0x9a   :  { %1585 = vmatprep.subr.bf16.mxu0 %v2902_v38  ;;  %v2995_v38 = vld [vmem:[#allocation5 + $0x6e4] ss:$16 sps:$4 sm:$0xff]  }
  0x9c   :  { %1672 = vmatpush1.bf16.msra.mxu1 %v2903_v41  ;;  %v2996_v41 = vld [vmem:[#allocation5 + $0x2e8] ss:$16 sps:$4 sm:$0xff]  }
  0x9d   :  { %1586 = vmatpush1.bf16.msra.mxu0 %v2900_v40  ;;  %1673 = vmatprep.subr.bf16.mxu1 %v2911_v43  ;;  %v2993_v40 = vld [vmem:[#allocation5 + $0x6e0] ss:$16 sps:$4 sm:$0xff]  }
  0x9e   :  { %1587 = vmatprep.subr.bf16.mxu0 %v2908_v42  ;;  %v3002_v42 = vld [vmem:[#allocation5 + $0x30c] ss:$16 sps:$4 sm:$0xff]  }
  0x9f   :  { %v3377_v43 = vld [vmem:[#allocation3 + $0x18] ss:$28 sps:$4 sm:$0xff]  }
  0xa0   :  { %1674 = vmatpush1.bf16.msra.mxu1 %v2909_v45  ;;  %v3005_v45 = vld [vmem:[#allocation5 + $0x32c] ss:$16 sps:$4 sm:$0xff]  }
  0xa1   :  { %1588 = vmatpush1.bf16.msra.mxu0 %v2906_v44  ;;  %1675 = vmatprep.subr.bf16.mxu1 %v2917_v47  ;;  %v3000_v44 = vld [vmem:[#allocation5 + $0x308] ss:$16 sps:$4 sm:$0xff]   ;;  %v3098_v47 = vld [vmem:[#allocation7 + $0x4] ss:$8 sps:$4 sm:$0xff]  }
  0xa2   :  { %1589 = vmatprep.subr.bf16.mxu0 %v2914_v46  ;;  %v3096_v46 = vld [vmem:[#allocation7] ss:$8 sps:$4 sm:$0xff]  }
  0xa4   :  { %1676 = vmatpush1.bf16.msra.mxu1 %v2915_v49  ;;  %v3101_v49 = vld [vmem:[#allocation7 + $0x14] ss:$8 sps:$4 sm:$0xff]  }
  0xa5   :  { %1590 = vmatpush1.bf16.msra.mxu0 %v2912_v48  ;;  %1677 = vmatprep.subr.bf16.mxu1 %v2923_v51  ;;  %v3003_v48 = vld [vmem:[#allocation5 + $0x328] ss:$16 sps:$4 sm:$0xff]  }
  0xa6   :  { %1591 = vmatprep.subr.bf16.mxu0 %v2920_v50  ;;  %v3008_v50 = vld [vmem:[#allocation5 + $0x34c] ss:$16 sps:$4 sm:$0xff]   ;;  %v3099_v51 = vld [vmem:[#allocation7 + $0x10] ss:$8 sps:$4 sm:$0xff]  }
  0xa8   :  { %1678 = vmatpush1.bf16.msra.mxu1 %v2921_v54  ;;  %v3006_v54 = vld [vmem:[#allocation5 + $0x348] ss:$16 sps:$4 sm:$0xff]  }
  0xa9   :  { %1592 = vmatpush1.bf16.msra.mxu0 %v2918_v53  ;;  %1679 = vmatprep.subr.bf16.mxu1 %v2929_v56  ;;  %v3104_v53 = vld [vmem:[#allocation7 + $0x24] ss:$8 sps:$4 sm:$0xff]   ;;  %v3009_v56 = vld [vmem:[#allocation5 + $0x368] ss:$16 sps:$4 sm:$0xff]  }
  0xaa   :  { %1593 = vmatprep.subr.bf16.mxu0 %v2926_v55  ;;  %v3011_v55 = vld [vmem:[#allocation5 + $0x36c] ss:$16 sps:$4 sm:$0xff]  }
  0xac   :  { %1680 = vmatpush1.bf16.msra.mxu1 %v2927_v58  ;;  %v3014_v58 = vld [vmem:[#allocation5 + $0x38c] ss:$16 sps:$4 sm:$0xff]  }
  0xad   :  { %1594 = vmatpush1.bf16.msra.mxu0 %v2924_v57  ;;  %1681 = vmatprep.subr.bf16.mxu1 %v2935_v60  ;;  %v3102_v57 = vld [vmem:[#allocation7 + $0x20] ss:$8 sps:$4 sm:$0xff]   ;;  %v3105_v60 = vld [vmem:[#allocation7 + $0x30] ss:$8 sps:$4 sm:$0xff]  }
  0xae   :  { %1595 = vmatprep.subr.bf16.mxu0 %v2932_v59  ;;  %v3107_v59 = vld [vmem:[#allocation7 + $0x34] ss:$8 sps:$4 sm:$0xff]  }
  0xb0   :  { %1682 = vmatpush1.bf16.msra.mxu1 %v2933_v62  ;;  %v3012_v62 = vld [vmem:[#allocation5 + $0x388] ss:$16 sps:$4 sm:$0xff]  }
  0xb1   :  { %1596 = vmatpush1.bf16.msra.mxu0 %v2930_v61  ;;  %1683 = vmatprep.subr.bf16.mxu1 %v2941_v0  ;;  %v3110_v61 = vld [vmem:[#allocation7 + $0x44] ss:$8 sps:$4 sm:$0xff]   ;;  %v3108_v0 = vld [vmem:[#allocation7 + $0x40] ss:$8 sps:$4 sm:$0xff]  }
  0xb2   :  { %1597 = vmatprep.subr.bf16.mxu0 %v2938_v63  ;;  %v3017_v63 = vld [vmem:[#allocation5 + $0x3ac] ss:$16 sps:$4 sm:$0xff]  }
  0xb4   :  { %1684 = vmatpush1.bf16.msra.mxu1 %v2939_v2  ;;  %v3015_v2 = vld [vmem:[#allocation5 + $0x3a8] ss:$16 sps:$4 sm:$0xff]  }
  0xb5   :  { %1598 = vmatpush1.bf16.msra.mxu0 %v2936_v1  ;;  %1685 = vmatprep.subr.bf16.mxu1 %v2947_v4  ;;  %v3113_v1 = vld [vmem:[#allocation7 + $0x54] ss:$8 sps:$4 sm:$0xff]   ;;  %v3111_v4 = vld [vmem:[#allocation7 + $0x50] ss:$8 sps:$4 sm:$0xff]  }
  0xb6   :  { %1599 = vmatprep.subr.bf16.mxu0 %v2944_v3  ;;  %v3020_v3 = vld [vmem:[#allocation5 + $0x3cc] ss:$16 sps:$4 sm:$0xff]  }
  0xb8   :  { %1686 = vmatpush1.bf16.msra.mxu1 %v2945_v8  ;;  %v3018_v8 = vld [vmem:[#allocation5 + $0x3c8] ss:$16 sps:$4 sm:$0xff]  }
  0xb9   :  { %1600 = vmatpush1.bf16.msra.mxu0 %v2942_v7  ;;  %1698 = vmatprep.subr.bf16.mxu1 %v2956_v10  ;;  %v3116_v7 = vld [vmem:[#allocation7 + $0x64] ss:$8 sps:$4 sm:$0xff]   ;;  %v3114_v10 = vld [vmem:[#allocation7 + $0x60] ss:$8 sps:$4 sm:$0xff]  }
  0xba   :  { %1612 = vmatprep.subr.bf16.mxu0 %v2953_v9  ;;  %v3023_v9 = vld [vmem:[#allocation5 + $0x3ec] ss:$16 sps:$4 sm:$0xff]  }
  0xbb   :  { %1688 = vmatmul.mubr.bf16.vlgmr.msra.gmra.mrb[4].mxu1 %v3362_v5  ;;  %v2974_v5 = vld [vmem:[#allocation5 + $0x26c] ss:$16 sps:$4 sm:$0xff]  }
  0xbc   :  { %1602 = vmatmul.mubr.bf16.vlgmr.msra.gmra.mrb[0].mxu0 %v3371_v11  ;;  %1699 = vmatpush1.bf16.msra.mxu1 %v2954_v13  ;;  %v3021_v13 = vld [vmem:[#allocation5 + $0x3e8] ss:$16 sps:$4 sm:$0xff]  }
  0xbd   :  { %1613 = vmatpush1.bf16.msra.mxu0 %v2951_v12  ;;  %1700 = vmatprep.subr.bf16.mxu1 %v2962_v15  ;;  %v3119_v12 = vld [vmem:[#allocation7 + $0x74] ss:$8 sps:$4 sm:$0xff]   ;;  %v3117_v15 = vld [vmem:[#allocation7 + $0x70] ss:$8 sps:$4 sm:$0xff]  }
  0xbe   :  { %1614 = vmatprep.subr.bf16.mxu0 %v2959_v14  ;;  %1644 = vmatprep.mubr.bf16.mxu0 %v3279_v20  ;;  %v3026_v14 = vld [vmem:[#allocation5 + $0x40c] ss:$16 sps:$4 sm:$0xff]  }
  0xbf   :  { %1730 = vmatprep.mubr.bf16.mxu1 %v3359_v52  ;;  %v2978_v52 = vld [vmem:[#allocation5 + $0x288] ss:$16 sps:$4 sm:$0xff]  }
  0xc0   :  { %1701 = vmatpush1.bf16.msra.mxu1 %v2960_v17  ;;  %v3024_v17 = vld [vmem:[#allocation5 + $0x408] ss:$16 sps:$4 sm:$0xff]  }
  0xc1   :  { %1615 = vmatpush1.bf16.msra.mxu0 %v2957_v16  ;;  %1702 = vmatprep.subr.bf16.mxu1 %v2968_v19  ;;  %v3122_v16 = vld [vmem:[#allocation7 + $0x84] ss:$8 sps:$4 sm:$0xff]   ;;  %v3120_v19 = vld [vmem:[#allocation7 + $0x80] ss:$8 sps:$4 sm:$0xff]  }
  0xc2   :  { %1616 = vmatprep.subr.bf16.mxu0 %v2965_v18  ;;  %v3029_v18 = vld [vmem:[#allocation5 + $0x42c] ss:$16 sps:$4 sm:$0xff]  }
  0xc4   :  { %1703 = vmatpush1.bf16.msra.mxu1 %v2966_v22  ;;  %v3027_v22 = vld [vmem:[#allocation5 + $0x428] ss:$16 sps:$4 sm:$0xff]  }
  0xc5   :  { %1617 = vmatpush1.bf16.msra.mxu0 %v2963_v21  ;;  %1704 = vmatprep.subr.bf16.mxu1 %v2974_v5  ;;  %v3125_v21 = vld [vmem:[#allocation7 + $0x94] ss:$8 sps:$4 sm:$0xff]   ;;  %v3123_v5 = vld [vmem:[#allocation7 + $0x90] ss:$8 sps:$4 sm:$0xff]  }
  0xc6   :  { %1618 = vmatprep.subr.bf16.mxu0 %v2971_v23  ;;  %v3032_v23 = vld [vmem:[#allocation5 + $0x44c] ss:$16 sps:$4 sm:$0xff]  }
  0xc8   :  { %1705 = vmatpush1.bf16.msra.mxu1 %v2972_v25  ;;  %v3030_v25 = vld [vmem:[#allocation5 + $0x448] ss:$16 sps:$4 sm:$0xff]  }
  0xc9   :  { %1619 = vmatpush1.bf16.msra.mxu0 %v2969_v24  ;;  %1706 = vmatprep.subr.bf16.mxu1 %v2980_v27  ;;  %v3128_v24 = vld [vmem:[#allocation7 + $0xa4] ss:$8 sps:$4 sm:$0xff]   ;;  %v3126_v27 = vld [vmem:[#allocation7 + $0xa0] ss:$8 sps:$4 sm:$0xff]  }
  0xca   :  { %1620 = vmatprep.subr.bf16.mxu0 %v2977_v26  ;;  %v3035_v26 = vld [vmem:[#allocation5 + $0x46c] ss:$16 sps:$4 sm:$0xff]  }
  0xcc   :  { %1707 = vmatpush1.bf16.msra.mxu1 %v2978_v52  ;;  %v3038_v52 = vld [vmem:[#allocation5 + $0x48c] ss:$16 sps:$4 sm:$0xff]  }
  0xcd   :  { %1621 = vmatpush1.bf16.msra.mxu0 %v2975_v28  ;;  %1708 = vmatprep.subr.bf16.mxu1 %v2986_v30  ;;  %v3033_v28 = vld [vmem:[#allocation5 + $0x468] ss:$16 sps:$4 sm:$0xff]  }
  0xce   :  { %1622 = vmatprep.subr.bf16.mxu0 %v2983_v29  ;;  %v3134_v29 = vld [vmem:[#allocation7 + $0xc4] ss:$8 sps:$4 sm:$0xff]   ;;  %v3036_v30 = vld [vmem:[#allocation5 + $0x488] ss:$16 sps:$4 sm:$0xff]  }
  0xd0   :  { %1709 = vmatpush1.bf16.msra.mxu1 %v2984_v32  ;;  %v3132_v32 = vld [vmem:[#allocation7 + $0xc0] ss:$8 sps:$4 sm:$0xff]  }
  0xd1   :  { %1623 = vmatpush1.bf16.msra.mxu0 %v2981_v31  ;;  %1710 = vmatprep.subr.bf16.mxu1 %v2992_v34  ;;  %v3041_v31 = vld [vmem:[#allocation5 + $0x4ac] ss:$16 sps:$4 sm:$0xff]  }
  0xd2   :  { %1624 = vmatprep.subr.bf16.mxu0 %v2989_v33  ;;  %v3039_v33 = vld [vmem:[#allocation5 + $0x4a8] ss:$16 sps:$4 sm:$0xff]   ;;  %v3044_v34 = vld [vmem:[#allocation5 + $0x4cc] ss:$16 sps:$4 sm:$0xff]  }
  0xd4   :  { %1711 = vmatpush1.bf16.msra.mxu1 %v2990_v37  ;;  %v3047_v37 = vld [vmem:[#allocation5 + $0x4ec] ss:$16 sps:$4 sm:$0xff]  }
  0xd5   :  { %1625 = vmatpush1.bf16.msra.mxu0 %v2987_v36  ;;  %1712 = vmatprep.subr.bf16.mxu1 %v2998_v39  ;;  %v3042_v36 = vld [vmem:[#allocation5 + $0x4c8] ss:$16 sps:$4 sm:$0xff]   ;;  %v3050_v39 = vld [vmem:[#allocation5 + $0x50c] ss:$16 sps:$4 sm:$0xff]  }
  0xd6   :  { %1626 = vmatprep.subr.bf16.mxu0 %v2995_v38  ;;  %v3045_v38 = vld [vmem:[#allocation5 + $0x4e8] ss:$16 sps:$4 sm:$0xff]  }
  0xd8   :  { %1713 = vmatpush1.bf16.msra.mxu1 %v2996_v41  ;;  %v3053_v41 = vld [vmem:[#allocation5 + $0x52c] ss:$16 sps:$4 sm:$0xff]  }
  0xd9   :  { %1627 = vmatpush1.bf16.msra.mxu0 %v2993_v40  ;;  %1714 = vmatprep.subr.bf16.mxu1 %v3002_v42  ;;  %v3048_v40 = vld [vmem:[#allocation5 + $0x508] ss:$16 sps:$4 sm:$0xff]  }
  0xda   :  { %2250 = vmatprep.subr.bf16.mxu0 %v3098_v47  ;;  %v3051_v42 = vld [vmem:[#allocation5 + $0x528] ss:$16 sps:$4 sm:$0xff]  }
  0xdb   :  { %v3057_v47 = vld [vmem:[#allocation5 + $0x568] ss:$16 sps:$4 sm:$0xff]  }
  0xdc   :  { %1645 = vmatmul.mubr.bf16.vlgmr.msra.gmra.mrb[0].mxu0 %v3377_v43  ;;  %1715 = vmatpush1.bf16.msra.mxu1 %v3000_v44  ;;  %v3056_v44 = vld [vmem:[#allocation5 + $0x54c] ss:$16 sps:$4 sm:$0xff]  }
  0xdd   :  { %1716 = vmatprep.subr.bf16.mxu1 %v3005_v45  ;;  %2251 = vmatpush1.bf16.msra.mxu0 %v3096_v46  ;;  %v3054_v45 = vld [vmem:[#allocation5 + $0x548] ss:$16 sps:$4 sm:$0xff]   ;;  %v3059_v46 = vld [vmem:[#allocation5 + $0x56c] ss:$16 sps:$4 sm:$0xff]  }
  0xde   :  { %2252 = vmatprep.subr.bf16.mxu0 %v3101_v49  ;;  %v3060_v49 = vld [vmem:[#allocation5 + $0x588] ss:$16 sps:$4 sm:$0xff]  }
  0xe0   :  { %1717 = vmatpush1.bf16.msra.mxu1 %v3003_v48  ;;  %v3062_v48 = vld [vmem:[#allocation5 + $0x58c] ss:$16 sps:$4 sm:$0xff]  }
  0xe1   :  { %1718 = vmatprep.subr.bf16.mxu1 %v3008_v50  ;;  %2253 = vmatpush1.bf16.msra.mxu0 %v3099_v51  ;;  %v3065_v50 = vld [vmem:[#allocation5 + $0x5ac] ss:$16 sps:$4 sm:$0xff]   ;;  %v3063_v51 = vld [vmem:[#allocation5 + $0x5a8] ss:$16 sps:$4 sm:$0xff]  }
  0xe2   :  { %2254 = vmatprep.subr.bf16.mxu0 %v3104_v53  ;;  %v3137_v53 = vld [vmem:[#allocation7 + $0xd4] ss:$8 sps:$4 sm:$0xff]  }
  0xe4   :  { %1719 = vmatpush1.bf16.msra.mxu1 %v3006_v54  ;;  %v3068_v54 = vld [vmem:[#allocation5 + $0x5cc] ss:$16 sps:$4 sm:$0xff]  }
  0xe5   :  { %1720 = vmatprep.subr.bf16.mxu1 %v3011_v55  ;;  %2255 = vmatpush1.bf16.msra.mxu0 %v3102_v57  ;;  %v3135_v55 = vld [vmem:[#allocation7 + $0xd0] ss:$8 sps:$4 sm:$0xff]   ;;  %v3140_v57 = vld [vmem:[#allocation7 + $0xe4] ss:$8 sps:$4 sm:$0xff]  }
  0xe6   :  { %2256 = vmatprep.subr.bf16.mxu0 %v3107_v59  ;;  %v3138_v59 = vld [vmem:[#allocation7 + $0xe0] ss:$8 sps:$4 sm:$0xff]  }
  0xe8   :  { %1721 = vmatpush1.bf16.msra.mxu1 %v3009_v56  ;;  %v3066_v56 = vld [vmem:[#allocation5 + $0x5c8] ss:$16 sps:$4 sm:$0xff]  }
  0xe9   :  { %1722 = vmatprep.subr.bf16.mxu1 %v3014_v58  ;;  %2257 = vmatpush1.bf16.msra.mxu0 %v3105_v60  ;;  %v3071_v58 = vld [vmem:[#allocation5 + $0x5ec] ss:$16 sps:$4 sm:$0xff]   ;;  %v3069_v60 = vld [vmem:[#allocation5 + $0x5e8] ss:$16 sps:$4 sm:$0xff]  }
  0xea   :  { %2258 = vmatprep.subr.bf16.mxu0 %v3110_v61  ;;  %v3143_v61 = vld [vmem:[#allocation7 + $0xf4] ss:$8 sps:$4 sm:$0xff]  }
  0xec   :  { %1723 = vmatpush1.bf16.msra.mxu1 %v3012_v62  ;;  %v3074_v62 = vld [vmem:[#allocation5 + $0x60c] ss:$16 sps:$4 sm:$0xff]  }
  0xed   :  { %1724 = vmatprep.subr.bf16.mxu1 %v3017_v63  ;;  %2259 = vmatpush1.bf16.msra.mxu0 %v3108_v0  ;;  %v3141_v63 = vld [vmem:[#allocation7 + $0xf0] ss:$8 sps:$4 sm:$0xff]  }
  0xee   :  { %2260 = vmatprep.subr.bf16.mxu0 %v3113_v1  ;;  %v3072_v0 = vld [vmem:[#allocation5 + $0x608] ss:$16 sps:$4 sm:$0xff]   ;;  %v3077_v1 = vld [vmem:[#allocation5 + $0x62c] ss:$16 sps:$4 sm:$0xff]  }
  0xf0   :  { %1725 = vmatpush1.bf16.msra.mxu1 %v3015_v2  ;;  %v3146_v2 = vld [vmem:[#allocation7 + $0x104] ss:$8 sps:$4 sm:$0xff]  }
  0xf1   :  { %1726 = vmatprep.subr.bf16.mxu1 %v3020_v3  ;;  %2261 = vmatpush1.bf16.msra.mxu0 %v3111_v4  ;;  %v3075_v3 = vld [vmem:[#allocation5 + $0x628] ss:$16 sps:$4 sm:$0xff]   ;;  %v3080_v4 = vld [vmem:[#allocation5 + $0x64c] ss:$16 sps:$4 sm:$0xff]  }
  0xf2   :  { %2262 = vmatprep.subr.bf16.mxu0 %v3116_v7  ;;  %v3078_v7 = vld [vmem:[#allocation5 + $0x648] ss:$16 sps:$4 sm:$0xff]  }
  0xf4   :  { %1727 = vmatpush1.bf16.msra.mxu1 %v3018_v8  ;;  %v3083_v8 = vld [vmem:[#allocation5 + $0x66c] ss:$16 sps:$4 sm:$0xff]  }
  0xf5   :  { %1728 = vmatprep.subr.bf16.mxu1 %v3023_v9  ;;  %2263 = vmatpush1.bf16.msra.mxu0 %v3114_v10  ;;  %v3081_v9 = vld [vmem:[#allocation5 + $0x668] ss:$16 sps:$4 sm:$0xff]   ;;  %v3086_v10 = vld [vmem:[#allocation5 + $0x68c] ss:$16 sps:$4 sm:$0xff]  }
  0xf6   :  { %2264 = vmatprep.subr.bf16.mxu0 %v3119_v12  ;;  %v3084_v12 = vld [vmem:[#allocation5 + $0x688] ss:$16 sps:$4 sm:$0xff]  }
  0xf8   :  { %1729 = vmatpush1.bf16.msra.mxu1 %v3021_v13  ;;  %v3089_v13 = vld [vmem:[#allocation5 + $0x6ac] ss:$16 sps:$4 sm:$0xff]  }
  0xf9   :  { %1741 = vmatprep.subr.bf16.mxu1 %v3026_v14  ;;  %2265 = vmatpush1.bf16.msra.mxu0 %v3117_v15  ;;  %v3092_v14 = vld [vmem:[#allocation5 + $0x6cc] ss:$16 sps:$4 sm:$0xff]  }
  0xfa   :  { %2266 = vmatprep.subr.bf16.mxu0 %v3122_v16 }
  0xfb   :  { %1731 = vmatmul.mubr.bf16.vlgmr.msra.gmra.mrb[4].mxu1 %v3364_v6  ;;  %v3131_v6 = vld [vmem:[#allocation7 + $0xb4] ss:$8 sps:$4 sm:$0xff]  }
  0xfc   :  { %1742 = vmatpush1.bf16.msra.mxu1 %v3024_v17  ;;  %1773 = vmatprep.mubr.bf16.mxu1 %v3368_v35  ;;  %v3129_v35 = vld [vmem:[#allocation7 + $0xb0] ss:$8 sps:$4 sm:$0xff]  }
  0xfd   :  { %1743 = vmatprep.subr.bf16.mxu1 %v3029_v18  ;;  %2267 = vmatpush1.bf16.msra.mxu0 %v3120_v19  ;;  %v3090_v17 = vld [vmem:[#allocation5 + $0x6c8] ss:$16 sps:$4 sm:$0xff]   ;;  %v3095_v19 = vld [vmem:[#allocation5 + $0x6ec] ss:$16 sps:$4 sm:$0xff]  }
  0xfe   :  { %2268 = vmatprep.subr.bf16.mxu0 %v3125_v21  ;;  %v3093_v21 = vld [vmem:[#allocation5 + $0x6e8] ss:$16 sps:$4 sm:$0xff]  }
 0x100   :  { %1744 = vmatpush1.bf16.msra.mxu1 %v3027_v22  ;;  %v307_v22 = vlaneseq }
 0x101   :  { %1745 = vmatprep.subr.bf16.mxu1 %v3032_v23  ;;  %2269 = vmatpush1.bf16.msra.mxu0 %v3123_v5 }
 0x102   :  { %2270 = vmatprep.subr.bf16.mxu0 %v3128_v24  ;;  %v3385_v23 = vshrl.u32 %v307_v22, 7  ;;  %v3393_v24 = vld [vmem:[%s3424_s2] sm:$0xf] }
 0x104   :  { %1746 = vmatpush1.bf16.msra.mxu1 %v3030_v25  ;;  %v3388_v5 = vsub.s32 0, %v3385_v23  ;;  %v3396_v25 = vsub.s32 1, %v3385_v23 }
 0x105   :  { %1747 = vmatprep.subr.bf16.mxu1 %v3035_v26  ;;  %2271 = vmatpush1.bf16.msra.mxu0 %v3126_v27 }
 0x106   :  { %2272 = vmatprep.subr.bf16.mxu0 %v3131_v6  ;;  %v310_v26 = vrot.slane %v3393_v24, %v3388_v5 }
 0x108   :  { %1748 = vmatpush1.bf16.msra.mxu1 %v3033_v28 }
 0x109   :  { %1749 = vmatprep.subr.bf16.mxu1 %v3038_v52  ;;  %2273 = vmatpush1.bf16.msra.mxu0 %v3129_v35 }
 0x10a   :  { %2274 = vmatprep.subr.bf16.mxu0 %v3134_v29 }
 0x10c   :  { %1750 = vmatpush1.bf16.msra.mxu1 %v3036_v30 }
 0x10d   :  { %1751 = vmatprep.subr.bf16.mxu1 %v3041_v31  ;;  %2275 = vmatpush1.bf16.msra.mxu0 %v3132_v32 }
 0x10e   :  { %2276 = vmatprep.subr.bf16.mxu0 %v3137_v53  ;;  %v3150_v53 = vld [vmem:[#allocation7 + $0x120] ss:$8 sps:$4 sm:$0xff]  }
 0x110   :  { %1752 = vmatpush1.bf16.msra.mxu1 %v3039_v33 }
 0x111   :  { %1753 = vmatprep.subr.bf16.mxu1 %v3044_v34  ;;  %2277 = vmatpush1.bf16.msra.mxu0 %v3135_v55  ;;  %v3153_v55 = vld [vmem:[#allocation7 + $0x130] ss:$8 sps:$4 sm:$0xff]  }
 0x112   :  { %2278 = vmatprep.subr.bf16.mxu0 %v3140_v57  ;;  %v3156_v57 = vld [vmem:[#allocation7 + $0x140] ss:$8 sps:$4 sm:$0xff]  }
 0x114   :  { %1754 = vmatpush1.bf16.msra.mxu1 %v3042_v36 }
 0x115   :  { %1755 = vmatprep.subr.bf16.mxu1 %v3047_v37  ;;  %2279 = vmatpush1.bf16.msra.mxu0 %v3138_v59  ;;  %v3159_v59 = vld [vmem:[#allocation7 + $0x150] ss:$8 sps:$4 sm:$0xff]  }
 0x116   :  { %2280 = vmatprep.subr.bf16.mxu0 %v3143_v61  ;;  %v3162_v61 = vld [vmem:[#allocation7 + $0x160] ss:$8 sps:$4 sm:$0xff]  }
 0x118   :  { %1756 = vmatpush1.bf16.msra.mxu1 %v3045_v38 }
 0x119   :  { %1757 = vmatprep.subr.bf16.mxu1 %v3050_v39  ;;  %2281 = vmatpush1.bf16.msra.mxu0 %v3141_v63  ;;  %v3165_v63 = vld [vmem:[#allocation7 + $0x170] ss:$8 sps:$4 sm:$0xff]  }
 0x11a   :  { %2293 = vmatprep.subr.bf16.mxu0 %v3146_v2  ;;  %v3173_v2 = vld [vmem:[#allocation7 + $0x194] ss:$8 sps:$4 sm:$0xff]  }
 0x11c   :  { %1758 = vmatpush1.bf16.msra.mxu1 %v3048_v40 }
 0x11d   :  { %1759 = vmatprep.subr.bf16.mxu1 %v3053_v41 }
 0x120   :  { %1760 = vmatpush1.bf16.msra.mxu1 %v3051_v42 }
 0x121   :  { %1761 = vmatprep.subr.bf16.mxu1 %v3056_v44 }
 0x124   :  { %1762 = vmatpush1.bf16.msra.mxu1 %v3054_v45 }
 0x125   :  { %1763 = vmatprep.subr.bf16.mxu1 %v3059_v46 }
 0x128   :  { %1764 = vmatpush1.bf16.msra.mxu1 %v3057_v47 }
 0x129   :  { %1765 = vmatprep.subr.bf16.mxu1 %v3062_v48  ;;  %v3144_v48 = vld [vmem:[#allocation7 + $0x100] ss:$8 sps:$4 sm:$0xff]  }
 0x12c   :  { %1766 = vmatpush1.bf16.msra.mxu1 %v3060_v49  ;;  %v3149_v49 = vld [vmem:[#allocation7 + $0x114] ss:$8 sps:$4 sm:$0xff]  }
 0x12d   :  { %1767 = vmatprep.subr.bf16.mxu1 %v3065_v50  ;;  %v3147_v50 = vld [vmem:[#allocation7 + $0x110] ss:$8 sps:$4 sm:$0xff]  }
 0x130   :  { %1768 = vmatpush1.bf16.msra.mxu1 %v3063_v51  ;;  %v3152_v51 = vld [vmem:[#allocation7 + $0x124] ss:$8 sps:$4 sm:$0xff]  }
 0x131   :  { %1769 = vmatprep.subr.bf16.mxu1 %v3068_v54  ;;  %v3155_v54 = vld [vmem:[#allocation7 + $0x134] ss:$8 sps:$4 sm:$0xff]  }
 0x134   :  { %1770 = vmatpush1.bf16.msra.mxu1 %v3066_v56  ;;  %v3158_v56 = vld [vmem:[#allocation7 + $0x144] ss:$8 sps:$4 sm:$0xff]  }
 0x135   :  { %1771 = vmatprep.subr.bf16.mxu1 %v3071_v58  ;;  %v3161_v58 = vld [vmem:[#allocation7 + $0x154] ss:$8 sps:$4 sm:$0xff]  }
 0x138   :  { %1772 = vmatpush1.bf16.msra.mxu1 %v3069_v60  ;;  %v3164_v60 = vld [vmem:[#allocation7 + $0x164] ss:$8 sps:$4 sm:$0xff]  }
 0x139   :  { %1784 = vmatprep.subr.bf16.mxu1 %v3074_v62  ;;  %v3167_v62 = vld [vmem:[#allocation7 + $0x174] ss:$8 sps:$4 sm:$0xff]  }
 0x13b   :  { %1774 = vmatmul.mubr.bf16.vlgmr.msra.gmra.mrb[4].mxu1 %v3371_v11  ;;  %v3087_v11 = vld [vmem:[#allocation5 + $0x6a8] ss:$16 sps:$4 sm:$0xff]  }
 0x13c   :  { %1785 = vmatpush1.bf16.msra.mxu1 %v3072_v0  ;;  %1816 = vmatprep.mubr.bf16.mxu1 %v3279_v20  ;;  %v3170_v0 = vld [vmem:[#allocation7 + $0x184] ss:$8 sps:$4 sm:$0xff]  }
 0x13d   :  { %1786 = vmatprep.subr.bf16.mxu1 %v3077_v1  ;;  %v3168_v1 = vld [vmem:[#allocation7 + $0x180] ss:$8 sps:$4 sm:$0xff]  }
 0x140   :  { %1787 = vmatpush1.bf16.msra.mxu1 %v3075_v3  ;;  %v3171_v3 = vld [vmem:[#allocation7 + $0x190] ss:$8 sps:$4 sm:$0xff]  }
 0x141   :  { %1788 = vmatprep.subr.bf16.mxu1 %v3080_v4  ;;  %v3176_v4 = vld [vmem:[#allocation7 + $0x1a4] ss:$8 sps:$4 sm:$0xff]  }
 0x144   :  { %1789 = vmatpush1.bf16.msra.mxu1 %v3078_v7  ;;  %v3174_v7 = vld [vmem:[#allocation7 + $0x1a0] ss:$8 sps:$4 sm:$0xff]  }
 0x145   :  { %1790 = vmatprep.subr.bf16.mxu1 %v3083_v8  ;;  %v3179_v8 = vld [vmem:[#allocation7 + $0x1b4] ss:$8 sps:$4 sm:$0xff]  }
 0x148   :  { %1791 = vmatpush1.bf16.msra.mxu1 %v3081_v9  ;;  %v3177_v9 = vld [vmem:[#allocation7 + $0x1b0] ss:$8 sps:$4 sm:$0xff]  }
 0x149   :  { %1792 = vmatprep.subr.bf16.mxu1 %v3086_v10  ;;  %v3182_v10 = vld [vmem:[#allocation7 + $0x1c4] ss:$8 sps:$4 sm:$0xff]  }
 0x14c   :  { %1793 = vmatpush1.bf16.msra.mxu1 %v3084_v12  ;;  %v3180_v12 = vld [vmem:[#allocation7 + $0x1c0] ss:$8 sps:$4 sm:$0xff]  }
 0x14d   :  { %1794 = vmatprep.subr.bf16.mxu1 %v3089_v13  ;;  %v3185_v13 = vld [vmem:[#allocation7 + $0x1d4] ss:$8 sps:$4 sm:$0xff]  }
 0x14e   :  { %v1517_v20 = vpop.f32.mrb[0].mxu1 }
 0x14f   :  { %v1519_v15 = vpop.f32.mrb[1].mxu1  ;;  %v1518_v27 = vadd.f32 %v1517_v20, %v310_v26  ;;  %v3186_v20 = vld [vmem:[#allocation7 + $0x1e0] ss:$8 sps:$4 sm:$0xff]  }
 0x150   :  { %v1521_v16 = vpop.f32.mrb[2].mxu1  ;;  %1795 = vmatpush1.bf16.msra.mxu1 %v3087_v11  ;;  %v3183_v11 = vld [vmem:[#allocation7 + $0x1d0] ss:$8 sps:$4 sm:$0xff]  }
 0x151   :  { %v1523_v18 = vpop.f32.mrb[3].mxu1  ;;  %1796 = vmatprep.subr.bf16.mxu1 %v3092_v14  ;;  %v1522_v52 = vadd.f32 %v1521_v16, %v310_v26  ;;  %v3188_v14 = vld [vmem:[#allocation7 + $0x1e4] ss:$8 sps:$4 sm:$0xff]   ;;  %v3189_v16 = vld [vmem:[#allocation7 + $0x1f0] ss:$8 sps:$4 sm:$0xff]  }
 0x154   :  { %1797 = vmatpush1.bf16.msra.mxu1 %v3090_v17  ;;  %v317_v17 = vsub.s32 2, %v3385_v23 }
 0x155   :  { %1798 = vmatprep.subr.bf16.mxu1 %v3095_v19 }
 0x156   :  { %v318_v19 = vrot.slane %v3393_v24, %v317_v17 }
 0x158   :  { %1799 = vmatpush1.bf16.msra.mxu1 %v3093_v21 }
 0x15b   :  { %1817 = vmatmul.mubr.bf16.vlgmr.msra.gmra.mrb[4].mxu1 %v3377_v43  ;;  %v314_v43 = vrot.slane %v3393_v24, %v3396_v25 }
 0x15d   :  { %v1520_v6 = vadd.f32 %v1519_v15, %v314_v43  ;;  %v1524_v30 = vadd.f32 %v1523_v18, %v314_v43  ;;  %v3191_v15 = vld [vmem:[#allocation7 + $0x1f4] ss:$8 sps:$4 sm:$0xff]   ;;  %v321_v18 = vsub.s32 3, %v3385_v23 }
 0x15f   :  { %v322_v21 = vrot.slane %v3393_v24, %v321_v18 }
 0x1af   :  { %v1646_v28 = vpop.f32.mrb[0].mxu0 }
 0x1b0   :  { %v2701_v35 = vadd.f32 %v1646_v28, %v1518_v27  ;;  %v1648_v29 = vpop.f32.mrb[1].mxu0 }
 0x1b1   :  { %v2703_v31 = vadd.f32 %v1648_v29, %v1520_v6  ;;  %v1650_v32 = vpop.f32.mrb[2].mxu0 }
 0x1b2   :  { %v1835_v33 = vmul.f32 0.2, %v2701_v35  ;;  %v2705_v34 = vadd.f32 %v1650_v32, %v1522_v52  ;;  %v1652_v36 = vpop.f32.mrb[3].mxu0  ;;  %vm1827_vm0 = vcmp.gt.f32.partialorder %v2701_v35, 0.0 }
 0x1b3   :  { %v1836_v37 = vmul.f32 0.2, %v2703_v31  ;;  %v2707_v38 = vadd.f32 %v1652_v36, %v1524_v30  ;;  %vm1828_vm1 = vcmp.gt.f32.partialorder %v2703_v31, 0.0 }
 0x1b4   :  { %vm1831_vm2 = vcmp.gt.f32.partialorder %v2705_v34, 0.0  ;;  %v1839_v39 = vmul.f32 0.2, %v2705_v34  ;;  %v1843_v41 = vsel %vm1827_vm0, %v2701_v35, %v1835_v33 }
 0x1b5   :  { %vm1832_vm3 = vcmp.gt.f32.partialorder %v2707_v38, 0.0  ;;  %v1840_v40 = vmul.f32 0.2, %v2707_v38  ;;  %v1844_v45 = vsel %vm1828_vm1, %v2703_v31, %v1836_v37 }
 0x1b6   :  { %v1847_v42 = vsel %vm1831_vm2, %v2705_v34, %v1839_v39 }
 0x1b7   :  { %v1851_v44 = vpack.c.bf16 %v1847_v42, %v1843_v41  ;;  %v1848_v46 = vsel %vm1832_vm3, %v2707_v38, %v1840_v40  ;;  %v79_v38 = vld [vmem:[%s3426_s4] sm:$0x3] }
 0x1b8   :  { %v1852_v47 = vpack.c.bf16 %v1848_v46, %v1844_v45  ;;  %v1923_v39 = vrot.slane %v79_v38, %v3388_v5  ;;  %v1927_v40 = vrot.slane %v79_v38, %v3396_v25  ;;  %v81_v41 = vld [vmem:[%s3427_s5] sm:$0x3] }
 0x1ba   :  { %2282 = vmatprep.mubr.bf16.mxu0 %v1852_v47 }
 0x1bb   :  { %2283 = vmatmul.mubr.bf16.vlgmr.msra.gmra.mrb[4].mxu0 %v1851_v44 }
 0x1bc   :  { %2294 = vmatpush1.bf16.msra.mxu0 %v3144_v48  ;;  %v2352_v48 = vrot.slane %v81_v41, %v3388_v5 }
 0x1bd   :  { %2295 = vmatprep.subr.bf16.mxu0 %v3149_v49 }
 0x1c0   :  { %2296 = vmatpush1.bf16.msra.mxu0 %v3147_v50 }
 0x1c1   :  { %2297 = vmatprep.subr.bf16.mxu0 %v3152_v51 }
 0x1c4   :  { %2298 = vmatpush1.bf16.msra.mxu0 %v3150_v53  ;;  %v2356_v53 = vrot.slane %v81_v41, %v3396_v25  ;;  %v2699_v25 = vld [vmem:[#allocation2] ss:$0 sm:$0xff] }
 0x1c5   :  { %2299 = vmatprep.subr.bf16.mxu0 %v3155_v54 }
 0x1c8   :  { %2300 = vmatpush1.bf16.msra.mxu0 %v3153_v55 }
 0x1c9   :  { %2301 = vmatprep.subr.bf16.mxu0 %v3158_v56 }
 0x1cc   :  { %2302 = vmatpush1.bf16.msra.mxu0 %v3156_v57 }
 0x1cd   :  { %2303 = vmatprep.subr.bf16.mxu0 %v3161_v58 }
 0x1d0   :  { %2304 = vmatpush1.bf16.msra.mxu0 %v3159_v59 }
 0x1d1   :  { %2305 = vmatprep.subr.bf16.mxu0 %v3164_v60 }
 0x1d4   :  { %2306 = vmatpush1.bf16.msra.mxu0 %v3162_v61 }
 0x1d5   :  { %2307 = vmatprep.subr.bf16.mxu0 %v3167_v62 }
 0x1d8   :  { %2308 = vmatpush1.bf16.msra.mxu0 %v3165_v63 }
 0x1d9   :  { %2309 = vmatprep.subr.bf16.mxu0 %v3170_v0 }
 0x1dc   :  { %2310 = vmatpush1.bf16.msra.mxu0 %v3168_v1 }
 0x1dd   :  { %2311 = vmatprep.subr.bf16.mxu0 %v3173_v2 }
 0x1e0   :  { %2312 = vmatpush1.bf16.msra.mxu0 %v3171_v3 }
 0x1e1   :  { %2313 = vmatprep.subr.bf16.mxu0 %v3176_v4 }
 0x1e4   :  { %2314 = vmatpush1.bf16.msra.mxu0 %v3174_v7 }
 0x1e5   :  { %2315 = vmatprep.subr.bf16.mxu0 %v3179_v8 }
 0x1e8   :  { %2316 = vmatpush1.bf16.msra.mxu0 %v3177_v9 }
 0x1e9   :  { %2317 = vmatprep.subr.bf16.mxu0 %v3182_v10 }
 0x1ec   :  { %2318 = vmatpush1.bf16.msra.mxu0 %v3180_v12 }
 0x1ed   :  { %2319 = vmatprep.subr.bf16.mxu0 %v3185_v13 }
 0x1f0   :  { %2320 = vmatpush1.bf16.msra.mxu0 %v3183_v11 }
 0x1f1   :  { %2321 = vmatprep.subr.bf16.mxu0 %v3188_v14 }
 0x1f4   :  { %2322 = vmatpush1.bf16.msra.mxu0 %v3186_v20 }
 0x1f5   :  { %2323 = vmatprep.subr.bf16.mxu0 %v3191_v15 }
 0x1f8   :  { %2324 = vmatpush1.bf16.msra.mxu0 %v3189_v16 }
 0x22e   :  { %v1818_v22 = vpop.f32.mrb[4].mxu1 }
 0x22f   :  { %v2708_v26 = vadd.f32 %v1818_v22, %v318_v19  ;;  %v1820_v43 = vpop.f32.mrb[5].mxu1 }
 0x230   :  { %v2709_v27 = vadd.f32 %v1820_v43, %v322_v21  ;;  %v1822_v6 = vpop.f32.mrb[6].mxu1 }
 0x231   :  { %v1837_v28 = vmul.f32 0.2, %v2708_v26  ;;  %v2710_v52 = vadd.f32 %v1822_v6, %v318_v19  ;;  %v1824_v35 = vpop.f32.mrb[7].mxu1  ;;  %vm1829_vm4 = vcmp.gt.f32.partialorder %v2708_v26, 0.0 }
 0x232   :  { %v1838_v29 = vmul.f32 0.2, %v2709_v27  ;;  %v2711_v30 = vadd.f32 %v1824_v35, %v322_v21  ;;  %vm1830_vm5 = vcmp.gt.f32.partialorder %v2709_v27, 0.0 }
 0x233   :  { %vm1833_vm6 = vcmp.gt.f32.partialorder %v2710_v52, 0.0  ;;  %v1841_v31 = vmul.f32 0.2, %v2710_v52  ;;  %v1845_v32 = vsel %vm1829_vm4, %v2708_v26, %v1837_v28 }
 0x234   :  { %vm1834_vm7 = vcmp.gt.f32.partialorder %v2711_v30, 0.0  ;;  %v1842_v23 = vmul.f32 0.2, %v2711_v30  ;;  %v1846_v24 = vsel %vm1830_vm5, %v2709_v27, %v1838_v29 }
 0x235   :  { %v1849_v33 = vsel %vm1833_vm6, %v2710_v52, %v1841_v31 }
 0x236   :  { %v1853_v34 = vpack.c.bf16 %v1849_v33, %v1845_v32  ;;  %v1850_v36 = vsel %vm1834_vm7, %v2711_v30, %v1842_v23 }
 0x237   :  { %v1854_v37 = vpack.c.bf16 %v1850_v36, %v1846_v24 }
 0x239   :  { %2325 = vmatprep.mubr.bf16.mxu0 %v1854_v37 }
 0x23a   :  { %2326 = vmatmul.mubr.bf16.vlgmr.msra.gmra.mrb[4].mxu0 %v1853_v34 }
 0x30d   :  { %v2327_v42 = vpop.f32.mrb[4].mxu0 }
 0x30e   :  { %v2712_v44 = vadd.f32 %v2327_v42, %v1923_v39  ;;  %v2329_v45 = vpop.f32.mrb[5].mxu0 }
 0x30f   :  { %v2713_v46 = vadd.f32 %v2329_v45, %v1927_v40  ;;  %v2331_v47 = vpop.f32.mrb[6].mxu0 }
 0x310   :  { %vm2336_vm8 = vcmp.gt.f32.partialorder %v2712_v44, 0.0  ;;  %v2340_v49 = vmul.f32 0.2, %v2712_v44  ;;  %v2714_v50 = vadd.f32 %v2331_v47, %v1923_v39  ;;  %v2333_v51 = vpop.f32.mrb[7].mxu0 }
 0x311   :  { %vm2337_vm9 = vcmp.gt.f32.partialorder %v2713_v46, 0.0  ;;  %v2341_v54 = vmul.f32 0.2, %v2713_v46  ;;  %v2715_v55 = vadd.f32 %v2333_v51, %v1927_v40 }
 0x312   :  { %vm2338_vm10 = vcmp.gt.f32.partialorder %v2714_v50, 0.0  ;;  %v2342_v56 = vmul.f32 0.2, %v2714_v50  ;;  %v2344_v57 = vsel %vm2336_vm8, %v2712_v44, %v2340_v49 }
 0x313   :  { %vm2339_vm11 = vcmp.gt.f32.partialorder %v2715_v55, 0.0  ;;  %v2343_v58 = vmul.f32 0.2, %v2715_v55  ;;  %v2345_v59 = vsel %vm2337_vm9, %v2713_v46, %v2341_v54  ;;  %v2359_v60 = vmul.f32 %v2352_v48, %v2344_v57 }
 0x314   :  { %v2360_v61 = vmul.f32 %v2356_v53, %v2345_v59  ;;  %v2346_v62 = vsel %vm2338_vm10, %v2714_v50, %v2342_v56 }
 0x315   :  { %v2347_v63 = vsel %vm2339_vm11, %v2715_v55, %v2343_v58  ;;  %v2361_v5 = vmul.f32 %v2352_v48, %v2346_v62 }
 0x316   :  { %v2363_v0 = vadd.f32 %v2360_v61, %v2359_v60  ;;  %v2362_v1 = vmul.f32 %v2356_v53, %v2347_v63 }
 0x318   :  { %2364 = vadd.xlane.f32.xlu0 %v2363_v0  ;;  %v2366_v2 = vadd.f32 %v2362_v1, %v2361_v5 }
 0x31c   :  { %2367 = vadd.xlane.f32.xlu0 %v2366_v2 }
 0x3a5   :  { %v2365_v3 = vpop.xlane.xlu0 %2364 }
 0x3a6   :  { %v2375_v4 = vadd.f32 %v2699_v25, %v2365_v3 }
 0x3a8   :  { %v2377_v7 = vand.u32 2147483647, %v2375_v4  ;;  %vm2385_vm12 = vcmp.ge.f32.partialorder %v2375_v4, 0.0 }
 0x3a9   :  { %v2368_v8 = vpop.xlane.xlu0 %2367 }
 0x3aa   :  { %v2379_v9 = vsub.f32 0.0, %v2377_v7  ;;  %v2376_v10 = vadd.f32 %v2699_v25, %v2368_v8 }
 0x3ac   :  { %v2381_v12 = vmul.f32 1.442695, %v2379_v9  ;;  %v2378_v13 = vand.u32 2147483647, %v2376_v10  ;;  %vm2386_vm14 = vcmp.ge.f32.partialorder %v2376_v10, 0.0 }
 0x3ae   :  { %3192 = vpow2.f32 %v2381_v12  ;;  %v2380_v11 = vsub.f32 0.0, %v2378_v13 }
 0x3b0   :  { %v2383_v14 = vmul.f32 1.442695, %v2380_v11 }
 0x3b2   :  { %3194 = vpow2.f32 %v2383_v14 }
 0x3b8   :  { %v3193_v20 = vpop.eup %3192 }
 0x3b9   :  { %v2389_v15 = vadd.f32 1.0, %v3193_v20  ;;  %v2387_v19 = vsel %vm2385_vm12, 1.0, %v3193_v20 }
 0x3bb   :  { %3196 = vrcp.f32 %v2389_v15 }
 0x3bc   :  { %v3195_v16 = vpop.eup %3194 }
 0x3bd   :  { %v2390_v17 = vadd.f32 1.0, %v3195_v16  ;;  %v2388_v26 = vsel %vm2386_vm14, 1.0, %v3195_v16 }
 0x3bf   :  { %3198 = vrcp.f32 %v2390_v17 }
 0x3c5   :  { %v3197_v18 = vpop.eup %3196 }
 0x3c6   :  { %v2393_v21 = vmul.f32 %v3197_v18, %v2387_v19 }
 0x3c8   :  { %2396 = vst.msk [vmem:[%s3429_s7] sm:$0xff] %vm2395_vm13, %v2393_v21 }
 0x3c9   :  { %v3199_v22 = vpop.eup %3198 }
 0x3ca   :  { %v2394_v43 = vmul.f32 %v3199_v22, %v2388_v26 }
 0x3cc   :  { %2397 = vst.msk [vmem:[%s3429_s7 + $0x8] sm:$0xff] %vm2395_vm13, %v2394_v43 }
 0x3cd   :  { %2402 = vsyncpa [#allocation4], 1 }
 0x3ce   :  { %2403 = vsyncpa [#allocation6], 1 }

// kernel: tpu_custom_call.1
= control target key start
LH: loop header
LB: loop body
LE: loop exit
PB: predicated region body
PF: predicated region fallthrough
CT: control target
= control target key end

     0   :  { %s3422_s0 = inlined_call_operand.hbm [shape: bf16[16,896], index: 0, kind: input, shape index: {}]   ;;  %s3423_s1 = inlined_call_operand.hbm [shape: bf16[896,512], index: 1, kind: input, shape index: {}]   ;;  %s3424_s2 = inlined_call_operand.vmem [shape: f32[1,512], index: 2, kind: input, shape index: {}]   ;;  %s3425_s3 = inlined_call_operand.hbm [shape: bf16[512,256], index: 3, kind: input, shape index: {}]   ;;  %s3426_s4 = inlined_call_operand.vmem [shape: f32[1,256], index: 4, kind: input, shape index: {}]   ;;  %s3427_s5 = inlined_call_operand.vmem [shape: f32[1,256], index: 5, kind: input, shape index: {}]   ;;  %s3428_s6 = inlined_call_operand.<no memory space> [shape: f32[1,1], index: 6, kind: input, shape index: {}]   ;;  %s3429_s7 = inlined_call_operand.vmem [shape: f32[16,1], index: 7, kind: output, shape index: {}]  }
   0x1   :  { %v12_v0 = vstv %s3428_s6 }
   0x2   :  { %13 = vst [vmem:[#allocation2] sm:$0x1] %v12_v0 }
   0x3   :  { %14 = vsyncpa [#allocation4], 0 }
   0x4   :  { %15 = vsyncpa [#allocation6], 0  ;;  %s3270_s26 = smov [#allocation5]   ;;  %s3200_s30 = scalar_lea.hbm %s3423_s1, 28672 }
   0x5   :  { %s33_s27 = sshll.u32 %s3270_s26, 4  ;;  %p3201_p0 = scmp.ne.s32.totalorder %s3423_s1, %s3200_s30  ;;  %s34_s27 = int_to_ptr.vmem [resolvable:$true] %s33_s27 }
   0x6   :  { %p3204_p1 = scmp.lt.u32.totalorder %s3200_s30, %s3423_s1 }
   0x8   :  { %p3206_p2 = pnand %p3204_p1, %p3201_p0 }
   0xa   :  { %3209 = shalt.err (!%p3206_p2)
}
   0xb   :  { %s3210_s6 = scalar_lea.vmem %s34_s27, 28672  ;;  %p3215_p4 = scmp.lt.s32.totalorder %s34_s27, %s34_s27 }
   0xc   :  { %p3211_p3 = scmp.ne.s32.totalorder %s34_s27, %s3210_s6  ;;  %p3216_p5 = scmp.lt.s32.totalorder %s3210_s6, %s3210_s6 }
   0xe   :  { %p3217_p6 = por %p3216_p5, %p3215_p4 }
  0x10   :  { %p3218_p7 = pnand %p3217_p6, %p3211_p3 }
  0x12   :  { %3221 = shalt.err (!%p3218_p7)
}
  0x13   :  { %s3271_s12 = smov 256   ;;  %s3272_s13 = smov 16  }
  0x14   :  { %39 = dma.hbm_to_vmem [thread:$0]  %s3423_s1, 28672, %s34_s27, [#allocation6], %s3271_s12, %s3271_s12, %s3272_s13  }
  0x15   :  { %s3273_s16 = smov [#allocation3]   ;;  %s3222_s20 = scalar_lea.hbm %s3422_s0, 896 }
  0x16   :  { %s21_s17 = sshll.u32 %s3273_s16, 4  ;;  %p3223_p8 = scmp.ne.s32.totalorder %s3422_s0, %s3222_s20  ;;  %s22_s17 = int_to_ptr.vmem [resolvable:$true] %s21_s17 }
  0x17   :  { %p3226_p9 = scmp.lt.u32.totalorder %s3222_s20, %s3422_s0 }
  0x19   :  { %p3228_p10 = pnand %p3226_p9, %p3223_p8 }
  0x1b   :  { %3231 = shalt.err (!%p3228_p10)
}
  0x1c   :  { %s3232_s25 = scalar_lea.vmem %s22_s17, 896  ;;  %p3237_p12 = scmp.lt.s32.totalorder %s22_s17, %s22_s17 }
  0x1d   :  { %p3233_p11 = scmp.ne.s32.totalorder %s22_s17, %s3232_s25  ;;  %p3238_p13 = scmp.lt.s32.totalorder %s3232_s25, %s3232_s25 }
  0x1f   :  { %p3239_p0 = por %p3238_p13, %p3237_p12 }
  0x21   :  { %p3240_p1 = pnand %p3239_p0, %p3233_p11 }
  0x23   :  { %3243 = shalt.err (!%p3240_p1)
}
  0x24   :  { %s3274_s1 = smov 448   ;;  %s3275_s26 = smov 28  }
  0x25   :  { %27 = dma.hbm_to_vmem [thread:$0]  %s3422_s0, 896, %s22_s17, [#allocation4], %s3274_s1, %s3274_s1, %s3275_s26  }
  0x26   :  { %s3276_s29 = smov [#allocation7]   ;;  %s3244_s10 = scalar_lea.hbm %s3425_s3, 8192 }
  0x27   :  { %s47_s30 = sshll.u32 %s3276_s29, 4  ;;  %p3245_p2 = scmp.ne.s32.totalorder %s3425_s3, %s3244_s10  ;;  %s48_s30 = int_to_ptr.vmem [resolvable:$true] %s47_s30 }
  0x28   :  { %p3248_p3 = scmp.lt.u32.totalorder %s3244_s10, %s3425_s3 }
  0x2a   :  { %p3250_p4 = pnand %p3248_p3, %p3245_p2 }
  0x2c   :  { %3253 = shalt.err (!%p3250_p4)
}
  0x2d   :  { %s3254_s14 = scalar_lea.vmem %s48_s30, 8192  ;;  %p3259_p6 = scmp.lt.s32.totalorder %s48_s30, %s48_s30 }
  0x2e   :  { %p3255_p5 = scmp.ne.s32.totalorder %s48_s30, %s3254_s14  ;;  %p3260_p7 = scmp.lt.s32.totalorder %s3254_s14, %s3254_s14 }
  0x30   :  { %p3261_p8 = por %p3260_p7, %p3259_p6 }
  0x32   :  { %p3262_p9 = pnand %p3261_p8, %p3255_p5 }
  0x34   :  { %3265 = shalt.err (!%p3262_p9)
}
  0x35   :  { %s3277_s0 = smov 128   ;;  %s3278_s15 = smov 8  }
  0x36   :  { %53 = dma.hbm_to_vmem [thread:$0]  %s3425_s3, 8192, %s48_s30, [#allocation6], %s3277_s0, %s3277_s0, %s3278_s15  }
  0x37   :  { %3266 = dma.done.wait [#allocation4], 896  }
  0x38   :  { %3267 = vsyncadd [#allocation4], 4294966400 }
  0x39   :  { %3268 = dma.done.wait [#allocation6], 36864  }
  0x3a   :  { %3269 = vsyncadd [#allocation6], 4294930432  ;;  %v2750_v1 = vld [vmem:[#allocation5 + $0x4] ss:$16 sps:$4 sm:$0xff]   ;;  %v2754_v3 = vld [vmem:[#allocation5] ss:$16 sps:$4 sm:$0xff]  }
  0x3b   :  { %v2752_v2 = vld [vmem:[#allocation5 + $0x204] ss:$16 sps:$4 sm:$0xff]   ;;  %1483 = vmatprep.subr.bf16.mxu1 %v2750_v1  ;;  %v2755_v4 = vld [vmem:[#allocation5 + $0x200] ss:$16 sps:$4 sm:$0xff]   ;;  %v2848_v50 = vld [vmem:[#allocation3 + $0x4] ss:$28 sps:$4 sm:$0xff]  }
  0x3c   :  { %1526 = vmatprep.subr.bf16.mxu0 %v2752_v2  ;;  %v2756_v5 = vld [vmem:[#allocation5 + $0x24] ss:$16 sps:$4 sm:$0xff]   ;;  %1484 = vmatpush1.bf16.msra.mxu1 %v2754_v3  ;;  %v2760_v7 = vld [vmem:[#allocation5 + $0x20] ss:$16 sps:$4 sm:$0xff]   ;;  %vm2395_vm13 = vcmask 7168  }
  0x3d   :  { %1527 = vmatpush1.bf16.msra.mxu0 %v2755_v4  ;;  %v2758_v6 = vld [vmem:[#allocation5 + $0x224] ss:$16 sps:$4 sm:$0xff]   ;;  %1485 = vmatprep.subr.bf16.mxu1 %v2756_v5  ;;  %v2761_v8 = vld [vmem:[#allocation5 + $0x220] ss:$16 sps:$4 sm:$0xff]   ;;  %v2857_v4 = vld [vmem:[#allocation5 + $0xc] ss:$16 sps:$4 sm:$0xff]  }
  0x3e   :  { %1528 = vmatprep.subr.bf16.mxu0 %v2758_v6  ;;  %v2762_v9 = vld [vmem:[#allocation5 + $0x44] ss:$16 sps:$4 sm:$0xff]   ;;  %v2766_v11 = vld [vmem:[#allocation5 + $0x40] ss:$16 sps:$4 sm:$0xff]   ;;  %1515 = vmatprep.mubr.bf16.mxu1 %v2848_v50 }
  0x3f   :  { %v2764_v10 = vld [vmem:[#allocation5 + $0x244] ss:$16 sps:$4 sm:$0xff]   ;;  %v2767_v12 = vld [vmem:[#allocation5 + $0x240] ss:$16 sps:$4 sm:$0xff]  }
  0x40   :  { %1486 = vmatpush1.bf16.msra.mxu1 %v2760_v7  ;;  %v2768_v13 = vld [vmem:[#allocation5 + $0x64] ss:$16 sps:$4 sm:$0xff]   ;;  %v2772_v15 = vld [vmem:[#allocation5 + $0x60] ss:$16 sps:$4 sm:$0xff]  }
  0x41   :  { %1529 = vmatpush1.bf16.msra.mxu0 %v2761_v8  ;;  %1487 = vmatprep.subr.bf16.mxu1 %v2762_v9  ;;  %v2770_v14 = vld [vmem:[#allocation5 + $0x264] ss:$16 sps:$4 sm:$0xff]   ;;  %v2773_v16 = vld [vmem:[#allocation5 + $0x260] ss:$16 sps:$4 sm:$0xff]   ;;  %v2855_v8 = vld [vmem:[#allocation5 + $0x8] ss:$16 sps:$4 sm:$0xff]  }
  0x42   :  { %1530 = vmatprep.subr.bf16.mxu0 %v2764_v10  ;;  %v2774_v17 = vld [vmem:[#allocation5 + $0x84] ss:$16 sps:$4 sm:$0xff]   ;;  %v2778_v19 = vld [vmem:[#allocation5 + $0x80] ss:$16 sps:$4 sm:$0xff]   ;;  %v2863_v10 = vld [vmem:[#allocation5 + $0x2c] ss:$16 sps:$4 sm:$0xff]  }
  0x43   :  { %v2776_v18 = vld [vmem:[#allocation5 + $0x284] ss:$16 sps:$4 sm:$0xff]   ;;  %v2779_v20 = vld [vmem:[#allocation5 + $0x280] ss:$16 sps:$4 sm:$0xff]  }
  0x44   :  { %1488 = vmatpush1.bf16.msra.mxu1 %v2766_v11  ;;  %v2780_v21 = vld [vmem:[#allocation5 + $0xa4] ss:$16 sps:$4 sm:$0xff]   ;;  %v2784_v23 = vld [vmem:[#allocation5 + $0xa0] ss:$16 sps:$4 sm:$0xff]  }
  0x45   :  { %1531 = vmatpush1.bf16.msra.mxu0 %v2767_v12  ;;  %1489 = vmatprep.subr.bf16.mxu1 %v2768_v13  ;;  %v2782_v22 = vld [vmem:[#allocation5 + $0x2a4] ss:$16 sps:$4 sm:$0xff]   ;;  %v2785_v24 = vld [vmem:[#allocation5 + $0x2a0] ss:$16 sps:$4 sm:$0xff]   ;;  %v2861_v12 = vld [vmem:[#allocation5 + $0x28] ss:$16 sps:$4 sm:$0xff]  }
  0x46   :  { %1532 = vmatprep.subr.bf16.mxu0 %v2770_v14  ;;  %v2786_v25 = vld [vmem:[#allocation5 + $0xc4] ss:$16 sps:$4 sm:$0xff]   ;;  %v2790_v27 = vld [vmem:[#allocation5 + $0xc0] ss:$16 sps:$4 sm:$0xff]   ;;  %v2869_v14 = vld [vmem:[#allocation5 + $0x4c] ss:$16 sps:$4 sm:$0xff]  }
  0x47   :  { %v2788_v26 = vld [vmem:[#allocation5 + $0x2c4] ss:$16 sps:$4 sm:$0xff]   ;;  %v2791_v28 = vld [vmem:[#allocation5 + $0x2c0] ss:$16 sps:$4 sm:$0xff]  }
  0x48   :  { %1490 = vmatpush1.bf16.msra.mxu1 %v2772_v15  ;;  %v2792_v29 = vld [vmem:[#allocation5 + $0xe4] ss:$16 sps:$4 sm:$0xff]   ;;  %v2796_v31 = vld [vmem:[#allocation5 + $0xe0] ss:$16 sps:$4 sm:$0xff]  }
  0x49   :  { %1533 = vmatpush1.bf16.msra.mxu0 %v2773_v16  ;;  %1491 = vmatprep.subr.bf16.mxu1 %v2774_v17  ;;  %v2794_v30 = vld [vmem:[#allocation5 + $0x2e4] ss:$16 sps:$4 sm:$0xff]   ;;  %v2797_v32 = vld [vmem:[#allocation5 + $0x2e0] ss:$16 sps:$4 sm:$0xff]   ;;  %v2867_v16 = vld [vmem:[#allocation5 + $0x48] ss:$16 sps:$4 sm:$0xff]  }
  0x4a   :  { %1534 = vmatprep.subr.bf16.mxu0 %v2776_v18  ;;  %v2798_v33 = vld [vmem:[#allocation5 + $0x104] ss:$16 sps:$4 sm:$0xff]   ;;  %v2802_v35 = vld [vmem:[#allocation5 + $0x100] ss:$16 sps:$4 sm:$0xff]   ;;  %v2875_v18 = vld [vmem:[#allocation5 + $0x6c] ss:$16 sps:$4 sm:$0xff]  }
  0x4b   :  { %v2800_v34 = vld [vmem:[#allocation5 + $0x304] ss:$16 sps:$4 sm:$0xff]   ;;  %v2803_v36 = vld [vmem:[#allocation5 + $0x300] ss:$16 sps:$4 sm:$0xff]  }
  0x4c   :  { %1492 = vmatpush1.bf16.msra.mxu1 %v2778_v19  ;;  %v2804_v37 = vld [vmem:[#allocation5 + $0x124] ss:$16 sps:$4 sm:$0xff]   ;;  %v2808_v39 = vld [vmem:[#allocation5 + $0x120] ss:$16 sps:$4 sm:$0xff]  }
  0x4d   :  { %1535 = vmatpush1.bf16.msra.mxu0 %v2779_v20  ;;  %1493 = vmatprep.subr.bf16.mxu1 %v2780_v21  ;;  %v2806_v38 = vld [vmem:[#allocation5 + $0x324] ss:$16 sps:$4 sm:$0xff]   ;;  %v2809_v40 = vld [vmem:[#allocation5 + $0x320] ss:$16 sps:$4 sm:$0xff]   ;;  %v2873_v20 = vld [vmem:[#allocation5 + $0x68] ss:$16 sps:$4 sm:$0xff]  }
  0x4e   :  { %1536 = vmatprep.subr.bf16.mxu0 %v2782_v22  ;;  %v2810_v41 = vld [vmem:[#allocation5 + $0x144] ss:$16 sps:$4 sm:$0xff]   ;;  %v2814_v43 = vld [vmem:[#allocation5 + $0x140] ss:$16 sps:$4 sm:$0xff]   ;;  %v2881_v22 = vld [vmem:[#allocation5 + $0x8c] ss:$16 sps:$4 sm:$0xff]  }
  0x4f   :  { %v2812_v42 = vld [vmem:[#allocation5 + $0x344] ss:$16 sps:$4 sm:$0xff]   ;;  %v2815_v44 = vld [vmem:[#allocation5 + $0x340] ss:$16 sps:$4 sm:$0xff]  }
  0x50   :  { %1494 = vmatpush1.bf16.msra.mxu1 %v2784_v23  ;;  %v2816_v45 = vld [vmem:[#allocation5 + $0x164] ss:$16 sps:$4 sm:$0xff]   ;;  %v2820_v47 = vld [vmem:[#allocation5 + $0x160] ss:$16 sps:$4 sm:$0xff]  }
  0x51   :  { %1537 = vmatpush1.bf16.msra.mxu0 %v2785_v24  ;;  %1495 = vmatprep.subr.bf16.mxu1 %v2786_v25  ;;  %v2818_v46 = vld [vmem:[#allocation5 + $0x364] ss:$16 sps:$4 sm:$0xff]   ;;  %v2821_v48 = vld [vmem:[#allocation5 + $0x360] ss:$16 sps:$4 sm:$0xff]   ;;  %v2879_v24 = vld [vmem:[#allocation5 + $0x88] ss:$16 sps:$4 sm:$0xff]  }
  0x52   :  { %1538 = vmatprep.subr.bf16.mxu0 %v2788_v26  ;;  %v2822_v49 = vld [vmem:[#allocation5 + $0x184] ss:$16 sps:$4 sm:$0xff]   ;;  %v2826_v53 = vld [vmem:[#allocation5 + $0x180] ss:$16 sps:$4 sm:$0xff]   ;;  %v2887_v26 = vld [vmem:[#allocation5 + $0xac] ss:$16 sps:$4 sm:$0xff]  }
  0x53   :  { %v2824_v51 = vld [vmem:[#allocation5 + $0x384] ss:$16 sps:$4 sm:$0xff]   ;;  %v2827_v54 = vld [vmem:[#allocation5 + $0x380] ss:$16 sps:$4 sm:$0xff]  }
  0x54   :  { %1496 = vmatpush1.bf16.msra.mxu1 %v2790_v27  ;;  %v3359_v52 = vld [vmem:[#allocation3 + $0xc] ss:$28 sps:$4 sm:$0xff]   ;;  %v3362_v5 = vld [vmem:[#allocation3] ss:$28 sps:$4 sm:$0xff]  }
  0x55   :  { %1539 = vmatpush1.bf16.msra.mxu0 %v2791_v28  ;;  %1497 = vmatprep.subr.bf16.mxu1 %v2792_v29  ;;  %v2828_v55 = vld [vmem:[#allocation5 + $0x1a4] ss:$16 sps:$4 sm:$0xff]   ;;  %v2832_v57 = vld [vmem:[#allocation5 + $0x1a0] ss:$16 sps:$4 sm:$0xff]   ;;  %v2885_v28 = vld [vmem:[#allocation5 + $0xa8] ss:$16 sps:$4 sm:$0xff]  }
  0x56   :  { %1540 = vmatprep.subr.bf16.mxu0 %v2794_v30  ;;  %1558 = vmatprep.mubr.bf16.mxu0 %v3359_v52  ;;  %v2830_v56 = vld [vmem:[#allocation5 + $0x3a4] ss:$16 sps:$4 sm:$0xff]   ;;  %v2833_v58 = vld [vmem:[#allocation5 + $0x3a0] ss:$16 sps:$4 sm:$0xff]   ;;  %v2893_v30 = vld [vmem:[#allocation5 + $0xcc] ss:$16 sps:$4 sm:$0xff]  }
  0x57   :  { %v2834_v59 = vld [vmem:[#allocation5 + $0x1c4] ss:$16 sps:$4 sm:$0xff]   ;;  %v2838_v61 = vld [vmem:[#allocation5 + $0x1c0] ss:$16 sps:$4 sm:$0xff]  }
  0x58   :  { %1498 = vmatpush1.bf16.msra.mxu1 %v2796_v31  ;;  %v2836_v60 = vld [vmem:[#allocation5 + $0x3c4] ss:$16 sps:$4 sm:$0xff]   ;;  %v2839_v62 = vld [vmem:[#allocation5 + $0x3c0] ss:$16 sps:$4 sm:$0xff]  }
  0x59   :  { %1541 = vmatpush1.bf16.msra.mxu0 %v2797_v32  ;;  %1499 = vmatprep.subr.bf16.mxu1 %v2798_v33  ;;  %v2840_v63 = vld [vmem:[#allocation5 + $0x1e4] ss:$16 sps:$4 sm:$0xff]   ;;  %v2844_v1 = vld [vmem:[#allocation5 + $0x1e0] ss:$16 sps:$4 sm:$0xff]   ;;  %v2891_v32 = vld [vmem:[#allocation5 + $0xc8] ss:$16 sps:$4 sm:$0xff]  }
  0x5a   :  { %1542 = vmatprep.subr.bf16.mxu0 %v2800_v34  ;;  %v2842_v0 = vld [vmem:[#allocation5 + $0x3e4] ss:$16 sps:$4 sm:$0xff]   ;;  %v2845_v2 = vld [vmem:[#allocation5 + $0x3e0] ss:$16 sps:$4 sm:$0xff]   ;;  %v2899_v34 = vld [vmem:[#allocation5 + $0xec] ss:$16 sps:$4 sm:$0xff]  }
  0x5b   :  { %v2854_v3 = vld [vmem:[#allocation5 + $0x404] ss:$16 sps:$4 sm:$0xff]   ;;  %v3364_v6 = vld [vmem:[#allocation3 + $0x8] ss:$28 sps:$4 sm:$0xff]  }
  0x5c   :  { %1500 = vmatpush1.bf16.msra.mxu1 %v2802_v35  ;;  %v2852_v7 = vld [vmem:[#allocation5 + $0x400] ss:$16 sps:$4 sm:$0xff]   ;;  %v2860_v9 = vld [vmem:[#allocation5 + $0x424] ss:$16 sps:$4 sm:$0xff]   ;;  %v3368_v35 = vld [vmem:[#allocation3 + $0x14] ss:$28 sps:$4 sm:$0xff]  }
  0x5d   :  { %1543 = vmatpush1.bf16.msra.mxu0 %v2803_v36  ;;  %1501 = vmatprep.subr.bf16.mxu1 %v2804_v37  ;;  %v2858_v11 = vld [vmem:[#allocation5 + $0x420] ss:$16 sps:$4 sm:$0xff]   ;;  %v2866_v13 = vld [vmem:[#allocation5 + $0x444] ss:$16 sps:$4 sm:$0xff]   ;;  %v2897_v37 = vld [vmem:[#allocation5 + $0xe8] ss:$16 sps:$4 sm:$0xff]  }
  0x5e   :  { %1544 = vmatprep.subr.bf16.mxu0 %v2806_v38  ;;  %v2864_v15 = vld [vmem:[#allocation5 + $0x440] ss:$16 sps:$4 sm:$0xff]   ;;  %v2872_v17 = vld [vmem:[#allocation5 + $0x464] ss:$16 sps:$4 sm:$0xff]  }
  0x5f   :  { %v2870_v19 = vld [vmem:[#allocation5 + $0x460] ss:$16 sps:$4 sm:$0xff]   ;;  %v2878_v21 = vld [vmem:[#allocation5 + $0x484] ss:$16 sps:$4 sm:$0xff]  }
  0x60   :  { %1502 = vmatpush1.bf16.msra.mxu1 %v2808_v39  ;;  %v2876_v23 = vld [vmem:[#allocation5 + $0x480] ss:$16 sps:$4 sm:$0xff]   ;;  %v2884_v25 = vld [vmem:[#allocation5 + $0x4a4] ss:$16 sps:$4 sm:$0xff]   ;;  %v2905_v39 = vld [vmem:[#allocation5 + $0x10c] ss:$16 sps:$4 sm:$0xff]  }
  0x61   :  { %1545 = vmatpush1.bf16.msra.mxu0 %v2809_v40  ;;  %1503 = vmatprep.subr.bf16.mxu1 %v2810_v41  ;;  %v2882_v27 = vld [vmem:[#allocation5 + $0x4a0] ss:$16 sps:$4 sm:$0xff]   ;;  %v2890_v29 = vld [vmem:[#allocation5 + $0x4c4] ss:$16 sps:$4 sm:$0xff]   ;;  %v2903_v41 = vld [vmem:[#allocation5 + $0x108] ss:$16 sps:$4 sm:$0xff]  }
  0x62   :  { %1546 = vmatprep.subr.bf16.mxu0 %v2812_v42  ;;  %v2888_v31 = vld [vmem:[#allocation5 + $0x4c0] ss:$16 sps:$4 sm:$0xff]   ;;  %v2896_v33 = vld [vmem:[#allocation5 + $0x4e4] ss:$16 sps:$4 sm:$0xff]  }
  0x63   :  { %v2894_v36 = vld [vmem:[#allocation5 + $0x4e0] ss:$16 sps:$4 sm:$0xff]   ;;  %v2902_v38 = vld [vmem:[#allocation5 + $0x504] ss:$16 sps:$4 sm:$0xff]  }
  0x64   :  { %1504 = vmatpush1.bf16.msra.mxu1 %v2814_v43  ;;  %v2900_v40 = vld [vmem:[#allocation5 + $0x500] ss:$16 sps:$4 sm:$0xff]   ;;  %v2908_v42 = vld [vmem:[#allocation5 + $0x524] ss:$16 sps:$4 sm:$0xff]   ;;  %v2911_v43 = vld [vmem:[#allocation5 + $0x12c] ss:$16 sps:$4 sm:$0xff]  }
  0x65   :  { %1547 = vmatpush1.bf16.msra.mxu0 %v2815_v44  ;;  %1505 = vmatprep.subr.bf16.mxu1 %v2816_v45  ;;  %v2906_v44 = vld [vmem:[#allocation5 + $0x520] ss:$16 sps:$4 sm:$0xff]   ;;  %v2909_v45 = vld [vmem:[#allocation5 + $0x128] ss:$16 sps:$4 sm:$0xff]  }
  0x66   :  { %1548 = vmatprep.subr.bf16.mxu0 %v2818_v46  ;;  %v2914_v46 = vld [vmem:[#allocation5 + $0x544] ss:$16 sps:$4 sm:$0xff]  }
  0x68   :  { %1506 = vmatpush1.bf16.msra.mxu1 %v2820_v47  ;;  %v2917_v47 = vld [vmem:[#allocation5 + $0x14c] ss:$16 sps:$4 sm:$0xff]  }
  0x69   :  { %1549 = vmatpush1.bf16.msra.mxu0 %v2821_v48  ;;  %1507 = vmatprep.subr.bf16.mxu1 %v2822_v49  ;;  %v2912_v48 = vld [vmem:[#allocation5 + $0x540] ss:$16 sps:$4 sm:$0xff]   ;;  %v2915_v49 = vld [vmem:[#allocation5 + $0x148] ss:$16 sps:$4 sm:$0xff]  }
  0x6a   :  { %1550 = vmatprep.subr.bf16.mxu0 %v2824_v51  ;;  %v2923_v51 = vld [vmem:[#allocation5 + $0x16c] ss:$16 sps:$4 sm:$0xff]  }
  0x6c   :  { %1508 = vmatpush1.bf16.msra.mxu1 %v2826_v53  ;;  %v2918_v53 = vld [vmem:[#allocation5 + $0x560] ss:$16 sps:$4 sm:$0xff]  }
  0x6d   :  { %1551 = vmatpush1.bf16.msra.mxu0 %v2827_v54  ;;  %1509 = vmatprep.subr.bf16.mxu1 %v2828_v55  ;;  %v2921_v54 = vld [vmem:[#allocation5 + $0x168] ss:$16 sps:$4 sm:$0xff]   ;;  %v2926_v55 = vld [vmem:[#allocation5 + $0x584] ss:$16 sps:$4 sm:$0xff]  }
  0x6e   :  { %1552 = vmatprep.subr.bf16.mxu0 %v2830_v56  ;;  %v2929_v56 = vld [vmem:[#allocation5 + $0x18c] ss:$16 sps:$4 sm:$0xff]  }
  0x70   :  { %1510 = vmatpush1.bf16.msra.mxu1 %v2832_v57  ;;  %v2924_v57 = vld [vmem:[#allocation5 + $0x580] ss:$16 sps:$4 sm:$0xff]  }
  0x71   :  { %1553 = vmatpush1.bf16.msra.mxu0 %v2833_v58  ;;  %1511 = vmatprep.subr.bf16.mxu1 %v2834_v59  ;;  %v2927_v58 = vld [vmem:[#allocation5 + $0x188] ss:$16 sps:$4 sm:$0xff]   ;;  %v2932_v59 = vld [vmem:[#allocation5 + $0x5a4] ss:$16 sps:$4 sm:$0xff]  }
  0x72   :  { %1554 = vmatprep.subr.bf16.mxu0 %v2836_v60  ;;  %v2935_v60 = vld [vmem:[#allocation5 + $0x1ac] ss:$16 sps:$4 sm:$0xff]  }
  0x74   :  { %1512 = vmatpush1.bf16.msra.mxu1 %v2838_v61  ;;  %v2930_v61 = vld [vmem:[#allocation5 + $0x5a0] ss:$16 sps:$4 sm:$0xff]  }
  0x75   :  { %1555 = vmatpush1.bf16.msra.mxu0 %v2839_v62  ;;  %1513 = vmatprep.subr.bf16.mxu1 %v2840_v63  ;;  %v2933_v62 = vld [vmem:[#allocation5 + $0x1a8] ss:$16 sps:$4 sm:$0xff]   ;;  %v2938_v63 = vld [vmem:[#allocation5 + $0x5c4] ss:$16 sps:$4 sm:$0xff]  }
  0x76   :  { %1556 = vmatprep.subr.bf16.mxu0 %v2842_v0  ;;  %v2941_v0 = vld [vmem:[#allocation5 + $0x1cc] ss:$16 sps:$4 sm:$0xff]  }
  0x78   :  { %1514 = vmatpush1.bf16.msra.mxu1 %v2844_v1  ;;  %v2936_v1 = vld [vmem:[#allocation5 + $0x5c0] ss:$16 sps:$4 sm:$0xff]  }
  0x79   :  { %1557 = vmatpush1.bf16.msra.mxu0 %v2845_v2  ;;  %1655 = vmatprep.subr.bf16.mxu1 %v2857_v4  ;;  %v2939_v2 = vld [vmem:[#allocation5 + $0x1c8] ss:$16 sps:$4 sm:$0xff]   ;;  %v2947_v4 = vld [vmem:[#allocation5 + $0x1ec] ss:$16 sps:$4 sm:$0xff]  }
  0x7a   :  { %1569 = vmatprep.subr.bf16.mxu0 %v2854_v3  ;;  %v2944_v3 = vld [vmem:[#allocation5 + $0x5e4] ss:$16 sps:$4 sm:$0xff]  }
  0x7b   :  { %1516 = vmatmul.mubr.bf16.vlgmr.msra.gmra.mrb[0].mxu1 %v3362_v5 }
  0x7c   :  { %1559 = vmatmul.mubr.bf16.vlgmr.msra.gmra.mrb[0].mxu0 %v3364_v6  ;;  %1656 = vmatpush1.bf16.msra.mxu1 %v2855_v8  ;;  %v2945_v8 = vld [vmem:[#allocation5 + $0x1e8] ss:$16 sps:$4 sm:$0xff]  }
  0x7d   :  { %1570 = vmatpush1.bf16.msra.mxu0 %v2852_v7  ;;  %1657 = vmatprep.subr.bf16.mxu1 %v2863_v10  ;;  %v2942_v7 = vld [vmem:[#allocation5 + $0x5e0] ss:$16 sps:$4 sm:$0xff]   ;;  %v2956_v10 = vld [vmem:[#allocation5 + $0x20c] ss:$16 sps:$4 sm:$0xff]  }
  0x7e   :  { %1571 = vmatprep.subr.bf16.mxu0 %v2860_v9  ;;  %1687 = vmatprep.mubr.bf16.mxu1 %v2848_v50  ;;  %v2920_v50 = vld [vmem:[#allocation5 + $0x564] ss:$16 sps:$4 sm:$0xff]  }
  0x7f   :  { %1601 = vmatprep.mubr.bf16.mxu0 %v3368_v35  ;;  %v2953_v9 = vld [vmem:[#allocation5 + $0x604] ss:$16 sps:$4 sm:$0xff]  }
  0x80   :  { %1658 = vmatpush1.bf16.msra.mxu1 %v2861_v12  ;;  %v2951_v12 = vld [vmem:[#allocation5 + $0x600] ss:$16 sps:$4 sm:$0xff]  }
  0x81   :  { %1572 = vmatpush1.bf16.msra.mxu0 %v2858_v11  ;;  %1659 = vmatprep.subr.bf16.mxu1 %v2869_v14  ;;  %v3371_v11 = vld [vmem:[#allocation3 + $0x10] ss:$28 sps:$4 sm:$0xff]  }
  0x82   :  { %1573 = vmatprep.subr.bf16.mxu0 %v2866_v13  ;;  %v2954_v13 = vld [vmem:[#allocation5 + $0x208] ss:$16 sps:$4 sm:$0xff]   ;;  %v2959_v14 = vld [vmem:[#allocation5 + $0x624] ss:$16 sps:$4 sm:$0xff]  }
  0x84   :  { %1660 = vmatpush1.bf16.msra.mxu1 %v2867_v16  ;;  %v2957_v16 = vld [vmem:[#allocation5 + $0x620] ss:$16 sps:$4 sm:$0xff]  }
  0x85   :  { %1574 = vmatpush1.bf16.msra.mxu0 %v2864_v15  ;;  %1661 = vmatprep.subr.bf16.mxu1 %v2875_v18  ;;  %v2962_v15 = vld [vmem:[#allocation5 + $0x22c] ss:$16 sps:$4 sm:$0xff]   ;;  %v2965_v18 = vld [vmem:[#allocation5 + $0x644] ss:$16 sps:$4 sm:$0xff]  }
  0x86   :  { %1575 = vmatprep.subr.bf16.mxu0 %v2872_v17  ;;  %v2960_v17 = vld [vmem:[#allocation5 + $0x228] ss:$16 sps:$4 sm:$0xff]  }
  0x88   :  { %1662 = vmatpush1.bf16.msra.mxu1 %v2873_v20  ;;  %v3279_v20 = vmov 0  }
  0x89   :  { %1576 = vmatpush1.bf16.msra.mxu0 %v2870_v19  ;;  %1663 = vmatprep.subr.bf16.mxu1 %v2881_v22  ;;  %v2968_v19 = vld [vmem:[#allocation5 + $0x24c] ss:$16 sps:$4 sm:$0xff]   ;;  %v2966_v22 = vld [vmem:[#allocation5 + $0x248] ss:$16 sps:$4 sm:$0xff]  }
  0x8a   :  { %1577 = vmatprep.subr.bf16.mxu0 %v2878_v21  ;;  %v2963_v21 = vld [vmem:[#allocation5 + $0x640] ss:$16 sps:$4 sm:$0xff]  }
  0x8c   :  { %1664 = vmatpush1.bf16.msra.mxu1 %v2879_v24  ;;  %v2969_v24 = vld [vmem:[#allocation5 + $0x660] ss:$16 sps:$4 sm:$0xff]  }
  0x8d   :  { %1578 = vmatpush1.bf16.msra.mxu0 %v2876_v23  ;;  %1665 = vmatprep.subr.bf16.mxu1 %v2887_v26  ;;  %v2971_v23 = vld [vmem:[#allocation5 + $0x664] ss:$16 sps:$4 sm:$0xff]  }
  0x8e   :  { %1579 = vmatprep.subr.bf16.mxu0 %v2884_v25  ;;  %v2972_v25 = vld [vmem:[#allocation5 + $0x268] ss:$16 sps:$4 sm:$0xff]   ;;  %v2977_v26 = vld [vmem:[#allocation5 + $0x684] ss:$16 sps:$4 sm:$0xff]  }
  0x90   :  { %1666 = vmatpush1.bf16.msra.mxu1 %v2885_v28  ;;  %v2975_v28 = vld [vmem:[#allocation5 + $0x680] ss:$16 sps:$4 sm:$0xff]  }
  0x91   :  { %1580 = vmatpush1.bf16.msra.mxu0 %v2882_v27  ;;  %1667 = vmatprep.subr.bf16.mxu1 %v2893_v30  ;;  %v2980_v27 = vld [vmem:[#allocation5 + $0x28c] ss:$16 sps:$4 sm:$0xff]  }
  0x92   :  { %1581 = vmatprep.subr.bf16.mxu0 %v2890_v29  ;;  %v2983_v29 = vld [vmem:[#allocation5 + $0x6a4] ss:$16 sps:$4 sm:$0xff]   ;;  %v2986_v30 = vld [vmem:[#allocation5 + $0x2ac] ss:$16 sps:$4 sm:$0xff]  }
  0x94   :  { %1668 = vmatpush1.bf16.msra.mxu1 %v2891_v32  ;;  %v2984_v32 = vld [vmem:[#allocation5 + $0x2a8] ss:$16 sps:$4 sm:$0xff]  }
  0x95   :  { %1582 = vmatpush1.bf16.msra.mxu0 %v2888_v31  ;;  %1669 = vmatprep.subr.bf16.mxu1 %v2899_v34  ;;  %v2981_v31 = vld [vmem:[#allocation5 + $0x6a0] ss:$16 sps:$4 sm:$0xff]   ;;  %v2992_v34 = vld [vmem:[#allocation5 + $0x2cc] ss:$16 sps:$4 sm:$0xff]  }
  0x96   :  { %1583 = vmatprep.subr.bf16.mxu0 %v2896_v33  ;;  %v2989_v33 = vld [vmem:[#allocation5 + $0x6c4] ss:$16 sps:$4 sm:$0xff]  }
  0x98   :  { %1670 = vmatpush1.bf16.msra.mxu1 %v2897_v37  ;;  %v2990_v37 = vld [vmem:[#allocation5 + $0x2c8] ss:$16 sps:$4 sm:$0xff]  }
  0x99   :  { %1584 = vmatpush1.bf16.msra.mxu0 %v2894_v36  ;;  %1671 = vmatprep.subr.bf16.mxu1 %v2905_v39  ;;  %v2987_v36 = vld [vmem:[#allocation5 + $0x6c0] ss:$16 sps:$4 sm:$0xff]   ;;  %v2998_v39 = vld [vmem:[#allocation5 + $0x2ec] ss:$16 sps:$4 sm:$0xff]  }
  0x9a   :  { %1585 = vmatprep.subr.bf16.mxu0 %v2902_v38  ;;  %v2995_v38 = vld [vmem:[#allocation5 + $0x6e4] ss:$16 sps:$4 sm:$0xff]  }
  0x9c   :  { %1672 = vmatpush1.bf16.msra.mxu1 %v2903_v41  ;;  %v2996_v41 = vld [vmem:[#allocation5 + $0x2e8] ss:$16 sps:$4 sm:$0xff]  }
  0x9d   :  { %1586 = vmatpush1.bf16.msra.mxu0 %v2900_v40  ;;  %1673 = vmatprep.subr.bf16.mxu1 %v2911_v43  ;;  %v2993_v40 = vld [vmem:[#allocation5 + $0x6e0] ss:$16 sps:$4 sm:$0xff]  }
  0x9e   :  { %1587 = vmatprep.subr.bf16.mxu0 %v2908_v42  ;;  %v3002_v42 = vld [vmem:[#allocation5 + $0x30c] ss:$16 sps:$4 sm:$0xff]  }
  0x9f   :  { %v3377_v43 = vld [vmem:[#allocation3 + $0x18] ss:$28 sps:$4 sm:$0xff]  }
  0xa0   :  { %1674 = vmatpush1.bf16.msra.mxu1 %v2909_v45  ;;  %v3005_v45 = vld [vmem:[#allocation5 + $0x32c] ss:$16 sps:$4 sm:$0xff]  }
  0xa1   :  { %1588 = vmatpush1.bf16.msra.mxu0 %v2906_v44  ;;  %1675 = vmatprep.subr.bf16.mxu1 %v2917_v47  ;;  %v3000_v44 = vld [vmem:[#allocation5 + $0x308] ss:$16 sps:$4 sm:$0xff]   ;;  %v3098_v47 = vld [vmem:[#allocation7 + $0x4] ss:$8 sps:$4 sm:$0xff]  }
  0xa2   :  { %1589 = vmatprep.subr.bf16.mxu0 %v2914_v46  ;;  %v3096_v46 = vld [vmem:[#allocation7] ss:$8 sps:$4 sm:$0xff]  }
  0xa4   :  { %1676 = vmatpush1.bf16.msra.mxu1 %v2915_v49  ;;  %v3101_v49 = vld [vmem:[#allocation7 + $0x14] ss:$8 sps:$4 sm:$0xff]  }
  0xa5   :  { %1590 = vmatpush1.bf16.msra.mxu0 %v2912_v48  ;;  %1677 = vmatprep.subr.bf16.mxu1 %v2923_v51  ;;  %v3003_v48 = vld [vmem:[#allocation5 + $0x328] ss:$16 sps:$4 sm:$0xff]  }
  0xa6   :  { %1591 = vmatprep.subr.bf16.mxu0 %v2920_v50  ;;  %v3008_v50 = vld [vmem:[#allocation5 + $0x34c] ss:$16 sps:$4 sm:$0xff]   ;;  %v3099_v51 = vld [vmem:[#allocation7 + $0x10] ss:$8 sps:$4 sm:$0xff]  }
  0xa8   :  { %1678 = vmatpush1.bf16.msra.mxu1 %v2921_v54  ;;  %v3006_v54 = vld [vmem:[#allocation5 + $0x348] ss:$16 sps:$4 sm:$0xff]  }
  0xa9   :  { %1592 = vmatpush1.bf16.msra.mxu0 %v2918_v53  ;;  %1679 = vmatprep.subr.bf16.mxu1 %v2929_v56  ;;  %v3104_v53 = vld [vmem:[#allocation7 + $0x24] ss:$8 sps:$4 sm:$0xff]   ;;  %v3009_v56 = vld [vmem:[#allocation5 + $0x368] ss:$16 sps:$4 sm:$0xff]  }
  0xaa   :  { %1593 = vmatprep.subr.bf16.mxu0 %v2926_v55  ;;  %v3011_v55 = vld [vmem:[#allocation5 + $0x36c] ss:$16 sps:$4 sm:$0xff]  }
  0xac   :  { %1680 = vmatpush1.bf16.msra.mxu1 %v2927_v58  ;;  %v3014_v58 = vld [vmem:[#allocation5 + $0x38c] ss:$16 sps:$4 sm:$0xff]  }
  0xad   :  { %1594 = vmatpush1.bf16.msra.mxu0 %v2924_v57  ;;  %1681 = vmatprep.subr.bf16.mxu1 %v2935_v60  ;;  %v3102_v57 = vld [vmem:[#allocation7 + $0x20] ss:$8 sps:$4 sm:$0xff]   ;;  %v3105_v60 = vld [vmem:[#allocation7 + $0x30] ss:$8 sps:$4 sm:$0xff]  }
  0xae   :  { %1595 = vmatprep.subr.bf16.mxu0 %v2932_v59  ;;  %v3107_v59 = vld [vmem:[#allocation7 + $0x34] ss:$8 sps:$4 sm:$0xff]  }
  0xb0   :  { %1682 = vmatpush1.bf16.msra.mxu1 %v2933_v62  ;;  %v3012_v62 = vld [vmem:[#allocation5 + $0x388] ss:$16 sps:$4 sm:$0xff]  }
  0xb1   :  { %1596 = vmatpush1.bf16.msra.mxu0 %v2930_v61  ;;  %1683 = vmatprep.subr.bf16.mxu1 %v2941_v0  ;;  %v3110_v61 = vld [vmem:[#allocation7 + $0x44] ss:$8 sps:$4 sm:$0xff]   ;;  %v3108_v0 = vld [vmem:[#allocation7 + $0x40] ss:$8 sps:$4 sm:$0xff]  }
  0xb2   :  { %1597 = vmatprep.subr.bf16.mxu0 %v2938_v63  ;;  %v3017_v63 = vld [vmem:[#allocation5 + $0x3ac] ss:$16 sps:$4 sm:$0xff]  }
  0xb4   :  { %1684 = vmatpush1.bf16.msra.mxu1 %v2939_v2  ;;  %v3015_v2 = vld [vmem:[#allocation5 + $0x3a8] ss:$16 sps:$4 sm:$0xff]  }
  0xb5   :  { %1598 = vmatpush1.bf16.msra.mxu0 %v2936_v1  ;;  %1685 = vmatprep.subr.bf16.mxu1 %v2947_v4  ;;  %v3113_v1 = vld [vmem:[#allocation7 + $0x54] ss:$8 sps:$4 sm:$0xff]   ;;  %v3111_v4 = vld [vmem:[#allocation7 + $0x50] ss:$8 sps:$4 sm:$0xff]  }
  0xb6   :  { %1599 = vmatprep.subr.bf16.mxu0 %v2944_v3  ;;  %v3020_v3 = vld [vmem:[#allocation5 + $0x3cc] ss:$16 sps:$4 sm:$0xff]  }
  0xb8   :  { %1686 = vmatpush1.bf16.msra.mxu1 %v2945_v8  ;;  %v3018_v8 = vld [vmem:[#allocation5 + $0x3c8] ss:$16 sps:$4 sm:$0xff]  }
  0xb9   :  { %1600 = vmatpush1.bf16.msra.mxu0 %v2942_v7  ;;  %1698 = vmatprep.subr.bf16.mxu1 %v2956_v10  ;;  %v3116_v7 = vld [vmem:[#allocation7 + $0x64] ss:$8 sps:$4 sm:$0xff]   ;;  %v3114_v10 = vld [vmem:[#allocation7 + $0x60] ss:$8 sps:$4 sm:$0xff]  }
  0xba   :  { %1612 = vmatprep.subr.bf16.mxu0 %v2953_v9  ;;  %v3023_v9 = vld [vmem:[#allocation5 + $0x3ec] ss:$16 sps:$4 sm:$0xff]  }
  0xbb   :  { %1688 = vmatmul.mubr.bf16.vlgmr.msra.gmra.mrb[4].mxu1 %v3362_v5  ;;  %v2974_v5 = vld [vmem:[#allocation5 + $0x26c] ss:$16 sps:$4 sm:$0xff]  }
  0xbc   :  { %1602 = vmatmul.mubr.bf16.vlgmr.msra.gmra.mrb[0].mxu0 %v3371_v11  ;;  %1699 = vmatpush1.bf16.msra.mxu1 %v2954_v13  ;;  %v3021_v13 = vld [vmem:[#allocation5 + $0x3e8] ss:$16 sps:$4 sm:$0xff]  }
  0xbd   :  { %1613 = vmatpush1.bf16.msra.mxu0 %v2951_v12  ;;  %1700 = vmatprep.subr.bf16.mxu1 %v2962_v15  ;;  %v3119_v12 = vld [vmem:[#allocation7 + $0x74] ss:$8 sps:$4 sm:$0xff]   ;;  %v3117_v15 = vld [vmem:[#allocation7 + $0x70] ss:$8 sps:$4 sm:$0xff]  }
  0xbe   :  { %1614 = vmatprep.subr.bf16.mxu0 %v2959_v14  ;;  %1644 = vmatprep.mubr.bf16.mxu0 %v3279_v20  ;;  %v3026_v14 = vld [vmem:[#allocation5 + $0x40c] ss:$16 sps:$4 sm:$0xff]  }
  0xbf   :  { %1730 = vmatprep.mubr.bf16.mxu1 %v3359_v52  ;;  %v2978_v52 = vld [vmem:[#allocation5 + $0x288] ss:$16 sps:$4 sm:$0xff]  }
  0xc0   :  { %1701 = vmatpush1.bf16.msra.mxu1 %v2960_v17  ;;  %v3024_v17 = vld [vmem:[#allocation5 + $0x408] ss:$16 sps:$4 sm:$0xff]  }
  0xc1   :  { %1615 = vmatpush1.bf16.msra.mxu0 %v2957_v16  ;;  %1702 = vmatprep.subr.bf16.mxu1 %v2968_v19  ;;  %v3122_v16 = vld [vmem:[#allocation7 + $0x84] ss:$8 sps:$4 sm:$0xff]   ;;  %v3120_v19 = vld [vmem:[#allocation7 + $0x80] ss:$8 sps:$4 sm:$0xff]  }
  0xc2   :  { %1616 = vmatprep.subr.bf16.mxu0 %v2965_v18  ;;  %v3029_v18 = vld [vmem:[#allocation5 + $0x42c] ss:$16 sps:$4 sm:$0xff]  }
  0xc4   :  { %1703 = vmatpush1.bf16.msra.mxu1 %v2966_v22  ;;  %v3027_v22 = vld [vmem:[#allocation5 + $0x428] ss:$16 sps:$4 sm:$0xff]  }
  0xc5   :  { %1617 = vmatpush1.bf16.msra.mxu0 %v2963_v21  ;;  %1704 = vmatprep.subr.bf16.mxu1 %v2974_v5  ;;  %v3125_v21 = vld [vmem:[#allocation7 + $0x94] ss:$8 sps:$4 sm:$0xff]   ;;  %v3123_v5 = vld [vmem:[#allocation7 + $0x90] ss:$8 sps:$4 sm:$0xff]  }
  0xc6   :  { %1618 = vmatprep.subr.bf16.mxu0 %v2971_v23  ;;  %v3032_v23 = vld [vmem:[#allocation5 + $0x44c] ss:$16 sps:$4 sm:$0xff]  }
  0xc8   :  { %1705 = vmatpush1.bf16.msra.mxu1 %v2972_v25  ;;  %v3030_v25 = vld [vmem:[#allocation5 + $0x448] ss:$16 sps:$4 sm:$0xff]  }
  0xc9   :  { %1619 = vmatpush1.bf16.msra.mxu0 %v2969_v24  ;;  %1706 = vmatprep.subr.bf16.mxu1 %v2980_v27  ;;  %v3128_v24 = vld [vmem:[#allocation7 + $0xa4] ss:$8 sps:$4 sm:$0xff]   ;;  %v3126_v27 = vld [vmem:[#allocation7 + $0xa0] ss:$8 sps:$4 sm:$0xff]  }
  0xca   :  { %1620 = vmatprep.subr.bf16.mxu0 %v2977_v26  ;;  %v3035_v26 = vld [vmem:[#allocation5 + $0x46c] ss:$16 sps:$4 sm:$0xff]  }
  0xcc   :  { %1707 = vmatpush1.bf16.msra.mxu1 %v2978_v52  ;;  %v3038_v52 = vld [vmem:[#allocation5 + $0x48c] ss:$16 sps:$4 sm:$0xff]  }
  0xcd   :  { %1621 = vmatpush1.bf16.msra.mxu0 %v2975_v28  ;;  %1708 = vmatprep.subr.bf16.mxu1 %v2986_v30  ;;  %v3033_v28 = vld [vmem:[#allocation5 + $0x468] ss:$16 sps:$4 sm:$0xff]  }
  0xce   :  { %1622 = vmatprep.subr.bf16.mxu0 %v2983_v29  ;;  %v3134_v29 = vld [vmem:[#allocation7 + $0xc4] ss:$8 sps:$4 sm:$0xff]   ;;  %v3036_v30 = vld [vmem:[#allocation5 + $0x488] ss:$16 sps:$4 sm:$0xff]  }
  0xd0   :  { %1709 = vmatpush1.bf16.msra.mxu1 %v2984_v32  ;;  %v3132_v32 = vld [vmem:[#allocation7 + $0xc0] ss:$8 sps:$4 sm:$0xff]  }
  0xd1   :  { %1623 = vmatpush1.bf16.msra.mxu0 %v2981_v31  ;;  %1710 = vmatprep.subr.bf16.mxu1 %v2992_v34  ;;  %v3041_v31 = vld [vmem:[#allocation5 + $0x4ac] ss:$16 sps:$4 sm:$0xff]  }
  0xd2   :  { %1624 = vmatprep.subr.bf16.mxu0 %v2989_v33  ;;  %v3039_v33 = vld [vmem:[#allocation5 + $0x4a8] ss:$16 sps:$4 sm:$0xff]   ;;  %v3044_v34 = vld [vmem:[#allocation5 + $0x4cc] ss:$16 sps:$4 sm:$0xff]  }
  0xd4   :  { %1711 = vmatpush1.bf16.msra.mxu1 %v2990_v37  ;;  %v3047_v37 = vld [vmem:[#allocation5 + $0x4ec] ss:$16 sps:$4 sm:$0xff]  }
  0xd5   :  { %1625 = vmatpush1.bf16.msra.mxu0 %v2987_v36  ;;  %1712 = vmatprep.subr.bf16.mxu1 %v2998_v39  ;;  %v3042_v36 = vld [vmem:[#allocation5 + $0x4c8] ss:$16 sps:$4 sm:$0xff]   ;;  %v3050_v39 = vld [vmem:[#allocation5 + $0x50c] ss:$16 sps:$4 sm:$0xff]  }
  0xd6   :  { %1626 = vmatprep.subr.bf16.mxu0 %v2995_v38  ;;  %v3045_v38 = vld [vmem:[#allocation5 + $0x4e8] ss:$16 sps:$4 sm:$0xff]  }
  0xd8   :  { %1713 = vmatpush1.bf16.msra.mxu1 %v2996_v41  ;;  %v3053_v41 = vld [vmem:[#allocation5 + $0x52c] ss:$16 sps:$4 sm:$0xff]  }
  0xd9   :  { %1627 = vmatpush1.bf16.msra.mxu0 %v2993_v40  ;;  %1714 = vmatprep.subr.bf16.mxu1 %v3002_v42  ;;  %v3048_v40 = vld [vmem:[#allocation5 + $0x508] ss:$16 sps:$4 sm:$0xff]  }
  0xda   :  { %2250 = vmatprep.subr.bf16.mxu0 %v3098_v47  ;;  %v3051_v42 = vld [vmem:[#allocation5 + $0x528] ss:$16 sps:$4 sm:$0xff]  }
  0xdb   :  { %v3057_v47 = vld [vmem:[#allocation5 + $0x568] ss:$16 sps:$4 sm:$0xff]  }
  0xdc   :  { %1645 = vmatmul.mubr.bf16.vlgmr.msra.gmra.mrb[0].mxu0 %v3377_v43  ;;  %1715 = vmatpush1.bf16.msra.mxu1 %v3000_v44  ;;  %v3056_v44 = vld [vmem:[#allocation5 + $0x54c] ss:$16 sps:$4 sm:$0xff]  }
  0xdd   :  { %1716 = vmatprep.subr.bf16.mxu1 %v3005_v45  ;;  %2251 = vmatpush1.bf16.msra.mxu0 %v3096_v46  ;;  %v3054_v45 = vld [vmem:[#allocation5 + $0x548] ss:$16 sps:$4 sm:$0xff]   ;;  %v3059_v46 = vld [vmem:[#allocation5 + $0x56c] ss:$16 sps:$4 sm:$0xff]  }
  0xde   :  { %2252 = vmatprep.subr.bf16.mxu0 %v3101_v49  ;;  %v3060_v49 = vld [vmem:[#allocation5 + $0x588] ss:$16 sps:$4 sm:$0xff]  }
  0xe0   :  { %1717 = vmatpush1.bf16.msra.mxu1 %v3003_v48  ;;  %v3062_v48 = vld [vmem:[#allocation5 + $0x58c] ss:$16 sps:$4 sm:$0xff]  }
  0xe1   :  { %1718 = vmatprep.subr.bf16.mxu1 %v3008_v50  ;;  %2253 = vmatpush1.bf16.msra.mxu0 %v3099_v51  ;;  %v3065_v50 = vld [vmem:[#allocation5 + $0x5ac] ss:$16 sps:$4 sm:$0xff]   ;;  %v3063_v51 = vld [vmem:[#allocation5 + $0x5a8] ss:$16 sps:$4 sm:$0xff]  }
  0xe2   :  { %2254 = vmatprep.subr.bf16.mxu0 %v3104_v53  ;;  %v3137_v53 = vld [vmem:[#allocation7 + $0xd4] ss:$8 sps:$4 sm:$0xff]  }
  0xe4   :  { %1719 = vmatpush1.bf16.msra.mxu1 %v3006_v54  ;;  %v3068_v54 = vld [vmem:[#allocation5 + $0x5cc] ss:$16 sps:$4 sm:$0xff]  }
  0xe5   :  { %1720 = vmatprep.subr.bf16.mxu1 %v3011_v55  ;;  %2255 = vmatpush1.bf16.msra.mxu0 %v3102_v57  ;;  %v3135_v55 = vld [vmem:[#allocation7 + $0xd0] ss:$8 sps:$4 sm:$0xff]   ;;  %v3140_v57 = vld [vmem:[#allocation7 + $0xe4] ss:$8 sps:$4 sm:$0xff]  }
  0xe6   :  { %2256 = vmatprep.subr.bf16.mxu0 %v3107_v59  ;;  %v3138_v59 = vld [vmem:[#allocation7 + $0xe0] ss:$8 sps:$4 sm:$0xff]  }
  0xe8   :  { %1721 = vmatpush1.bf16.msra.mxu1 %v3009_v56  ;;  %v3066_v56 = vld [vmem:[#allocation5 + $0x5c8] ss:$16 sps:$4 sm:$0xff]  }
  0xe9   :  { %1722 = vmatprep.subr.bf16.mxu1 %v3014_v58  ;;  %2257 = vmatpush1.bf16.msra.mxu0 %v3105_v60  ;;  %v3071_v58 = vld [vmem:[#allocation5 + $0x5ec] ss:$16 sps:$4 sm:$0xff]   ;;  %v3069_v60 = vld [vmem:[#allocation5 + $0x5e8] ss:$16 sps:$4 sm:$0xff]  }
  0xea   :  { %2258 = vmatprep.subr.bf16.mxu0 %v3110_v61  ;;  %v3143_v61 = vld [vmem:[#allocation7 + $0xf4] ss:$8 sps:$4 sm:$0xff]  }
  0xec   :  { %1723 = vmatpush1.bf16.msra.mxu1 %v3012_v62  ;;  %v3074_v62 = vld [vmem:[#allocation5 + $0x60c] ss:$16 sps:$4 sm:$0xff]  }
  0xed   :  { %1724 = vmatprep.subr.bf16.mxu1 %v3017_v63  ;;  %2259 = vmatpush1.bf16.msra.mxu0 %v3108_v0  ;;  %v3141_v63 = vld [vmem:[#allocation7 + $0xf0] ss:$8 sps:$4 sm:$0xff]  }
  0xee   :  { %2260 = vmatprep.subr.bf16.mxu0 %v3113_v1  ;;  %v3072_v0 = vld [vmem:[#allocation5 + $0x608] ss:$16 sps:$4 sm:$0xff]   ;;  %v3077_v1 = vld [vmem:[#allocation5 + $0x62c] ss:$16 sps:$4 sm:$0xff]  }
  0xf0   :  { %1725 = vmatpush1.bf16.msra.mxu1 %v3015_v2  ;;  %v3146_v2 = vld [vmem:[#allocation7 + $0x104] ss:$8 sps:$4 sm:$0xff]  }
  0xf1   :  { %1726 = vmatprep.subr.bf16.mxu1 %v3020_v3  ;;  %2261 = vmatpush1.bf16.msra.mxu0 %v3111_v4  ;;  %v3075_v3 = vld [vmem:[#allocation5 + $0x628] ss:$16 sps:$4 sm:$0xff]   ;;  %v3080_v4 = vld [vmem:[#allocation5 + $0x64c] ss:$16 sps:$4 sm:$0xff]  }
  0xf2   :  { %2262 = vmatprep.subr.bf16.mxu0 %v3116_v7  ;;  %v3078_v7 = vld [vmem:[#allocation5 + $0x648] ss:$16 sps:$4 sm:$0xff]  }
  0xf4   :  { %1727 = vmatpush1.bf16.msra.mxu1 %v3018_v8  ;;  %v3083_v8 = vld [vmem:[#allocation5 + $0x66c] ss:$16 sps:$4 sm:$0xff]  }
  0xf5   :  { %1728 = vmatprep.subr.bf16.mxu1 %v3023_v9  ;;  %2263 = vmatpush1.bf16.msra.mxu0 %v3114_v10  ;;  %v3081_v9 = vld [vmem:[#allocation5 + $0x668] ss:$16 sps:$4 sm:$0xff]   ;;  %v3086_v10 = vld [vmem:[#allocation5 + $0x68c] ss:$16 sps:$4 sm:$0xff]  }
  0xf6   :  { %2264 = vmatprep.subr.bf16.mxu0 %v3119_v12  ;;  %v3084_v12 = vld [vmem:[#allocation5 + $0x688] ss:$16 sps:$4 sm:$0xff]  }
  0xf8   :  { %1729 = vmatpush1.bf16.msra.mxu1 %v3021_v13  ;;  %v3089_v13 = vld [vmem:[#allocation5 + $0x6ac] ss:$16 sps:$4 sm:$0xff]  }
  0xf9   :  { %1741 = vmatprep.subr.bf16.mxu1 %v3026_v14  ;;  %2265 = vmatpush1.bf16.msra.mxu0 %v3117_v15  ;;  %v3092_v14 = vld [vmem:[#allocation5 + $0x6cc] ss:$16 sps:$4 sm:$0xff]  }
  0xfa   :  { %2266 = vmatprep.subr.bf16.mxu0 %v3122_v16 }
  0xfb   :  { %1731 = vmatmul.mubr.bf16.vlgmr.msra.gmra.mrb[4].mxu1 %v3364_v6  ;;  %v3131_v6 = vld [vmem:[#allocation7 + $0xb4] ss:$8 sps:$4 sm:$0xff]  }
  0xfc   :  { %1742 = vmatpush1.bf16.msra.mxu1 %v3024_v17  ;;  %1773 = vmatprep.mubr.bf16.mxu1 %v3368_v35  ;;  %v3129_v35 = vld [vmem:[#allocation7 + $0xb0] ss:$8 sps:$4 sm:$0xff]  }
  0xfd   :  { %1743 = vmatprep.subr.bf16.mxu1 %v3029_v18  ;;  %2267 = vmatpush1.bf16.msra.mxu0 %v3120_v19  ;;  %v3090_v17 = vld [vmem:[#allocation5 + $0x6c8] ss:$16 sps:$4 sm:$0xff]   ;;  %v3095_v19 = vld [vmem:[#allocation5 + $0x6ec] ss:$16 sps:$4 sm:$0xff]  }
  0xfe   :  { %2268 = vmatprep.subr.bf16.mxu0 %v3125_v21  ;;  %v3093_v21 = vld [vmem:[#allocation5 + $0x6e8] ss:$16 sps:$4 sm:$0xff]  }
 0x100   :  { %1744 = vmatpush1.bf16.msra.mxu1 %v3027_v22  ;;  %v307_v22 = vlaneseq }
 0x101   :  { %1745 = vmatprep.subr.bf16.mxu1 %v3032_v23  ;;  %2269 = vmatpush1.bf16.msra.mxu0 %v3123_v5 }
 0x102   :  { %2270 = vmatprep.subr.bf16.mxu0 %v3128_v24  ;;  %v3385_v23 = vshrl.u32 %v307_v22, 7  ;;  %v3393_v24 = vld [vmem:[%s3424_s2] sm:$0xf] }
 0x104   :  { %1746 = vmatpush1.bf16.msra.mxu1 %v3030_v25  ;;  %v3388_v5 = vsub.s32 0, %v3385_v23  ;;  %v3396_v25 = vsub.s32 1, %v3385_v23 }
 0x105   :  { %1747 = vmatprep.subr.bf16.mxu1 %v3035_v26  ;;  %2271 = vmatpush1.bf16.msra.mxu0 %v3126_v27 }
 0x106   :  { %2272 = vmatprep.subr.bf16.mxu0 %v3131_v6  ;;  %v310_v26 = vrot.slane %v3393_v24, %v3388_v5 }
 0x108   :  { %1748 = vmatpush1.bf16.msra.mxu1 %v3033_v28 }
 0x109   :  { %1749 = vmatprep.subr.bf16.mxu1 %v3038_v52  ;;  %2273 = vmatpush1.bf16.msra.mxu0 %v3129_v35 }
 0x10a   :  { %2274 = vmatprep.subr.bf16.mxu0 %v3134_v29 }
 0x10c   :  { %1750 = vmatpush1.bf16.msra.mxu1 %v3036_v30 }
 0x10d   :  { %1751 = vmatprep.subr.bf16.mxu1 %v3041_v31  ;;  %2275 = vmatpush1.bf16.msra.mxu0 %v3132_v32 }
 0x10e   :  { %2276 = vmatprep.subr.bf16.mxu0 %v3137_v53  ;;  %v3150_v53 = vld [vmem:[#allocation7 + $0x120] ss:$8 sps:$4 sm:$0xff]  }
 0x110   :  { %1752 = vmatpush1.bf16.msra.mxu1 %v3039_v33 }
 0x111   :  { %1753 = vmatprep.subr.bf16.mxu1 %v3044_v34  ;;  %2277 = vmatpush1.bf16.msra.mxu0 %v3135_v55  ;;  %v3153_v55 = vld [vmem:[#allocation7 + $0x130] ss:$8 sps:$4 sm:$0xff]  }
 0x112   :  { %2278 = vmatprep.subr.bf16.mxu0 %v3140_v57  ;;  %v3156_v57 = vld [vmem:[#allocation7 + $0x140] ss:$8 sps:$4 sm:$0xff]  }
 0x114   :  { %1754 = vmatpush1.bf16.msra.mxu1 %v3042_v36 }
 0x115   :  { %1755 = vmatprep.subr.bf16.mxu1 %v3047_v37  ;;  %2279 = vmatpush1.bf16.msra.mxu0 %v3138_v59  ;;  %v3159_v59 = vld [vmem:[#allocation7 + $0x150] ss:$8 sps:$4 sm:$0xff]  }
 0x116   :  { %2280 = vmatprep.subr.bf16.mxu0 %v3143_v61  ;;  %v3162_v61 = vld [vmem:[#allocation7 + $0x160] ss:$8 sps:$4 sm:$0xff]  }
 0x118   :  { %1756 = vmatpush1.bf16.msra.mxu1 %v3045_v38 }
 0x119   :  { %1757 = vmatprep.subr.bf16.mxu1 %v3050_v39  ;;  %2281 = vmatpush1.bf16.msra.mxu0 %v3141_v63  ;;  %v3165_v63 = vld [vmem:[#allocation7 + $0x170] ss:$8 sps:$4 sm:$0xff]  }
 0x11a   :  { %2293 = vmatprep.subr.bf16.mxu0 %v3146_v2  ;;  %v3173_v2 = vld [vmem:[#allocation7 + $0x194] ss:$8 sps:$4 sm:$0xff]  }
 0x11c   :  { %1758 = vmatpush1.bf16.msra.mxu1 %v3048_v40 }
 0x11d   :  { %1759 = vmatprep.subr.bf16.mxu1 %v3053_v41 }
 0x120   :  { %1760 = vmatpush1.bf16.msra.mxu1 %v3051_v42 }
 0x121   :  { %1761 = vmatprep.subr.bf16.mxu1 %v3056_v44 }
 0x124   :  { %1762 = vmatpush1.bf16.msra.mxu1 %v3054_v45 }
 0x125   :  { %1763 = vmatprep.subr.bf16.mxu1 %v3059_v46 }
 0x128   :  { %1764 = vmatpush1.bf16.msra.mxu1 %v3057_v47 }
 0x129   :  { %1765 = vmatprep.subr.bf16.mxu1 %v3062_v48  ;;  %v3144_v48 = vld [vmem:[#allocation7 + $0x100] ss:$8 sps:$4 sm:$0xff]  }
 0x12c   :  { %1766 = vmatpush1.bf16.msra.mxu1 %v3060_v49  ;;  %v3149_v49 = vld [vmem:[#allocation7 + $0x114] ss:$8 sps:$4 sm:$0xff]  }
 0x12d   :  { %1767 = vmatprep.subr.bf16.mxu1 %v3065_v50  ;;  %v3147_v50 = vld [vmem:[#allocation7 + $0x110] ss:$8 sps:$4 sm:$0xff]  }
 0x130   :  { %1768 = vmatpush1.bf16.msra.mxu1 %v3063_v51  ;;  %v3152_v51 = vld [vmem:[#allocation7 + $0x124] ss:$8 sps:$4 sm:$0xff]  }
 0x131   :  { %1769 = vmatprep.subr.bf16.mxu1 %v3068_v54  ;;  %v3155_v54 = vld [vmem:[#allocation7 + $0x134] ss:$8 sps:$4 sm:$0xff]  }
 0x134   :  { %1770 = vmatpush1.bf16.msra.mxu1 %v3066_v56  ;;  %v3158_v56 = vld [vmem:[#allocation7 + $0x144] ss:$8 sps:$4 sm:$0xff]  }
 0x135   :  { %1771 = vmatprep.subr.bf16.mxu1 %v3071_v58  ;;  %v3161_v58 = vld [vmem:[#allocation7 + $0x154] ss:$8 sps:$4 sm:$0xff]  }
 0x138   :  { %1772 = vmatpush1.bf16.msra.mxu1 %v3069_v60  ;;  %v3164_v60 = vld [vmem:[#allocation7 + $0x164] ss:$8 sps:$4 sm:$0xff]  }
 0x139   :  { %1784 = vmatprep.subr.bf16.mxu1 %v3074_v62  ;;  %v3167_v62 = vld [vmem:[#allocation7 + $0x174] ss:$8 sps:$4 sm:$0xff]  }
 0x13b   :  { %1774 = vmatmul.mubr.bf16.vlgmr.msra.gmra.mrb[4].mxu1 %v3371_v11  ;;  %v3087_v11 = vld [vmem:[#allocation5 + $0x6a8] ss:$16 sps:$4 sm:$0xff]  }
 0x13c   :  { %1785 = vmatpush1.bf16.msra.mxu1 %v3072_v0  ;;  %1816 = vmatprep.mubr.bf16.mxu1 %v3279_v20  ;;  %v3170_v0 = vld [vmem:[#allocation7 + $0x184] ss:$8 sps:$4 sm:$0xff]  }
 0x13d   :  { %1786 = vmatprep.subr.bf16.mxu1 %v3077_v1  ;;  %v3168_v1 = vld [vmem:[#allocation7 + $0x180] ss:$8 sps:$4 sm:$0xff]  }
 0x140   :  { %1787 = vmatpush1.bf16.msra.mxu1 %v3075_v3  ;;  %v3171_v3 = vld [vmem:[#allocation7 + $0x190] ss:$8 sps:$4 sm:$0xff]  }
 0x141   :  { %1788 = vmatprep.subr.bf16.mxu1 %v3080_v4  ;;  %v3176_v4 = vld [vmem:[#allocation7 + $0x1a4] ss:$8 sps:$4 sm:$0xff]  }
 0x144   :  { %1789 = vmatpush1.bf16.msra.mxu1 %v3078_v7  ;;  %v3174_v7 = vld [vmem:[#allocation7 + $0x1a0] ss:$8 sps:$4 sm:$0xff]  }
 0x145   :  { %1790 = vmatprep.subr.bf16.mxu1 %v3083_v8  ;;  %v3179_v8 = vld [vmem:[#allocation7 + $0x1b4] ss:$8 sps:$4 sm:$0xff]  }
 0x148   :  { %1791 = vmatpush1.bf16.msra.mxu1 %v3081_v9  ;;  %v3177_v9 = vld [vmem:[#allocation7 + $0x1b0] ss:$8 sps:$4 sm:$0xff]  }
 0x149   :  { %1792 = vmatprep.subr.bf16.mxu1 %v3086_v10  ;;  %v3182_v10 = vld [vmem:[#allocation7 + $0x1c4] ss:$8 sps:$4 sm:$0xff]  }
 0x14c   :  { %1793 = vmatpush1.bf16.msra.mxu1 %v3084_v12  ;;  %v3180_v12 = vld [vmem:[#allocation7 + $0x1c0] ss:$8 sps:$4 sm:$0xff]  }
 0x14d   :  { %1794 = vmatprep.subr.bf16.mxu1 %v3089_v13  ;;  %v3185_v13 = vld [vmem:[#allocation7 + $0x1d4] ss:$8 sps:$4 sm:$0xff]  }
 0x14e   :  { %v1517_v20 = vpop.f32.mrb[0].mxu1 }
 0x14f   :  { %v1519_v15 = vpop.f32.mrb[1].mxu1  ;;  %v1518_v27 = vadd.f32 %v1517_v20, %v310_v26  ;;  %v3186_v20 = vld [vmem:[#allocation7 + $0x1e0] ss:$8 sps:$4 sm:$0xff]  }
 0x150   :  { %v1521_v16 = vpop.f32.mrb[2].mxu1  ;;  %1795 = vmatpush1.bf16.msra.mxu1 %v3087_v11  ;;  %v3183_v11 = vld [vmem:[#allocation7 + $0x1d0] ss:$8 sps:$4 sm:$0xff]  }
 0x151   :  { %v1523_v18 = vpop.f32.mrb[3].mxu1  ;;  %1796 = vmatprep.subr.bf16.mxu1 %v3092_v14  ;;  %v1522_v52 = vadd.f32 %v1521_v16, %v310_v26  ;;  %v3188_v14 = vld [vmem:[#allocation7 + $0x1e4] ss:$8 sps:$4 sm:$0xff]   ;;  %v3189_v16 = vld [vmem:[#allocation7 + $0x1f0] ss:$8 sps:$4 sm:$0xff]  }
 0x154   :  { %1797 = vmatpush1.bf16.msra.mxu1 %v3090_v17  ;;  %v317_v17 = vsub.s32 2, %v3385_v23 }
 0x155   :  { %1798 = vmatprep.subr.bf16.mxu1 %v3095_v19 }
 0x156   :  { %v318_v19 = vrot.slane %v3393_v24, %v317_v17 }
 0x158   :  { %1799 = vmatpush1.bf16.msra.mxu1 %v3093_v21 }
 0x15b   :  { %1817 = vmatmul.mubr.bf16.vlgmr.msra.gmra.mrb[4].mxu1 %v3377_v43  ;;  %v314_v43 = vrot.slane %v3393_v24, %v3396_v25 }
 0x15d   :  { %v1520_v6 = vadd.f32 %v1519_v15, %v314_v43  ;;  %v1524_v30 = vadd.f32 %v1523_v18, %v314_v43  ;;  %v3191_v15 = vld [vmem:[#allocation7 + $0x1f4] ss:$8 sps:$4 sm:$0xff]   ;;  %v321_v18 = vsub.s32 3, %v3385_v23 }
 0x15f   :  { %v322_v21 = vrot.slane %v3393_v24, %v321_v18 }
 0x1af   :  { %v1646_v28 = vpop.f32.mrb[0].mxu0 }
 0x1b0   :  { %v2701_v35 = vadd.f32 %v1646_v28, %v1518_v27  ;;  %v1648_v29 = vpop.f32.mrb[1].mxu0 }
 0x1b1   :  { %v2703_v31 = vadd.f32 %v1648_v29, %v1520_v6  ;;  %v1650_v32 = vpop.f32.mrb[2].mxu0 }
 0x1b2   :  { %v1835_v33 = vmul.f32 0.2, %v2701_v35  ;;  %v2705_v34 = vadd.f32 %v1650_v32, %v1522_v52  ;;  %v1652_v36 = vpop.f32.mrb[3].mxu0  ;;  %vm1827_vm0 = vcmp.gt.f32.partialorder %v2701_v35, 0.0 }
 0x1b3   :  { %v1836_v37 = vmul.f32 0.2, %v2703_v31  ;;  %v2707_v38 = vadd.f32 %v1652_v36, %v1524_v30  ;;  %vm1828_vm1 = vcmp.gt.f32.partialorder %v2703_v31, 0.0 }
 0x1b4   :  { %vm1831_vm2 = vcmp.gt.f32.partialorder %v2705_v34, 0.0  ;;  %v1839_v39 = vmul.f32 0.2, %v2705_v34  ;;  %v1843_v41 = vsel %vm1827_vm0, %v2701_v35, %v1835_v33 }
 0x1b5   :  { %vm1832_vm3 = vcmp.gt.f32.partialorder %v2707_v38, 0.0  ;;  %v1840_v40 = vmul.f32 0.2, %v2707_v38  ;;  %v1844_v45 = vsel %vm1828_vm1, %v2703_v31, %v1836_v37 }
 0x1b6   :  { %v1847_v42 = vsel %vm1831_vm2, %v2705_v34, %v1839_v39 }
 0x1b7   :  { %v1851_v44 = vpack.c.bf16 %v1847_v42, %v1843_v41  ;;  %v1848_v46 = vsel %vm1832_vm3, %v2707_v38, %v1840_v40  ;;  %v79_v38 = vld [vmem:[%s3426_s4] sm:$0x3] }
 0x1b8   :  { %v1852_v47 = vpack.c.bf16 %v1848_v46, %v1844_v45  ;;  %v1923_v39 = vrot.slane %v79_v38, %v3388_v5  ;;  %v1927_v40 = vrot.slane %v79_v38, %v3396_v25  ;;  %v81_v41 = vld [vmem:[%s3427_s5] sm:$0x3] }
 0x1ba   :  { %2282 = vmatprep.mubr.bf16.mxu0 %v1852_v47 }
 0x1bb   :  { %2283 = vmatmul.mubr.bf16.vlgmr.msra.gmra.mrb[4].mxu0 %v1851_v44 }
 0x1bc   :  { %2294 = vmatpush1.bf16.msra.mxu0 %v3144_v48  ;;  %v2352_v48 = vrot.slane %v81_v41, %v3388_v5 }
 0x1bd   :  { %2295 = vmatprep.subr.bf16.mxu0 %v3149_v49 }
 0x1c0   :  { %2296 = vmatpush1.bf16.msra.mxu0 %v3147_v50 }
 0x1c1   :  { %2297 = vmatprep.subr.bf16.mxu0 %v3152_v51 }
 0x1c4   :  { %2298 = vmatpush1.bf16.msra.mxu0 %v3150_v53  ;;  %v2356_v53 = vrot.slane %v81_v41, %v3396_v25  ;;  %v2699_v25 = vld [vmem:[#allocation2] ss:$0 sm:$0xff] }
 0x1c5   :  { %2299 = vmatprep.subr.bf16.mxu0 %v3155_v54 }
 0x1c8   :  { %2300 = vmatpush1.bf16.msra.mxu0 %v3153_v55 }
 0x1c9   :  { %2301 = vmatprep.subr.bf16.mxu0 %v3158_v56 }
 0x1cc   :  { %2302 = vmatpush1.bf16.msra.mxu0 %v3156_v57 }
 0x1cd   :  { %2303 = vmatprep.subr.bf16.mxu0 %v3161_v58 }
 0x1d0   :  { %2304 = vmatpush1.bf16.msra.mxu0 %v3159_v59 }
 0x1d1   :  { %2305 = vmatprep.subr.bf16.mxu0 %v3164_v60 }
 0x1d4   :  { %2306 = vmatpush1.bf16.msra.mxu0 %v3162_v61 }
 0x1d5   :  { %2307 = vmatprep.subr.bf16.mxu0 %v3167_v62 }
 0x1d8   :  { %2308 = vmatpush1.bf16.msra.mxu0 %v3165_v63 }
 0x1d9   :  { %2309 = vmatprep.subr.bf16.mxu0 %v3170_v0 }
 0x1dc   :  { %2310 = vmatpush1.bf16.msra.mxu0 %v3168_v1 }
 0x1dd   :  { %2311 = vmatprep.subr.bf16.mxu0 %v3173_v2 }
 0x1e0   :  { %2312 = vmatpush1.bf16.msra.mxu0 %v3171_v3 }
 0x1e1   :  { %2313 = vmatprep.subr.bf16.mxu0 %v3176_v4 }
 0x1e4   :  { %2314 = vmatpush1.bf16.msra.mxu0 %v3174_v7 }
 0x1e5   :  { %2315 = vmatprep.subr.bf16.mxu0 %v3179_v8 }
 0x1e8   :  { %2316 = vmatpush1.bf16.msra.mxu0 %v3177_v9 }
 0x1e9   :  { %2317 = vmatprep.subr.bf16.mxu0 %v3182_v10 }
 0x1ec   :  { %2318 = vmatpush1.bf16.msra.mxu0 %v3180_v12 }
 0x1ed   :  { %2319 = vmatprep.subr.bf16.mxu0 %v3185_v13 }
 0x1f0   :  { %2320 = vmatpush1.bf16.msra.mxu0 %v3183_v11 }
 0x1f1   :  { %2321 = vmatprep.subr.bf16.mxu0 %v3188_v14 }
 0x1f4   :  { %2322 = vmatpush1.bf16.msra.mxu0 %v3186_v20 }
 0x1f5   :  { %2323 = vmatprep.subr.bf16.mxu0 %v3191_v15 }
 0x1f8   :  { %2324 = vmatpush1.bf16.msra.mxu0 %v3189_v16 }
 0x22e   :  { %v1818_v22 = vpop.f32.mrb[4].mxu1 }
 0x22f   :  { %v2708_v26 = vadd.f32 %v1818_v22, %v318_v19  ;;  %v1820_v43 = vpop.f32.mrb[5].mxu1 }
 0x230   :  { %v2709_v27 = vadd.f32 %v1820_v43, %v322_v21  ;;  %v1822_v6 = vpop.f32.mrb[6].mxu1 }
 0x231   :  { %v1837_v28 = vmul.f32 0.2, %v2708_v26  ;;  %v2710_v52 = vadd.f32 %v1822_v6, %v318_v19  ;;  %v1824_v35 = vpop.f32.mrb[7].mxu1  ;;  %vm1829_vm4 = vcmp.gt.f32.partialorder %v2708_v26, 0.0 }
 0x232   :  { %v1838_v29 = vmul.f32 0.2, %v2709_v27  ;;  %v2711_v30 = vadd.f32 %v1824_v35, %v322_v21  ;;  %vm1830_vm5 = vcmp.gt.f32.partialorder %v2709_v27, 0.0 }
 0x233   :  { %vm1833_vm6 = vcmp.gt.f32.partialorder %v2710_v52, 0.0  ;;  %v1841_v31 = vmul.f32 0.2, %v2710_v52  ;;  %v1845_v32 = vsel %vm1829_vm4, %v2708_v26, %v1837_v28 }
 0x234   :  { %vm1834_vm7 = vcmp.gt.f32.partialorder %v2711_v30, 0.0  ;;  %v1842_v23 = vmul.f32 0.2, %v2711_v30  ;;  %v1846_v24 = vsel %vm1830_vm5, %v2709_v27, %v1838_v29 }
 0x235   :  { %v1849_v33 = vsel %vm1833_vm6, %v2710_v52, %v1841_v31 }
 0x236   :  { %v1853_v34 = vpack.c.bf16 %v1849_v33, %v1845_v32  ;;  %v1850_v36 = vsel %vm1834_vm7, %v2711_v30, %v1842_v23 }
 0x237   :  { %v1854_v37 = vpack.c.bf16 %v1850_v36, %v1846_v24 }
 0x239   :  { %2325 = vmatprep.mubr.bf16.mxu0 %v1854_v37 }
 0x23a   :  { %2326 = vmatmul.mubr.bf16.vlgmr.msra.gmra.mrb[4].mxu0 %v1853_v34 }
 0x30d   :  { %v2327_v42 = vpop.f32.mrb[4].mxu0 }
 0x30e   :  { %v2712_v44 = vadd.f32 %v2327_v42, %v1923_v39  ;;  %v2329_v45 = vpop.f32.mrb[5].mxu0 }
 0x30f   :  { %v2713_v46 = vadd.f32 %v2329_v45, %v1927_v40  ;;  %v2331_v47 = vpop.f32.mrb[6].mxu0 }
 0x310   :  { %vm2336_vm8 = vcmp.gt.f32.partialorder %v2712_v44, 0.0  ;;  %v2340_v49 = vmul.f32 0.2, %v2712_v44  ;;  %v2714_v50 = vadd.f32 %v2331_v47, %v1923_v39  ;;  %v2333_v51 = vpop.f32.mrb[7].mxu0 }
 0x311   :  { %vm2337_vm9 = vcmp.gt.f32.partialorder %v2713_v46, 0.0  ;;  %v2341_v54 = vmul.f32 0.2, %v2713_v46  ;;  %v2715_v55 = vadd.f32 %v2333_v51, %v1927_v40 }
 0x312   :  { %vm2338_vm10 = vcmp.gt.f32.partialorder %v2714_v50, 0.0  ;;  %v2342_v56 = vmul.f32 0.2, %v2714_v50  ;;  %v2344_v57 = vsel %vm2336_vm8, %v2712_v44, %v2340_v49 }
 0x313   :  { %vm2339_vm11 = vcmp.gt.f32.partialorder %v2715_v55, 0.0  ;;  %v2343_v58 = vmul.f32 0.2, %v2715_v55  ;;  %v2345_v59 = vsel %vm2337_vm9, %v2713_v46, %v2341_v54  ;;  %v2359_v60 = vmul.f32 %v2352_v48, %v2344_v57 }
 0x314   :  { %v2360_v61 = vmul.f32 %v2356_v53, %v2345_v59  ;;  %v2346_v62 = vsel %vm2338_vm10, %v2714_v50, %v2342_v56 }
 0x315   :  { %v2347_v63 = vsel %vm2339_vm11, %v2715_v55, %v2343_v58  ;;  %v2361_v5 = vmul.f32 %v2352_v48, %v2346_v62 }
 0x316   :  { %v2363_v0 = vadd.f32 %v2360_v61, %v2359_v60  ;;  %v2362_v1 = vmul.f32 %v2356_v53, %v2347_v63 }
 0x318   :  { %2364 = vadd.xlane.f32.xlu0 %v2363_v0  ;;  %v2366_v2 = vadd.f32 %v2362_v1, %v2361_v5 }
 0x31c   :  { %2367 = vadd.xlane.f32.xlu0 %v2366_v2 }
 0x3a5   :  { %v2365_v3 = vpop.xlane.xlu0 %2364 }
 0x3a6   :  { %v2375_v4 = vadd.f32 %v2699_v25, %v2365_v3 }
 0x3a8   :  { %v2377_v7 = vand.u32 2147483647, %v2375_v4  ;;  %vm2385_vm12 = vcmp.ge.f32.partialorder %v2375_v4, 0.0 }
 0x3a9   :  { %v2368_v8 = vpop.xlane.xlu0 %2367 }
 0x3aa   :  { %v2379_v9 = vsub.f32 0.0, %v2377_v7  ;;  %v2376_v10 = vadd.f32 %v2699_v25, %v2368_v8 }
 0x3ac   :  { %v2381_v12 = vmul.f32 1.442695, %v2379_v9  ;;  %v2378_v13 = vand.u32 2147483647, %v2376_v10  ;;  %vm2386_vm14 = vcmp.ge.f32.partialorder %v2376_v10, 0.0 }
 0x3ae   :  { %3192 = vpow2.f32 %v2381_v12  ;;  %v2380_v11 = vsub.f32 0.0, %v2378_v13 }
 0x3b0   :  { %v2383_v14 = vmul.f32 1.442695, %v2380_v11 }
 0x3b2   :  { %3194 = vpow2.f32 %v2383_v14 }
 0x3b8   :  { %v3193_v20 = vpop.eup %3192 }
 0x3b9   :  { %v2389_v15 = vadd.f32 1.0, %v3193_v20  ;;  %v2387_v19 = vsel %vm2385_vm12, 1.0, %v3193_v20 }
 0x3bb   :  { %3196 = vrcp.f32 %v2389_v15 }
 0x3bc   :  { %v3195_v16 = vpop.eup %3194 }
 0x3bd   :  { %v2390_v17 = vadd.f32 1.0, %v3195_v16  ;;  %v2388_v26 = vsel %vm2386_vm14, 1.0, %v3195_v16 }
 0x3bf   :  { %3198 = vrcp.f32 %v2390_v17 }
 0x3c5   :  { %v3197_v18 = vpop.eup %3196 }
 0x3c6   :  { %v2393_v21 = vmul.f32 %v3197_v18, %v2387_v19 }
 0x3c8   :  { %2396 = vst.msk [vmem:[%s3429_s7] sm:$0xff] %vm2395_vm13, %v2393_v21 }
 0x3c9   :  { %v3199_v22 = vpop.eup %3198 }
 0x3ca   :  { %v2394_v43 = vmul.f32 %v3199_v22, %v2388_v26 }
 0x3cc   :  { %2397 = vst.msk [vmem:[%s3429_s7 + $0x8] sm:$0xff] %vm2395_vm13, %v2394_v43 }
 0x3cd   :  { %2402 = vsyncpa [#allocation4], 1 }
 0x3ce   :  { %2403 = vsyncpa [#allocation6], 1 }

</bundles_post_ra>
